<compile_context>
chip_gen: v7x
topology: tpu7x:2x2x1
jax: 0.10.0
libtpu: 0.0.40
codegen_flags: <defaults>
</compile_context>

<pallas_src>
import functools

import jax
import jax.numpy as jnp
import numpy as np
from jax.experimental import pallas as pl
from jax.experimental.pallas import tpu as pltpu

EPS = 1e-5
DOT_DTYPE = jnp.bfloat16   # MXU-native operand dtype (f32 accumulation)
ACT_DTYPE = jnp.bfloat16   # storage dtype for intermediate activations t1 / t2


# --------------------------------------------------------------------------
# Pallas kernels
# --------------------------------------------------------------------------

def stats_kernel(x_ref, stat_ref):
    """Per-tile partial (sum, sum_sq), packed into an (8, C) sublane-aligned block."""
    x = x_ref[...].astype(jnp.float32)
    s = jnp.sum(x, axis=0, keepdims=True)
    q = jnp.sum(x * x, axis=0, keepdims=True)
    stat_ref[0] = jnp.concatenate(
        [s, q, jnp.zeros((6, x.shape[1]), jnp.float32)], axis=0)


def stage1_kernel(x_ref, s1_ref, b1_ref, w1_ref, t1_ref, stat_ref):
    """t1 = relu(bn1(x)) @ w1 (1x1 conv1), fused with partial BN stats of t1."""
    p = jnp.maximum(x_ref[...].astype(jnp.float32) * s1_ref[...] + b1_ref[...], 0.0)
    t1 = jnp.dot(p.astype(DOT_DTYPE), w1_ref[...],
                 preferred_element_type=jnp.float32)                 # bf16 MXU
    t1s = t1.astype(t1_ref.dtype)
    t1_ref[...] = t1s
    t1f = t1s.astype(jnp.float32)          # stats on exactly what is stored
    s = jnp.sum(t1f, axis=0, keepdims=True)
    q = jnp.sum(t1f * t1f, axis=0, keepdims=True)
    stat_ref[0] = jnp.concatenate(
        [s, q, jnp.zeros((6, t1f.shape[1]), jnp.float32)], axis=0)


def conv2_kernel(t1_ref, s2_ref, b2_ref, w2_ref, t2_ref, stat_ref, pad_ref, *,
                 stride):
    """Fused bn2+relu + zero-pad (VMEM scratch) + 3x3 conv + BN stats of t2.

    The 3x3 conv is nine accumulated (H*W, Cin) x (Cin, P) matmuls over shifted
    views of the padded scratch (no im2col buffer).  One grid step = one image,
    stride-1 output; for stride > 1 the stats are restricted in-kernel to the
    strided rows and the caller subsamples t2.
    # TODO(synk): stride > 1 -> read the taps with strided pl.ds so only the
    #             strided outputs are computed (saves ~75% of the FLOPs).
    """
    _, H, W, Cp = t1_ref.shape
    P = w2_ref.shape[-1]

    # bn2 + relu in f32 on the VPU.
    a = jnp.maximum(t1_ref[0].astype(jnp.float32) * s2_ref[...] + b2_ref[...], 0.0)

    # Interior write + zero ONLY the 1-pixel border (never overwritten).
    pad_ref[1:H + 1, 1:W + 1, :] = a
    zrow = jnp.zeros((1, W + 2, Cp), pad_ref.dtype)
    zcol = jnp.zeros((H, 1, Cp), pad_ref.dtype)
    pad_ref[0:1, :, :] = zrow
    pad_ref[H + 1:H + 2, :, :] = zrow
    pad_ref[1:H + 1, 0:1, :] = zcol
    pad_ref[1:H + 1, W + 1:W + 2, :] = zcol

    # Nine shifted-view dots, accumulated in f32 (pad scratch stays f32 so all
    # loads are plain unaligned sublane loads; the per-tap bf16 cast feeding the
    # MXU is negligible VPU work vs. the MACs).
    acc = jnp.zeros((H * W, P), jnp.float32)
    for ky in range(3):
        for kx in range(3):
            lhs = pad_ref[ky:ky + H, kx:kx + W, :].reshape(H * W, Cp)
            acc = acc + jnp.dot(lhs.astype(DOT_DTYPE), w2_ref[ky * 3 + kx],
                                preferred_element_type=jnp.float32)

    t2s = acc.astype(t2_ref.dtype)
    t2_ref[0] = t2s

    # BN3 partial stats on exactly what is stored (bf16-quantized), restricted to
    # the strided output rows when stride > 1 (no extra stats pass needed later).
    t2f = t2s.astype(jnp.float32)
    if stride > 1:
        r = jax.lax.broadcasted_iota(jnp.int32, (H * W, P), 0)
        keep = ((r // W) % stride == 0) & ((r % W) % stride == 0)
        t2f = jnp.where(keep, t2f, 0.0)
    s = jnp.sum(t2f, axis=0, keepdims=True)
    q = jnp.sum(t2f * t2f, axis=0, keepdims=True)
    stat_ref[0] = jnp.concatenate(
        [s, q, jnp.zeros((6, P), jnp.float32)], axis=0)


def final_kernel_convsc(t2_ref, s3_ref, b3_ref, w3_ref, x_ref, s1_ref, b1_ref,
                        wsc_ref, o_ref):
    """out = relu(bn3(t2)) @ w3 + relu(bn1(x)) @ wsc   (1x1 shortcut fused here)."""
    a3 = jnp.maximum(t2_ref[...].astype(jnp.float32) * s3_ref[...] + b3_ref[...], 0.0)
    y = jnp.dot(a3.astype(DOT_DTYPE), w3_ref[...], preferred_element_type=jnp.float32)
    p1 = jnp.maximum(x_ref[...].astype(jnp.float32) * s1_ref[...] + b1_ref[...], 0.0)
    y = y + jnp.dot(p1.astype(DOT_DTYPE), wsc_ref[...],
                    preferred_element_type=jnp.float32)
    o_ref[...] = y.astype(o_ref.dtype)


def final_kernel_identity(t2_ref, s3_ref, b3_ref, w3_ref, x_ref, s1_ref, b1_ref,
                          o_ref):
    """out = relu(bn3(t2)) @ w3 + relu(bn1(x))   (identity shortcut; no eye matmul)."""
    a3 = jnp.maximum(t2_ref[...].astype(jnp.float32) * s3_ref[...] + b3_ref[...], 0.0)
    y = jnp.dot(a3.astype(DOT_DTYPE), w3_ref[...], preferred_element_type=jnp.float32)
    p1 = jnp.maximum(x_ref[...].astype(jnp.float32) * s1_ref[...] + b1_ref[...], 0.0)
    o_ref[...] = (y + p1).astype(o_ref.dtype)


# --------------------------------------------------------------------------
# Wrappers
# --------------------------------------------------------------------------

def _params(n_axes=1):
    # 48 MiB scoped VMEM: generous vs. v5e/v6e's scoped defaults (128 MiB
    # physical), still safe under v7x's 64 MiB physical VMEM.
    return pltpu.CompilerParams(dimension_semantics=("parallel",) * n_axes,
                                vmem_limit_bytes=48 << 20)


def _pick_tile(m, row_bytes, budget=12 << 20):
    """Largest row tile that divides m and keeps the double-buffered working set
    inside a per-generation-safe VMEM budget."""
    cap = max(8, budget // (2 * max(row_bytes, 1)))
    for t in (4096, 2048, 1024, 512, 256, 128, 64, 32, 16, 8):
        if t <= cap and m % t == 0:
            return t
    return m


def _finish_stats(stat, count):
    """stat: (nt, 8, C) partials, row 0 = sum, row 1 = sum_sq."""
    total = jnp.sum(stat[:, 0, :], axis=0)
    total_sq = jnp.sum(stat[:, 1, :], axis=0)
    mean = total / count
    # E[x^2] - E[x]^2 is fine at these scales (clamp guards tiny negative residues).
    # TODO(synk): use a shifted / two-pass variance for pass 1 if raw inputs ever
    #             have |mean| >> std.
    var = jnp.maximum(total_sq / count - mean * mean, 0.0)
    return mean, var


def batch_stats(x_flat):
    """Standalone per-channel (mean, biased var); only needed for the input x."""
    Mr, C = x_flat.shape
    tm = _pick_tile(Mr, C * x_flat.dtype.itemsize)
    nt = Mr // tm
    stat = pl.pallas_call(
        stats_kernel,
        out_shape=jax.ShapeDtypeStruct((nt, 8, C), jnp.float32),
        grid=(nt,),
        in_specs=[pl.BlockSpec((tm, C), lambda i: (i, 0))],
        out_specs=pl.BlockSpec((1, 8, C), lambda i: (i, 0, 0)),
        compiler_params=_params(),
    )(x_flat)
    return _finish_stats(stat, Mr)


def bn_fold(mean, var, gamma, beta):
    s = gamma / jnp.sqrt(var + EPS)
    b = beta - mean * s
    return (s.reshape(1, -1).astype(jnp.float32),
            b.reshape(1, -1).astype(jnp.float32))


@functools.partial(jax.jit, static_argnames=("stride",))
def preact_bottleneck(x_nchw, p, stride=1):
    N, Cin, H, W = x_nchw.shape
    P = p["w1"].shape[0]                       # planes
    Cout = 4 * P                               # expansion * planes
    M = N * H * W
    Ho = (H - 1) // stride + 1
    Wo = (W - 1) // stride + 1
    M2 = N * Ho * Wo

    if stride != 1 and p["wsc"] is None:
        raise ValueError("stride > 1 requires the 1x1 conv shortcut (as in PyTorch).")

    # NHWC transpose + bf16 cast fused into one XLA pass over x; every kernel
    # that reads x sees bf16 (half the HBM traffic).  BN math stays in f32.
    x_nhwc = jnp.transpose(x_nchw, (0, 2, 3, 1)).astype(DOT_DTYPE)
    x = x_nhwc.reshape(M, Cin)

    # 1x1 convs as (Cin, Cout) matmuls; 3x3 as 9 per-tap (Cin, Cout) matmuls.
    w1 = p["w1"][:, :, 0, 0].T.astype(DOT_DTYPE)                          # (Cin, P)
    w2 = jnp.transpose(p["w2"], (2, 3, 1, 0)).reshape(9, P, P).astype(DOT_DTYPE)
    w3 = p["w3"][:, :, 0, 0].T.astype(DOT_DTYPE)                          # (P, 4P)
    wsc = (p["wsc"][:, :, 0, 0].T.astype(DOT_DTYPE)                       # (Cin, 4P)
           if p["wsc"] is not None else None)

    # ---- pass 1: batch stats of x (the only standalone stats pass) ----------
    mean1, var1 = batch_stats(x)
    s1, b1 = bn_fold(mean1, var1, p["g1"], p["b1"])

    # ---- pass 2: relu(bn1(x)) @ w1 fused with BN stats of t1 ----------------
    tm = _pick_tile(M, 2 * (Cin + P) + 4 * P)
    nt = M // tm
    t1, stat1 = pl.pallas_call(
        stage1_kernel,
        out_shape=(jax.ShapeDtypeStruct((M, P), ACT_DTYPE),
                   jax.ShapeDtypeStruct((nt, 8, P), jnp.float32)),
        grid=(nt,),
        in_specs=[pl.BlockSpec((tm, Cin), lambda i: (i, 0)),
                  pl.BlockSpec((1, Cin), lambda i: (0, 0)),
                  pl.BlockSpec((1, Cin), lambda i: (0, 0)),
                  pl.BlockSpec((Cin, P), lambda i: (0, 0))],
        out_specs=(pl.BlockSpec((tm, P), lambda i: (i, 0)),
                   pl.BlockSpec((1, 8, P), lambda i: (i, 0, 0))),
        compiler_params=_params(),
    )(x, s1, b1, w1)
    mean2, var2 = _finish_stats(stat1, M)
    s2, b2 = bn_fold(mean2, var2, p["g2"], p["b2"])

    # ---- pass 3: fused bn2+relu + in-VMEM pad + 3x3 conv + BN stats of t2 ---
    # TODO(synk): spatial row tiling (halo via manual DMA) for production H,W /
    #             v7x 2-TensorCore load balance.
    t2_full, stat2 = pl.pallas_call(
        functools.partial(conv2_kernel, stride=stride),
        out_shape=(jax.ShapeDtypeStruct((N, H * W, P), ACT_DTYPE),
                   jax.ShapeDtypeStruct((N, 8, P), jnp.float32)),
        grid=(N,),
        in_specs=[pl.BlockSpec((1, H, W, P), lambda n: (n, 0, 0, 0)),
                  pl.BlockSpec((1, P), lambda n: (0, 0)),
                  pl.BlockSpec((1, P), lambda n: (0, 0)),
                  pl.BlockSpec((9, P, P), lambda n: (0, 0, 0))],
        out_specs=(pl.BlockSpec((1, H * W, P), lambda n: (n, 0, 0)),
                   pl.BlockSpec((1, 8, P), lambda n: (n, 0, 0))),
        scratch_shapes=[pltpu.VMEM((H + 2, W + 2, P), jnp.float32)],
        compiler_params=_params(),
    )(t1.reshape(N, H, W, P), s2, b2, w2)

    mean3, var3 = _finish_stats(stat2, M2)
    s3, b3 = bn_fold(mean3, var3, p["g3"], p["b3"])

    if stride == 1:
        t2 = t2_full.reshape(M2, P)
        x_sc = x                                   # shortcut rows == output rows
    else:
        # For k=3 / pad=1, the strided conv equals the stride-1 conv subsampled;
        # the kernel already emitted BN3 stats for exactly these rows.
        # TODO(synk): compute only the strided outputs in-kernel (strided pl.ds
        #             taps) so this XLA gather and the extra FLOPs disappear.
        t2 = t2_full.reshape(N, H, W, P)[:, ::stride, ::stride, :].reshape(M2, P)
        x_sc = x_nhwc[:, ::stride, ::stride, :].reshape(M2, Cin)

    # ---- pass 4: relu(bn3(t2)) @ w3 + shortcut (fused; no sc intermediate) ---
    tm2 = _pick_tile(M2, 2 * (P + Cin) + 4 * Cout)
    nt2 = M2 // tm2
    common_in = [pl.BlockSpec((tm2, P), lambda i: (i, 0)),
                 pl.BlockSpec((1, P), lambda i: (0, 0)),
                 pl.BlockSpec((1, P), lambda i: (0, 0)),
                 pl.BlockSpec((P, Cout), lambda i: (0, 0)),
                 pl.BlockSpec((tm2, Cin), lambda i: (i, 0)),
                 pl.BlockSpec((1, Cin), lambda i: (0, 0)),
                 pl.BlockSpec((1, Cin), lambda i: (0, 0))]
    # TODO(synk): at demo widths the output lane dim is only 16 (masked stores);
    #             production Cout >= 128 makes these stores lane-dense.
    if wsc is not None:
        out = pl.pallas_call(
            final_kernel_convsc,
            out_shape=jax.ShapeDtypeStruct((M2, Cout), jnp.float32),
            grid=(nt2,),
            in_specs=common_in + [pl.BlockSpec((Cin, Cout), lambda i: (0, 0))],
            out_specs=pl.BlockSpec((tm2, Cout), lambda i: (i, 0)),
            compiler_params=_params(),
        )(t2, s3, b3, w3, x_sc, s1, b1, wsc)
    else:
        out = pl.pallas_call(
            final_kernel_identity,
            out_shape=jax.ShapeDtypeStruct((M2, Cout), jnp.float32),
            grid=(nt2,),
            in_specs=common_in,
            out_specs=pl.BlockSpec((tm2, Cout), lambda i: (i, 0)),
            compiler_params=_params(),
        )(t2, s3, b3, w3, x_sc, s1, b1)

    # TODO(synk): keep NHWC / emit bf16 when the consumer is another NHWC block.
    return jnp.transpose(out.reshape(N, Ho, Wo, Cout), (0, 3, 1, 2))


# --------------------------------------------------------------------------
# Pure-JAX reference (mirrors the PyTorch forward exactly, NCHW, f32)
# --------------------------------------------------------------------------

def reference_forward(x, p, stride=1):
    def bn(x, gamma, beta):
        mean = x.mean(axis=(0, 2, 3), keepdims=True)
        var = x.var(axis=(0, 2, 3), keepdims=True)       # biased (training-mode BN)
        xn = (x - mean) / jnp.sqrt(var + EPS)
        return gamma[None, :, None, None] * xn + beta[None, :, None, None]

    def conv(x, w, stride=1, padding=0):
        return jax.lax.conv_general_dilated(
            x, w, window_strides=(stride, stride),
            padding=[(padding, padding), (padding, padding)],
            dimension_numbers=("NCHW", "OIHW", "NCHW"))

    out = jax.nn.relu(bn(x, p["g1"], p["b1"]))
    shortcut = conv(out, p["wsc"], stride=stride) if p["wsc"] is not None else out
    out = conv(out, p["w1"])
    out = conv(jax.nn.relu(bn(out, p["g2"], p["b2"])), p["w2"],
               stride=stride, padding=1)
    out = conv(jax.nn.relu(bn(out, p["g3"], p["b3"])), p["w3"])
    return out + shortcut


# --------------------------------------------------------------------------

if __name__ == "__main__":
    def make_params(key, Cin, planes, stride):
        Cout = 4 * planes
        ks = jax.random.split(key, 10)
        has_sc = (stride != 1) or (Cin != Cout)
        return {
            "g1": 1.0 + 0.1 * jax.random.normal(ks[0], (Cin,), jnp.float32),
            "b1": 0.1 * jax.random.normal(ks[1], (Cin,), jnp.float32),
            "w1": 0.1 * jax.random.normal(ks[2], (planes, Cin, 1, 1), jnp.float32),
            "g2": 1.0 + 0.1 * jax.random.normal(ks[3], (planes,), jnp.float32),
            "b2": 0.1 * jax.random.normal(ks[4], (planes,), jnp.float32),
            "w2": 0.1 * jax.random.normal(ks[5], (planes, planes, 3, 3), jnp.float32),
            "g3": 1.0 + 0.1 * jax.random.normal(ks[6], (planes,), jnp.float32),
            "b3": 0.1 * jax.random.normal(ks[7], (planes,), jnp.float32),
            "w3": 0.1 * jax.random.normal(ks[8], (Cout, planes, 1, 1), jnp.float32),
            "wsc": (0.1 * jax.random.normal(ks[9], (Cout, Cin, 1, 1), jnp.float32)
                    if has_sc else None),
        }

    key = jax.random.PRNGKey(0)
    # (N, Cin, H, W, planes, stride)
    configs = [
        (2, 4, 16, 16, 4, 1),    # 1x1-conv shortcut, stride 1 (fully fused path)
        (2, 16, 16, 16, 4, 1),   # identity shortcut (fused into the last kernel)
        (2, 4, 16, 16, 4, 2),    # strided block
    ]
    for (N, Cin, H, W, planes, stride) in configs:
        key, kx, kp = jax.random.split(key, 3)
        x = jax.random.normal(kx, (N, Cin, H, W), jnp.float32)
        params = make_params(kp, Cin, planes, stride)

        out = jax.block_until_ready(preact_bottleneck(x, params, stride=stride))
        ref = reference_forward(x, params, stride=stride)

        Ho = (H - 1) // stride + 1
        assert out.shape == (N, 4 * planes, Ho, Ho), out.shape
        # bf16 input/activation storage + bf16 MXU operands (f32 BN math / accum)
        # => looser tolerance than a pure-f32 pipeline.
        np.testing.assert_allclose(np.asarray(out), np.asarray(ref),
                                   rtol=3e-2, atol=3e-2)

    print("KERNEL_OK")
</pallas_src>

<mosaic_0001>
module attributes {stable_mosaic.version = 11 : i64} {
  func.func @stage1_kernel(%arg0: i32, %arg1: memref<512x4xbf16, #tpu.memory_space<vmem>>, %arg2: memref<1x4xf32, #tpu.memory_space<vmem>>, %arg3: memref<1x4xf32, #tpu.memory_space<vmem>>, %arg4: memref<4x4xbf16, #tpu.memory_space<vmem>>, %arg5: memref<512x4xbf16, #tpu.memory_space<vmem>>, %arg6: memref<1x8x4xf32, #tpu.memory_space<vmem>>) attributes {dimension_semantics = [#tpu.dimension_semantics<parallel>], iteration_bounds = array<i64: 1>, scalar_prefetch = 0 : i64, scratch_operands = 0 : i64, tpu.core_type = #tpu.core_type<tc>, window_params = [{transform_indices = @transform_0, window_bounds = array<i64: 512, 4>}, {pipeline_mode = #tpu.pipeline_mode<synchronous>, transform_indices = @transform_1, window_bounds = array<i64: 1, 4>}, {pipeline_mode = #tpu.pipeline_mode<synchronous>, transform_indices = @transform_2, window_bounds = array<i64: 1, 4>}, {pipeline_mode = #tpu.pipeline_mode<synchronous>, transform_indices = @transform_3, window_bounds = array<i64: 4, 4>}, {transform_indices = @transform_4, window_bounds = array<i64: 512, 4>}, {transform_indices = @transform_5, window_bounds = array<i64: 1, 8, 4>}]} {
    %c0 = arith.constant 0 : index
    %c0_0 = arith.constant 0 : index
    %0 = vector.load %arg1[%c0, %c0_0] : memref<512x4xbf16, #tpu.memory_space<vmem>>, vector<512x4xbf16>
    %1 = arith.extf %0 : vector<512x4xbf16> to vector<512x4xf32>
    %c0_1 = arith.constant 0 : index
    %c0_2 = arith.constant 0 : index
    %2 = vector.load %arg2[%c0_1, %c0_2] : memref<1x4xf32, #tpu.memory_space<vmem>>, vector<1x4xf32>
    %3 = vector.broadcast %2 : vector<1x4xf32> to vector<512x4xf32>
    %4 = arith.mulf %1, %3 : vector<512x4xf32>
    %c0_3 = arith.constant 0 : index
    %c0_4 = arith.constant 0 : index
    %5 = vector.load %arg3[%c0_3, %c0_4] : memref<1x4xf32, #tpu.memory_space<vmem>>, vector<1x4xf32>
    %6 = vector.broadcast %5 : vector<1x4xf32> to vector<512x4xf32>
    %7 = arith.addf %4, %6 : vector<512x4xf32>
    %cst = arith.constant 0.000000e+00 : f32
    %8 = vector.broadcast %cst : f32 to vector<512x4xf32>
    %9 = arith.maximumf %7, %8 : vector<512x4xf32>
    %10 = arith.truncf %9 : vector<512x4xf32> to vector<512x4xbf16>
    %c0_5 = arith.constant 0 : index
    %c0_6 = arith.constant 0 : index
    %11 = vector.load %arg4[%c0_5, %c0_6] : memref<4x4xbf16, #tpu.memory_space<vmem>>, vector<4x4xbf16>
    %cst_7 = arith.constant dense<0.000000e+00> : vector<512x4xf32>
    %12 = tpu.matmul %10, %11, %cst_7 {dimension_numbers = #tpu.dot_dimension_numbers<[1], [0], [0], [1], [0, 0, 1, 1], [], []>} : vector<512x4xbf16>, vector<4x4xbf16>, vector<512x4xf32> -> vector<512x4xf32>
    %13 = arith.truncf %12 : vector<512x4xf32> to vector<512x4xbf16>
    %c0_8 = arith.constant 0 : index
    %c0_9 = arith.constant 0 : index
    %14 = vector.load %arg5[%c0_8, %c0_9] : memref<512x4xbf16, #tpu.memory_space<vmem>>, vector<512x4xbf16>
    tpu.vector_store %arg5[%c0_8, %c0_9], %13 {strides = array<i32>} : memref<512x4xbf16, #tpu.memory_space<vmem>>, vector<512x4xbf16>,
    %15 = arith.extf %13 : vector<512x4xbf16> to vector<512x4xf32>
    %cst_10 = arith.constant dense<0.000000e+00> : vector<4xf32>
    %16 = vector.multi_reduction <add>, %15, %cst_10 [0] : vector<512x4xf32> to vector<4xf32>
    %17 = vector.shape_cast %16 : vector<4xf32> to vector<1x4xf32>
    %18 = arith.mulf %15, %15 : vector<512x4xf32>
    %cst_11 = arith.constant dense<0.000000e+00> : vector<4xf32>
    %19 = vector.multi_reduction <add>, %18, %cst_11 [0] : vector<512x4xf32> to vector<4xf32>
    %20 = vector.shape_cast %19 : vector<4xf32> to vector<1x4xf32>
    %cst_12 = arith.constant 0.000000e+00 : f32
    %21 = vector.broadcast %cst_12 : f32 to vector<6x4xf32>
    %22 = tpu.concatenate %17, %20, %21 in 0 : vector<1x4xf32>, vector<1x4xf32>, vector<6x4xf32> -> vector<8x4xf32>
    %c0_13 = arith.constant 0 : index
    %c0_14 = arith.constant 0 : index
    %c0_15 = arith.constant 0 : index
    %23 = vector.load %arg6[%c0_13, %c0_14, %c0_15] : memref<1x8x4xf32, #tpu.memory_space<vmem>>, vector<1x8x4xf32>
    %24 = vector.shape_cast %23 : vector<1x8x4xf32> to vector<8x4xf32>
    %25 = vector.shape_cast %22 : vector<8x4xf32> to vector<1x8x4xf32>
    tpu.vector_store %arg6[%c0_13, %c0_14, %c0_15], %25 {strides = array<i32>} : memref<1x8x4xf32, #tpu.memory_space<vmem>>, vector<1x8x4xf32>,
    return
  }
  func.func @transform_0(%arg0: i32) -> (i32, i32) {
    %c0_i32 = arith.constant 0 : i32
    %c0_i32_0 = arith.constant 0 : i32
    return %arg0, %c0_i32 : i32, i32
  }
  func.func @transform_1(%arg0: i32) -> (i32, i32) {
    %c0_i32 = arith.constant 0 : i32
    %c0_i32_0 = arith.constant 0 : i32
    %c0_i32_1 = arith.constant 0 : i32
    return %c0_i32, %c0_i32_0 : i32, i32
  }
  func.func @transform_2(%arg0: i32) -> (i32, i32) {
    %c0_i32 = arith.constant 0 : i32
    %c0_i32_0 = arith.constant 0 : i32
    %c0_i32_1 = arith.constant 0 : i32
    return %c0_i32, %c0_i32_0 : i32, i32
  }
  func.func @transform_3(%arg0: i32) -> (i32, i32) {
    %c0_i32 = arith.constant 0 : i32
    %c0_i32_0 = arith.constant 0 : i32
    %c0_i32_1 = arith.constant 0 : i32
    return %c0_i32, %c0_i32_0 : i32, i32
  }
  func.func @transform_4(%arg0: i32) -> (i32, i32) {
    %c0_i32 = arith.constant 0 : i32
    %c0_i32_0 = arith.constant 0 : i32
    return %arg0, %c0_i32 : i32, i32
  }
  func.func @transform_5(%arg0: i32) -> (i32, i32, i32) {
    %c0_i32 = arith.constant 0 : i32
    %c0_i32_0 = arith.constant 0 : i32
    %c0_i32_1 = arith.constant 0 : i32
    return %arg0, %c0_i32, %c0_i32_0 : i32, i32, i32
  }
}

module attributes {stable_mosaic.version = 11 : i64} {
  func.func @stats_kernel(%arg0: i32, %arg1: memref<512x4xbf16, #tpu.memory_space<vmem>>, %arg2: memref<1x8x4xf32, #tpu.memory_space<vmem>>) attributes {dimension_semantics = [#tpu.dimension_semantics<parallel>], iteration_bounds = array<i64: 1>, scalar_prefetch = 0 : i64, scratch_operands = 0 : i64, tpu.core_type = #tpu.core_type<tc>, window_params = [{transform_indices = @transform_0, window_bounds = array<i64: 512, 4>}, {transform_indices = @transform_1, window_bounds = array<i64: 1, 8, 4>}]} {
    %c0 = arith.constant 0 : index
    %c0_0 = arith.constant 0 : index
    %0 = vector.load %arg1[%c0, %c0_0] : memref<512x4xbf16, #tpu.memory_space<vmem>>, vector<512x4xbf16>
    %1 = arith.extf %0 : vector<512x4xbf16> to vector<512x4xf32>
    %cst = arith.constant dense<0.000000e+00> : vector<4xf32>
    %2 = vector.multi_reduction <add>, %1, %cst [0] : vector<512x4xf32> to vector<4xf32>
    %3 = vector.shape_cast %2 : vector<4xf32> to vector<1x4xf32>
    %4 = arith.mulf %1, %1 : vector<512x4xf32>
    %cst_1 = arith.constant dense<0.000000e+00> : vector<4xf32>
    %5 = vector.multi_reduction <add>, %4, %cst_1 [0] : vector<512x4xf32> to vector<4xf32>
    %6 = vector.shape_cast %5 : vector<4xf32> to vector<1x4xf32>
    %cst_2 = arith.constant 0.000000e+00 : f32
    %7 = vector.broadcast %cst_2 : f32 to vector<6x4xf32>
    %8 = tpu.concatenate %3, %6, %7 in 0 : vector<1x4xf32>, vector<1x4xf32>, vector<6x4xf32> -> vector<8x4xf32>
    %c0_3 = arith.constant 0 : index
    %c0_4 = arith.constant 0 : index
    %c0_5 = arith.constant 0 : index
    %9 = vector.load %arg2[%c0_3, %c0_4, %c0_5] : memref<1x8x4xf32, #tpu.memory_space<vmem>>, vector<1x8x4xf32>
    %10 = vector.shape_cast %9 : vector<1x8x4xf32> to vector<8x4xf32>
    %11 = vector.shape_cast %8 : vector<8x4xf32> to vector<1x8x4xf32>
    tpu.vector_store %arg2[%c0_3, %c0_4, %c0_5], %11 {strides = array<i32>} : memref<1x8x4xf32, #tpu.memory_space<vmem>>, vector<1x8x4xf32>,
    return
  }
  func.func @transform_0(%arg0: i32) -> (i32, i32) {
    %c0_i32 = arith.constant 0 : i32
    %c0_i32_0 = arith.constant 0 : i32
    return %arg0, %c0_i32 : i32, i32
  }
  func.func @transform_1(%arg0: i32) -> (i32, i32, i32) {
    %c0_i32 = arith.constant 0 : i32
    %c0_i32_0 = arith.constant 0 : i32
    %c0_i32_1 = arith.constant 0 : i32
    return %arg0, %c0_i32, %c0_i32_0 : i32, i32, i32
  }
}

module attributes {stable_mosaic.version = 11 : i64} {
  func.func @conv2_kernel(%arg0: i32, %arg1: memref<1x16x16x4xbf16, #tpu.memory_space<vmem>>, %arg2: memref<1x4xf32, #tpu.memory_space<vmem>>, %arg3: memref<1x4xf32, #tpu.memory_space<vmem>>, %arg4: memref<9x4x4xbf16, #tpu.memory_space<vmem>>, %arg5: memref<1x256x4xbf16, #tpu.memory_space<vmem>>, %arg6: memref<1x8x4xf32, #tpu.memory_space<vmem>>, %arg7: memref<18x18x4xf32, #tpu.memory_space<vmem>>) attributes {dimension_semantics = [#tpu.dimension_semantics<parallel>], iteration_bounds = array<i64: 2>, scalar_prefetch = 0 : i64, scratch_operands = 1 : i64, tpu.core_type = #tpu.core_type<tc>, window_params = [{transform_indices = @transform_0, window_bounds = array<i64: 1, 16, 16, 4>}, {pipeline_mode = #tpu.pipeline_mode<synchronous>, transform_indices = @transform_1, window_bounds = array<i64: 1, 4>}, {pipeline_mode = #tpu.pipeline_mode<synchronous>, transform_indices = @transform_2, window_bounds = array<i64: 1, 4>}, {pipeline_mode = #tpu.pipeline_mode<synchronous>, transform_indices = @transform_3, window_bounds = array<i64: 9, 4, 4>}, {transform_indices = @transform_4, window_bounds = array<i64: 1, 256, 4>}, {transform_indices = @transform_5, window_bounds = array<i64: 1, 8, 4>}]} {
    %c0 = arith.constant 0 : index
    %c0_0 = arith.constant 0 : index
    %c0_1 = arith.constant 0 : index
    %c0_2 = arith.constant 0 : index
    %0 = vector.load %arg1[%c0, %c0_0, %c0_1, %c0_2] : memref<1x16x16x4xbf16, #tpu.memory_space<vmem>>, vector<1x16x16x4xbf16>
    %1 = vector.shape_cast %0 : vector<1x16x16x4xbf16> to vector<16x16x4xbf16>
    %2 = arith.extf %1 : vector<16x16x4xbf16> to vector<16x16x4xf32>
    %c0_3 = arith.constant 0 : index
    %c0_4 = arith.constant 0 : index
    %3 = vector.load %arg2[%c0_3, %c0_4] : memref<1x4xf32, #tpu.memory_space<vmem>>, vector<1x4xf32>
    %4 = vector.shape_cast %3 : vector<1x4xf32> to vector<1x1x4xf32>
    %5 = vector.broadcast %4 : vector<1x1x4xf32> to vector<16x16x4xf32>
    %6 = arith.mulf %2, %5 : vector<16x16x4xf32>
    %c0_5 = arith.constant 0 : index
    %c0_6 = arith.constant 0 : index
    %7 = vector.load %arg3[%c0_5, %c0_6] : memref<1x4xf32, #tpu.memory_space<vmem>>, vector<1x4xf32>
    %8 = vector.shape_cast %7 : vector<1x4xf32> to vector<1x1x4xf32>
    %9 = vector.broadcast %8 : vector<1x1x4xf32> to vector<16x16x4xf32>
    %10 = arith.addf %6, %9 : vector<16x16x4xf32>
    %cst = arith.constant 0.000000e+00 : f32
    %11 = vector.broadcast %cst : f32 to vector<16x16x4xf32>
    %12 = arith.maximumf %10, %11 : vector<16x16x4xf32>
    %c1 = arith.constant 1 : index
    %c1_7 = arith.constant 1 : index
    %c0_8 = arith.constant 0 : index
    %13 = vector.load %arg7[%c1, %c1_7, %c0_8] : memref<18x18x4xf32, #tpu.memory_space<vmem>>, vector<16x16x4xf32>
    tpu.vector_store %arg7[%c1, %c1_7, %c0_8], %12 {strides = array<i32>} : memref<18x18x4xf32, #tpu.memory_space<vmem>>, vector<16x16x4xf32>,
    %cst_9 = arith.constant 0.000000e+00 : f32
    %14 = vector.broadcast %cst_9 : f32 to vector<1x18x4xf32>
    %cst_10 = arith.constant 0.000000e+00 : f32
    %15 = vector.broadcast %cst_10 : f32 to vector<16x1x4xf32>
    %c0_11 = arith.constant 0 : index
    %c0_12 = arith.constant 0 : index
    %c0_13 = arith.constant 0 : index
    %16 = vector.load %arg7[%c0_11, %c0_12, %c0_13] : memref<18x18x4xf32, #tpu.memory_space<vmem>>, vector<1x18x4xf32>
    tpu.vector_store %arg7[%c0_11, %c0_12, %c0_13], %14 {strides = array<i32>} : memref<18x18x4xf32, #tpu.memory_space<vmem>>, vector<1x18x4xf32>,
    %c17 = arith.constant 17 : index
    %c0_14 = arith.constant 0 : index
    %c0_15 = arith.constant 0 : index
    %17 = vector.load %arg7[%c17, %c0_14, %c0_15] : memref<18x18x4xf32, #tpu.memory_space<vmem>>, vector<1x18x4xf32>
    tpu.vector_store %arg7[%c17, %c0_14, %c0_15], %14 {strides = array<i32>} : memref<18x18x4xf32, #tpu.memory_space<vmem>>, vector<1x18x4xf32>,
    %c1_16 = arith.constant 1 : index
    %c0_17 = arith.constant 0 : index
    %c0_18 = arith.constant 0 : index
    %18 = vector.load %arg7[%c1_16, %c0_17, %c0_18] : memref<18x18x4xf32, #tpu.memory_space<vmem>>, vector<16x1x4xf32>
    tpu.vector_store %arg7[%c1_16, %c0_17, %c0_18], %15 {strides = array<i32>} : memref<18x18x4xf32, #tpu.memory_space<vmem>>, vector<16x1x4xf32>,
    %c1_19 = arith.constant 1 : index
    %c17_20 = arith.constant 17 : index
    %c0_21 = arith.constant 0 : index
    %19 = vector.load %arg7[%c1_19, %c17_20, %c0_21] : memref<18x18x4xf32, #tpu.memory_space<vmem>>, vector<16x1x4xf32>
    tpu.vector_store %arg7[%c1_19, %c17_20, %c0_21], %15 {strides = array<i32>} : memref<18x18x4xf32, #tpu.memory_space<vmem>>, vector<16x1x4xf32>,
    %cst_22 = arith.constant 0.000000e+00 : f32
    %20 = vector.broadcast %cst_22 : f32 to vector<256x4xf32>
    %c0_23 = arith.constant 0 : index
    %c0_24 = arith.constant 0 : index
    %c0_25 = arith.constant 0 : index
    %21 = vector.load %arg7[%c0_23, %c0_24, %c0_25] : memref<18x18x4xf32, #tpu.memory_space<vmem>>, vector<16x16x4xf32>
    %22 = vector.shape_cast %21 : vector<16x16x4xf32> to vector<256x4xf32>
    %23 = arith.truncf %22 : vector<256x4xf32> to vector<256x4xbf16>
    %c0_26 = arith.constant 0 : index
    %c0_27 = arith.constant 0 : index
    %c0_28 = arith.constant 0 : index
    %24 = vector.load %arg4[%c0_26, %c0_27, %c0_28] : memref<9x4x4xbf16, #tpu.memory_space<vmem>>, vector<1x4x4xbf16>
    %25 = vector.shape_cast %24 : vector<1x4x4xbf16> to vector<4x4xbf16>
    %cst_29 = arith.constant dense<0.000000e+00> : vector<256x4xf32>
    %26 = tpu.matmul %23, %25, %cst_29 {dimension_numbers = #tpu.dot_dimension_numbers<[1], [0], [0], [1], [0, 0, 1, 1], [], []>} : vector<256x4xbf16>, vector<4x4xbf16>, vector<256x4xf32> -> vector<256x4xf32>
    %27 = arith.addf %20, %26 : vector<256x4xf32>
    %c0_30 = arith.constant 0 : index
    %c1_31 = arith.constant 1 : index
    %c0_32 = arith.constant 0 : index
    %28 = vector.load %arg7[%c0_30, %c1_31, %c0_32] : memref<18x18x4xf32, #tpu.memory_space<vmem>>, vector<16x16x4xf32>
    %29 = vector.shape_cast %28 : vector<16x16x4xf32> to vector<256x4xf32>
    %30 = arith.truncf %29 : vector<256x4xf32> to vector<256x4xbf16>
    %c1_33 = arith.constant 1 : index
    %c0_34 = arith.constant 0 : index
    %c0_35 = arith.constant 0 : index
    %31 = vector.load %arg4[%c1_33, %c0_34, %c0_35] : memref<9x4x4xbf16, #tpu.memory_space<vmem>>, vector<1x4x4xbf16>
    %32 = vector.shape_cast %31 : vector<1x4x4xbf16> to vector<4x4xbf16>
    %cst_36 = arith.constant dense<0.000000e+00> : vector<256x4xf32>
    %33 = tpu.matmul %30, %32, %cst_36 {dimension_numbers = #tpu.dot_dimension_numbers<[1], [0], [0], [1], [0, 0, 1, 1], [], []>} : vector<256x4xbf16>, vector<4x4xbf16>, vector<256x4xf32> -> vector<256x4xf32>
    %34 = arith.addf %27, %33 : vector<256x4xf32>
    %c0_37 = arith.constant 0 : index
    %c2 = arith.constant 2 : index
    %c0_38 = arith.constant 0 : index
    %35 = vector.load %arg7[%c0_37, %c2, %c0_38] : memref<18x18x4xf32, #tpu.memory_space<vmem>>, vector<16x16x4xf32>
    %36 = vector.shape_cast %35 : vector<16x16x4xf32> to vector<256x4xf32>
    %37 = arith.truncf %36 : vector<256x4xf32> to vector<256x4xbf16>
    %c2_39 = arith.constant 2 : index
    %c0_40 = arith.constant 0 : index
    %c0_41 = arith.constant 0 : index
    %38 = vector.load %arg4[%c2_39, %c0_40, %c0_41] : memref<9x4x4xbf16, #tpu.memory_space<vmem>>, vector<1x4x4xbf16>
    %39 = vector.shape_cast %38 : vector<1x4x4xbf16> to vector<4x4xbf16>
    %cst_42 = arith.constant dense<0.000000e+00> : vector<256x4xf32>
    %40 = tpu.matmul %37, %39, %cst_42 {dimension_numbers = #tpu.dot_dimension_numbers<[1], [0], [0], [1], [0, 0, 1, 1], [], []>} : vector<256x4xbf16>, vector<4x4xbf16>, vector<256x4xf32> -> vector<256x4xf32>
    %41 = arith.addf %34, %40 : vector<256x4xf32>
    %c1_43 = arith.constant 1 : index
    %c0_44 = arith.constant 0 : index
    %c0_45 = arith.constant 0 : index
    %42 = vector.load %arg7[%c1_43, %c0_44, %c0_45] : memref<18x18x4xf32, #tpu.memory_space<vmem>>, vector<16x16x4xf32>
    %43 = vector.shape_cast %42 : vector<16x16x4xf32> to vector<256x4xf32>
    %44 = arith.truncf %43 : vector<256x4xf32> to vector<256x4xbf16>
    %c3 = arith.constant 3 : index
    %c0_46 = arith.constant 0 : index
    %c0_47 = arith.constant 0 : index
    %45 = vector.load %arg4[%c3, %c0_46, %c0_47] : memref<9x4x4xbf16, #tpu.memory_space<vmem>>, vector<1x4x4xbf16>
    %46 = vector.shape_cast %45 : vector<1x4x4xbf16> to vector<4x4xbf16>
    %cst_48 = arith.constant dense<0.000000e+00> : vector<256x4xf32>
    %47 = tpu.matmul %44, %46, %cst_48 {dimension_numbers = #tpu.dot_dimension_numbers<[1], [0], [0], [1], [0, 0, 1, 1], [], []>} : vector<256x4xbf16>, vector<4x4xbf16>, vector<256x4xf32> -> vector<256x4xf32>
    %48 = arith.addf %41, %47 : vector<256x4xf32>
    %c1_49 = arith.constant 1 : index
    %c1_50 = arith.constant 1 : index
    %c0_51 = arith.constant 0 : index
    %49 = vector.load %arg7[%c1_49, %c1_50, %c0_51] : memref<18x18x4xf32, #tpu.memory_space<vmem>>, vector<16x16x4xf32>
    %50 = vector.shape_cast %49 : vector<16x16x4xf32> to vector<256x4xf32>
    %51 = arith.truncf %50 : vector<256x4xf32> to vector<256x4xbf16>
    %c4 = arith.constant 4 : index
    %c0_52 = arith.constant 0 : index
    %c0_53 = arith.constant 0 : index
    %52 = vector.load %arg4[%c4, %c0_52, %c0_53] : memref<9x4x4xbf16, #tpu.memory_space<vmem>>, vector<1x4x4xbf16>
    %53 = vector.shape_cast %52 : vector<1x4x4xbf16> to vector<4x4xbf16>
    %cst_54 = arith.constant dense<0.000000e+00> : vector<256x4xf32>
    %54 = tpu.matmul %51, %53, %cst_54 {dimension_numbers = #tpu.dot_dimension_numbers<[1], [0], [0], [1], [0, 0, 1, 1], [], []>} : vector<256x4xbf16>, vector<4x4xbf16>, vector<256x4xf32> -> vector<256x4xf32>
    %55 = arith.addf %48, %54 : vector<256x4xf32>
    %c1_55 = arith.constant 1 : index
    %c2_56 = arith.constant 2 : index
    %c0_57 = arith.constant 0 : index
    %56 = vector.load %arg7[%c1_55, %c2_56, %c0_57] : memref<18x18x4xf32, #tpu.memory_space<vmem>>, vector<16x16x4xf32>
    %57 = vector.shape_cast %56 : vector<16x16x4xf32> to vector<256x4xf32>
    %58 = arith.truncf %57 : vector<256x4xf32> to vector<256x4xbf16>
    %c5 = arith.constant 5 : index
    %c0_58 = arith.constant 0 : index
    %c0_59 = arith.constant 0 : index
    %59 = vector.load %arg4[%c5, %c0_58, %c0_59] : memref<9x4x4xbf16, #tpu.memory_space<vmem>>, vector<1x4x4xbf16>
    %60 = vector.shape_cast %59 : vector<1x4x4xbf16> to vector<4x4xbf16>
    %cst_60 = arith.constant dense<0.000000e+00> : vector<256x4xf32>
    %61 = tpu.matmul %58, %60, %cst_60 {dimension_numbers = #tpu.dot_dimension_numbers<[1], [0], [0], [1], [0, 0, 1, 1], [], []>} : vector<256x4xbf16>, vector<4x4xbf16>, vector<256x4xf32> -> vector<256x4xf32>
    %62 = arith.addf %55, %61 : vector<256x4xf32>
    %c2_61 = arith.constant 2 : index
    %c0_62 = arith.constant 0 : index
    %c0_63 = arith.constant 0 : index
    %63 = vector.load %arg7[%c2_61, %c0_62, %c0_63] : memref<18x18x4xf32, #tpu.memory_space<vmem>>, vector<16x16x4xf32>
    %64 = vector.shape_cast %63 : vector<16x16x4xf32> to vector<256x4xf32>
    %65 = arith.truncf %64 : vector<256x4xf32> to vector<256x4xbf16>
    %c6 = arith.constant 6 : index
    %c0_64 = arith.constant 0 : index
    %c0_65 = arith.constant 0 : index
    %66 = vector.load %arg4[%c6, %c0_64, %c0_65] : memref<9x4x4xbf16, #tpu.memory_space<vmem>>, vector<1x4x4xbf16>
    %67 = vector.shape_cast %66 : vector<1x4x4xbf16> to vector<4x4xbf16>
    %cst_66 = arith.constant dense<0.000000e+00> : vector<256x4xf32>
    %68 = tpu.matmul %65, %67, %cst_66 {dimension_numbers = #tpu.dot_dimension_numbers<[1], [0], [0], [1], [0, 0, 1, 1], [], []>} : vector<256x4xbf16>, vector<4x4xbf16>, vector<256x4xf32> -> vector<256x4xf32>
    %69 = arith.addf %62, %68 : vector<256x4xf32>
    %c2_67 = arith.constant 2 : index
    %c1_68 = arith.constant 1 : index
    %c0_69 = arith.constant 0 : index
    %70 = vector.load %arg7[%c2_67, %c1_68, %c0_69] : memref<18x18x4xf32, #tpu.memory_space<vmem>>, vector<16x16x4xf32>
    %71 = vector.shape_cast %70 : vector<16x16x4xf32> to vector<256x4xf32>
    %72 = arith.truncf %71 : vector<256x4xf32> to vector<256x4xbf16>
    %c7 = arith.constant 7 : index
    %c0_70 = arith.constant 0 : index
    %c0_71 = arith.constant 0 : index
    %73 = vector.load %arg4[%c7, %c0_70, %c0_71] : memref<9x4x4xbf16, #tpu.memory_space<vmem>>, vector<1x4x4xbf16>
    %74 = vector.shape_cast %73 : vector<1x4x4xbf16> to vector<4x4xbf16>
    %cst_72 = arith.constant dense<0.000000e+00> : vector<256x4xf32>
    %75 = tpu.matmul %72, %74, %cst_72 {dimension_numbers = #tpu.dot_dimension_numbers<[1], [0], [0], [1], [0, 0, 1, 1], [], []>} : vector<256x4xbf16>, vector<4x4xbf16>, vector<256x4xf32> -> vector<256x4xf32>
    %76 = arith.addf %69, %75 : vector<256x4xf32>
    %c2_73 = arith.constant 2 : index
    %c2_74 = arith.constant 2 : index
    %c0_75 = arith.constant 0 : index
    %77 = vector.load %arg7[%c2_73, %c2_74, %c0_75] : memref<18x18x4xf32, #tpu.memory_space<vmem>>, vector<16x16x4xf32>
    %78 = vector.shape_cast %77 : vector<16x16x4xf32> to vector<256x4xf32>
    %79 = arith.truncf %78 : vector<256x4xf32> to vector<256x4xbf16>
    %c8 = arith.constant 8 : index
    %c0_76 = arith.constant 0 : index
    %c0_77 = arith.constant 0 : index
    %80 = vector.load %arg4[%c8, %c0_76, %c0_77] : memref<9x4x4xbf16, #tpu.memory_space<vmem>>, vector<1x4x4xbf16>
    %81 = vector.shape_cast %80 : vector<1x4x4xbf16> to vector<4x4xbf16>
    %cst_78 = arith.constant dense<0.000000e+00> : vector<256x4xf32>
    %82 = tpu.matmul %79, %81, %cst_78 {dimension_numbers = #tpu.dot_dimension_numbers<[1], [0], [0], [1], [0, 0, 1, 1], [], []>} : vector<256x4xbf16>, vector<4x4xbf16>, vector<256x4xf32> -> vector<256x4xf32>
    %83 = arith.addf %76, %82 : vector<256x4xf32>
    %84 = arith.truncf %83 : vector<256x4xf32> to vector<256x4xbf16>
    %c0_79 = arith.constant 0 : index
    %c0_80 = arith.constant 0 : index
    %c0_81 = arith.constant 0 : index
    %85 = vector.load %arg5[%c0_79, %c0_80, %c0_81] : memref<1x256x4xbf16, #tpu.memory_space<vmem>>, vector<1x256x4xbf16>
    %86 = vector.shape_cast %85 : vector<1x256x4xbf16> to vector<256x4xbf16>
    %87 = vector.shape_cast %84 : vector<256x4xbf16> to vector<1x256x4xbf16>
    tpu.vector_store %arg5[%c0_79, %c0_80, %c0_81], %87 {strides = array<i32>} : memref<1x256x4xbf16, #tpu.memory_space<vmem>>, vector<1x256x4xbf16>,
    %88 = arith.extf %84 : vector<256x4xbf16> to vector<256x4xf32>
    %cst_82 = arith.constant dense<0.000000e+00> : vector<4xf32>
    %89 = vector.multi_reduction <add>, %88, %cst_82 [0] : vector<256x4xf32> to vector<4xf32>
    %90 = vector.shape_cast %89 : vector<4xf32> to vector<1x4xf32>
    %91 = arith.mulf %88, %88 : vector<256x4xf32>
    %cst_83 = arith.constant dense<0.000000e+00> : vector<4xf32>
    %92 = vector.multi_reduction <add>, %91, %cst_83 [0] : vector<256x4xf32> to vector<4xf32>
    %93 = vector.shape_cast %92 : vector<4xf32> to vector<1x4xf32>
    %cst_84 = arith.constant 0.000000e+00 : f32
    %94 = vector.broadcast %cst_84 : f32 to vector<6x4xf32>
    %95 = tpu.concatenate %90, %93, %94 in 0 : vector<1x4xf32>, vector<1x4xf32>, vector<6x4xf32> -> vector<8x4xf32>
    %c0_85 = arith.constant 0 : index
    %c0_86 = arith.constant 0 : index
    %c0_87 = arith.constant 0 : index
    %96 = vector.load %arg6[%c0_85, %c0_86, %c0_87] : memref<1x8x4xf32, #tpu.memory_space<vmem>>, vector<1x8x4xf32>
    %97 = vector.shape_cast %96 : vector<1x8x4xf32> to vector<8x4xf32>
    %98 = vector.shape_cast %95 : vector<8x4xf32> to vector<1x8x4xf32>
    tpu.vector_store %arg6[%c0_85, %c0_86, %c0_87], %98 {strides = array<i32>} : memref<1x8x4xf32, #tpu.memory_space<vmem>>, vector<1x8x4xf32>,
    return
  }
  func.func @transform_0(%arg0: i32) -> (i32, i32, i32, i32) {
    %c0_i32 = arith.constant 0 : i32
    %c0_i32_0 = arith.constant 0 : i32
    %c0_i32_1 = arith.constant 0 : i32
    %c0_i32_2 = arith.constant 0 : i32
    return %arg0, %c0_i32, %c0_i32_0, %c0_i32_1 : i32, i32, i32, i32
  }
  func.func @transform_1(%arg0: i32) -> (i32, i32) {
    %c0_i32 = arith.constant 0 : i32
    %c0_i32_0 = arith.constant 0 : i32
    %c0_i32_1 = arith.constant 0 : i32
    return %c0_i32, %c0_i32_0 : i32, i32
  }
  func.func @transform_2(%arg0: i32) -> (i32, i32) {
    %c0_i32 = arith.constant 0 : i32
    %c0_i32_0 = arith.constant 0 : i32
    %c0_i32_1 = arith.constant 0 : i32
    return %c0_i32, %c0_i32_0 : i32, i32
  }
  func.func @transform_3(%arg0: i32) -> (i32, i32, i32) {
    %c0_i32 = arith.constant 0 : i32
    %c0_i32_0 = arith.constant 0 : i32
    %c0_i32_1 = arith.constant 0 : i32
    %c0_i32_2 = arith.constant 0 : i32
    return %c0_i32, %c0_i32_0, %c0_i32_1 : i32, i32, i32
  }
  func.func @transform_4(%arg0: i32) -> (i32, i32, i32) {
    %c0_i32 = arith.constant 0 : i32
    %c0_i32_0 = arith.constant 0 : i32
    %c0_i32_1 = arith.constant 0 : i32
    return %arg0, %c0_i32, %c0_i32_0 : i32, i32, i32
  }
  func.func @transform_5(%arg0: i32) -> (i32, i32, i32) {
    %c0_i32 = arith.constant 0 : i32
    %c0_i32_0 = arith.constant 0 : i32
    %c0_i32_1 = arith.constant 0 : i32
    return %arg0, %c0_i32, %c0_i32_0 : i32, i32, i32
  }
}

module attributes {stable_mosaic.version = 11 : i64} {
  func.func @final_kernel_convsc(%arg0: i32, %arg1: memref<512x4xbf16, #tpu.memory_space<vmem>>, %arg2: memref<1x4xf32, #tpu.memory_space<vmem>>, %arg3: memref<1x4xf32, #tpu.memory_space<vmem>>, %arg4: memref<4x16xbf16, #tpu.memory_space<vmem>>, %arg5: memref<512x4xbf16, #tpu.memory_space<vmem>>, %arg6: memref<1x4xf32, #tpu.memory_space<vmem>>, %arg7: memref<1x4xf32, #tpu.memory_space<vmem>>, %arg8: memref<4x16xbf16, #tpu.memory_space<vmem>>, %arg9: memref<512x16xf32, #tpu.memory_space<vmem>>) attributes {dimension_semantics = [#tpu.dimension_semantics<parallel>], iteration_bounds = array<i64: 1>, scalar_prefetch = 0 : i64, scratch_operands = 0 : i64, tpu.core_type = #tpu.core_type<tc>, window_params = [{transform_indices = @transform_0, window_bounds = array<i64: 512, 4>}, {pipeline_mode = #tpu.pipeline_mode<synchronous>, transform_indices = @transform_1, window_bounds = array<i64: 1, 4>}, {pipeline_mode = #tpu.pipeline_mode<synchronous>, transform_indices = @transform_2, window_bounds = array<i64: 1, 4>}, {pipeline_mode = #tpu.pipeline_mode<synchronous>, transform_indices = @transform_3, window_bounds = array<i64: 4, 16>}, {transform_indices = @transform_4, window_bounds = array<i64: 512, 4>}, {pipeline_mode = #tpu.pipeline_mode<synchronous>, transform_indices = @transform_5, window_bounds = array<i64: 1, 4>}, {pipeline_mode = #tpu.pipeline_mode<synchronous>, transform_indices = @transform_6, window_bounds = array<i64: 1, 4>}, {pipeline_mode = #tpu.pipeline_mode<synchronous>, transform_indices = @transform_7, window_bounds = array<i64: 4, 16>}, {transform_indices = @transform_8, window_bounds = array<i64: 512, 16>}]} {
    %c0 = arith.constant 0 : index
    %c0_0 = arith.constant 0 : index
    %0 = vector.load %arg1[%c0, %c0_0] : memref<512x4xbf16, #tpu.memory_space<vmem>>, vector<512x4xbf16>
    %1 = arith.extf %0 : vector<512x4xbf16> to vector<512x4xf32>
    %c0_1 = arith.constant 0 : index
    %c0_2 = arith.constant 0 : index
    %2 = vector.load %arg2[%c0_1, %c0_2] : memref<1x4xf32, #tpu.memory_space<vmem>>, vector<1x4xf32>
    %3 = vector.broadcast %2 : vector<1x4xf32> to vector<512x4xf32>
    %4 = arith.mulf %1, %3 : vector<512x4xf32>
    %c0_3 = arith.constant 0 : index
    %c0_4 = arith.constant 0 : index
    %5 = vector.load %arg3[%c0_3, %c0_4] : memref<1x4xf32, #tpu.memory_space<vmem>>, vector<1x4xf32>
    %6 = vector.broadcast %5 : vector<1x4xf32> to vector<512x4xf32>
    %7 = arith.addf %4, %6 : vector<512x4xf32>
    %cst = arith.constant 0.000000e+00 : f32
    %8 = vector.broadcast %cst : f32 to vector<512x4xf32>
    %9 = arith.maximumf %7, %8 : vector<512x4xf32>
    %10 = arith.truncf %9 : vector<512x4xf32> to vector<512x4xbf16>
    %c0_5 = arith.constant 0 : index
    %c0_6 = arith.constant 0 : index
    %11 = vector.load %arg4[%c0_5, %c0_6] : memref<4x16xbf16, #tpu.memory_space<vmem>>, vector<4x16xbf16>
    %cst_7 = arith.constant dense<0.000000e+00> : vector<512x16xf32>
    %12 = tpu.matmul %10, %11, %cst_7 {dimension_numbers = #tpu.dot_dimension_numbers<[1], [0], [0], [1], [0, 0, 1, 1], [], []>} : vector<512x4xbf16>, vector<4x16xbf16>, vector<512x16xf32> -> vector<512x16xf32>
    %c0_8 = arith.constant 0 : index
    %c0_9 = arith.constant 0 : index
    %13 = vector.load %arg5[%c0_8, %c0_9] : memref<512x4xbf16, #tpu.memory_space<vmem>>, vector<512x4xbf16>
    %14 = arith.extf %13 : vector<512x4xbf16> to vector<512x4xf32>
    %c0_10 = arith.constant 0 : index
    %c0_11 = arith.constant 0 : index
    %15 = vector.load %arg6[%c0_10, %c0_11] : memref<1x4xf32, #tpu.memory_space<vmem>>, vector<1x4xf32>
    %16 = vector.broadcast %15 : vector<1x4xf32> to vector<512x4xf32>
    %17 = arith.mulf %14, %16 : vector<512x4xf32>
    %c0_12 = arith.constant 0 : index
    %c0_13 = arith.constant 0 : index
    %18 = vector.load %arg7[%c0_12, %c0_13] : memref<1x4xf32, #tpu.memory_space<vmem>>, vector<1x4xf32>
    %19 = vector.broadcast %18 : vector<1x4xf32> to vector<512x4xf32>
    %20 = arith.addf %17, %19 : vector<512x4xf32>
    %cst_14 = arith.constant 0.000000e+00 : f32
    %21 = vector.broadcast %cst_14 : f32 to vector<512x4xf32>
    %22 = arith.maximumf %20, %21 : vector<512x4xf32>
    %23 = arith.truncf %22 : vector<512x4xf32> to vector<512x4xbf16>
    %c0_15 = arith.constant 0 : index
    %c0_16 = arith.constant 0 : index
    %24 = vector.load %arg8[%c0_15, %c0_16] : memref<4x16xbf16, #tpu.memory_space<vmem>>, vector<4x16xbf16>
    %cst_17 = arith.constant dense<0.000000e+00> : vector<512x16xf32>
    %25 = tpu.matmul %23, %24, %cst_17 {dimension_numbers = #tpu.dot_dimension_numbers<[1], [0], [0], [1], [0, 0, 1, 1], [], []>} : vector<512x4xbf16>, vector<4x16xbf16>, vector<512x16xf32> -> vector<512x16xf32>
    %26 = arith.addf %12, %25 : vector<512x16xf32>
    %c0_18 = arith.constant 0 : index
    %c0_19 = arith.constant 0 : index
    %27 = vector.load %arg9[%c0_18, %c0_19] : memref<512x16xf32, #tpu.memory_space<vmem>>, vector<512x16xf32>
    tpu.vector_store %arg9[%c0_18, %c0_19], %26 {strides = array<i32>} : memref<512x16xf32, #tpu.memory_space<vmem>>, vector<512x16xf32>,
    return
  }
  func.func @transform_0(%arg0: i32) -> (i32, i32) {
    %c0_i32 = arith.constant 0 : i32
    %c0_i32_0 = arith.constant 0 : i32
    return %arg0, %c0_i32 : i32, i32
  }
  func.func @transform_1(%arg0: i32) -> (i32, i32) {
    %c0_i32 = arith.constant 0 : i32
    %c0_i32_0 = arith.constant 0 : i32
    %c0_i32_1 = arith.constant 0 : i32
    return %c0_i32, %c0_i32_0 : i32, i32
  }
  func.func @transform_2(%arg0: i32) -> (i32, i32) {
    %c0_i32 = arith.constant 0 : i32
    %c0_i32_0 = arith.constant 0 : i32
    %c0_i32_1 = arith.constant 0 : i32
    return %c0_i32, %c0_i32_0 : i32, i32
  }
  func.func @transform_3(%arg0: i32) -> (i32, i32) {
    %c0_i32 = arith.constant 0 : i32
    %c0_i32_0 = arith.constant 0 : i32
    %c0_i32_1 = arith.constant 0 : i32
    return %c0_i32, %c0_i32_0 : i32, i32
  }
  func.func @transform_4(%arg0: i32) -> (i32, i32) {
    %c0_i32 = arith.constant 0 : i32
    %c0_i32_0 = arith.constant 0 : i32
    return %arg0, %c0_i32 : i32, i32
  }
  func.func @transform_5(%arg0: i32) -> (i32, i32) {
    %c0_i32 = arith.constant 0 : i32
    %c0_i32_0 = arith.constant 0 : i32
    %c0_i32_1 = arith.constant 0 : i32
    return %c0_i32, %c0_i32_0 : i32, i32
  }
  func.func @transform_6(%arg0: i32) -> (i32, i32) {
    %c0_i32 = arith.constant 0 : i32
    %c0_i32_0 = arith.constant 0 : i32
    %c0_i32_1 = arith.constant 0 : i32
    return %c0_i32, %c0_i32_0 : i32, i32
  }
  func.func @transform_7(%arg0: i32) -> (i32, i32) {
    %c0_i32 = arith.constant 0 : i32
    %c0_i32_0 = arith.constant 0 : i32
    %c0_i32_1 = arith.constant 0 : i32
    return %c0_i32, %c0_i32_0 : i32, i32
  }
  func.func @transform_8(%arg0: i32) -> (i32, i32) {
    %c0_i32 = arith.constant 0 : i32
    %c0_i32_0 = arith.constant 0 : i32
    return %arg0, %c0_i32 : i32, i32
  }
}

</mosaic_0001>

<bundles_post_ra>
// kernel: preact_bottleneck.4
= control target key start
LH: loop header
LB: loop body
LE: loop exit
PB: predicated region body
PF: predicated region fallthrough
CT: control target
= control target key end

     0   :  { %vm136_vm0 = vcmask 31744   ;;  %vm467_vm1 = vcmask 1040384   ;;  %vm469_vm2 = vcmask 1041408   ;;  %s1158_s0 = inlined_call_operand.vmem [shape: bf16[512,4], index: 0, kind: input, shape index: {}]   ;;  %s1159_s1 = inlined_call_operand.vmem [shape: f32[1,8,4], index: 1, kind: output, shape index: {}]  }
   0x1   :  { %v477_v0 = vld [vmem:[%s1158_s0] sm:$0xff]   ;;  %v604_v1 = vld [vmem:[%s1158_s0 + $0x8] sm:$0xff]   ;;  %v605_v5 = vld [vmem:[%s1158_s0 + $0x10] sm:$0xff]  }
   0x2   :  { %v651_v2 = vunpack.c.l.bf16 %v477_v0  ;;  %v653_v3 = vunpack.c.h.bf16 %v477_v0  ;;  %v655_v4 = vunpack.c.l.bf16 %v604_v1  ;;  %v660_v6 = vunpack.c.h.bf16 %v604_v1  ;;  %v606_v13 = vld [vmem:[%s1158_s0 + $0x18] sm:$0xff]   ;;  %v607_v20 = vld [vmem:[%s1158_s0 + $0x20] sm:$0xff]   ;;  %v608_v27 = vld [vmem:[%s1158_s0 + $0x28] sm:$0xff]  }
   0x3   :  { %v668_v11 = vunpack.c.l.bf16 %v605_v5  ;;  %v675_v15 = vunpack.c.h.bf16 %v605_v5  ;;  %v679_v18 = vunpack.c.l.bf16 %v606_v13  ;;  %v686_v22 = vunpack.c.h.bf16 %v606_v13  ;;  %v609_v34 = vld [vmem:[%s1158_s0 + $0x30] sm:$0xff]   ;;  %v610_v41 = vld [vmem:[%s1158_s0 + $0x38] sm:$0xff]   ;;  %v611_v48 = vld [vmem:[%s1158_s0 + $0x40] sm:$0xff]  }
   0x4   :  { %v137_v7 = vsel %vm136_vm0, %v651_v2, 0.0  ;;  %v138_v8 = vsel %vm136_vm0, %v653_v3, 0.0  ;;  %v140_v9 = vsel %vm136_vm0, %v655_v4, 0.0  ;;  %v142_v12 = vsel %vm136_vm0, %v660_v6, 0.0  ;;  %v612_v55 = vld [vmem:[%s1158_s0 + $0x48] sm:$0xff]   ;;  %v613_v62 = vld [vmem:[%s1158_s0 + $0x50] sm:$0xff]  }
   0x5   :  { %v139_v10 = vadd.f32 %v138_v8, %v137_v7  ;;  %v144_v16 = vsel %vm136_vm0, %v668_v11, 0.0  ;;  %v146_v19 = vsel %vm136_vm0, %v675_v15, 0.0  ;;  %v148_v23 = vsel %vm136_vm0, %v679_v18, 0.0 }
   0x6   :  { %v690_v25 = vunpack.c.l.bf16 %v607_v20  ;;  %v150_v26 = vsel %vm136_vm0, %v686_v22, 0.0  ;;  %v697_v29 = vunpack.c.h.bf16 %v607_v20  ;;  %v701_v32 = vunpack.c.l.bf16 %v608_v27 }
   0x7   :  { %v141_v14 = vadd.f32 %v140_v9, %v139_v10  ;;  %v708_v36 = vunpack.c.h.bf16 %v608_v27  ;;  %v712_v39 = vunpack.c.l.bf16 %v609_v34  ;;  %v719_v43 = vunpack.c.h.bf16 %v609_v34 }
   0x8   :  { %v152_v30 = vsel %vm136_vm0, %v690_v25, 0.0  ;;  %v154_v33 = vsel %vm136_vm0, %v697_v29, 0.0  ;;  %v156_v37 = vsel %vm136_vm0, %v701_v32, 0.0  ;;  %v723_v46 = vunpack.c.l.bf16 %v610_v41 }
   0x9   :  { %v143_v17 = vadd.f32 %v142_v12, %v141_v14  ;;  %v158_v40 = vsel %vm136_vm0, %v708_v36, 0.0  ;;  %v160_v44 = vsel %vm136_vm0, %v712_v39, 0.0  ;;  %v162_v47 = vsel %vm136_vm0, %v719_v43, 0.0 }
   0xa   :  { %v730_v50 = vunpack.c.h.bf16 %v610_v41  ;;  %v164_v51 = vsel %vm136_vm0, %v723_v46, 0.0  ;;  %v734_v53 = vunpack.c.l.bf16 %v611_v48  ;;  %v741_v57 = vunpack.c.h.bf16 %v611_v48 }
   0xb   :  { %v145_v21 = vadd.f32 %v144_v16, %v143_v17  ;;  %v745_v60 = vunpack.c.l.bf16 %v612_v55  ;;  %v752_v0 = vunpack.c.h.bf16 %v612_v55  ;;  %v270_v5 = vmul.f32 %v651_v2, %v651_v2  ;;  %v614_v2 = vld [vmem:[%s1158_s0 + $0x58] sm:$0xff]  }
   0xc   :  { %v166_v54 = vsel %vm136_vm0, %v730_v50, 0.0  ;;  %v168_v58 = vsel %vm136_vm0, %v734_v53, 0.0  ;;  %v170_v61 = vsel %vm136_vm0, %v741_v57, 0.0  ;;  %v271_v7 = vmul.f32 %v653_v3, %v653_v3 }
   0xd   :  { %v147_v24 = vadd.f32 %v146_v19, %v145_v21  ;;  %v172_v1 = vsel %vm136_vm0, %v745_v60, 0.0  ;;  %v272_v9 = vmul.f32 %v655_v4, %v655_v4  ;;  %v762_v10 = vunpack.c.l.bf16 %v613_v62 }
   0xe   :  { %v174_v12 = vsel %vm136_vm0, %v752_v0, 0.0  ;;  %v273_v13 = vmul.f32 %v660_v6, %v660_v6  ;;  %v768_v14 = vunpack.c.h.bf16 %v613_v62  ;;  %v274_v4 = vmul.f32 %v668_v11, %v668_v11  ;;  %v615_v11 = vld [vmem:[%s1158_s0 + $0x60] sm:$0xff]  }
   0xf   :  { %v149_v28 = vadd.f32 %v148_v23, %v147_v24  ;;  %v176_v3 = vsel %vm136_vm0, %v762_v10, 0.0  ;;  %v334_v17 = vsel %vm136_vm0, %v270_v5, 0.0  ;;  %v335_v19 = vsel %vm136_vm0, %v271_v7, 0.0 }
  0x10   :  { %v336_v21 = vadd.f32 %v335_v19, %v334_v17  ;;  %v337_v6 = vsel %vm136_vm0, %v272_v9, 0.0  ;;  %v780_v23 = vunpack.c.l.bf16 %v614_v2  ;;  %v178_v24 = vsel %vm136_vm0, %v768_v14, 0.0 }
  0x11   :  { %v151_v31 = vadd.f32 %v150_v26, %v149_v28  ;;  %v275_v26 = vmul.f32 %v675_v15, %v675_v15  ;;  %v339_v27 = vsel %vm136_vm0, %v273_v13, 0.0  ;;  %v276_v34 = vmul.f32 %v679_v18, %v679_v18 }
  0x12   :  { %v277_v41 = vmul.f32 %v686_v22, %v686_v22  ;;  %v282_v17 = vmul.f32 %v712_v39, %v712_v39 }
  0x13   :  { %v153_v35 = vadd.f32 %v152_v30, %v151_v31  ;;  %v338_v30 = vadd.f32 %v337_v6, %v336_v21  ;;  %v790_v31 = vunpack.c.h.bf16 %v614_v2  ;;  %v618_v2 = vld [vmem:[%s1158_s0 + $0x78] sm:$0xff]  }
  0x14   :  { %v848_v21 = vunpack.c.l.bf16 %v618_v2 }
  0x15   :  { %v155_v38 = vadd.f32 %v154_v33, %v153_v35  ;;  %v180_v33 = vsel %vm136_vm0, %v780_v23, 0.0  ;;  %v341_v35 = vsel %vm136_vm0, %v274_v4, 0.0  ;;  %v340_v15 = vadd.f32 %v339_v27, %v338_v30  ;;  %v619_v27 = vld [vmem:[%s1158_s0 + $0x80] sm:$0xff]  }
  0x16   :  { %v196_v30 = vsel %vm136_vm0, %v848_v21, 0.0 }
  0x17   :  { %v157_v42 = vadd.f32 %v156_v37, %v155_v38  ;;  %v797_v38 = vunpack.c.l.bf16 %v615_v11  ;;  %v342_v18 = vadd.f32 %v341_v35, %v340_v15 }
  0x19   :  { %v159_v45 = vadd.f32 %v158_v40, %v157_v42  ;;  %v182_v40 = vsel %vm136_vm0, %v790_v31, 0.0  ;;  %v343_v42 = vsel %vm136_vm0, %v275_v26, 0.0  ;;  %v184_v48 = vsel %vm136_vm0, %v797_v38, 0.0 }
  0x1a   :  { %v344_v22 = vadd.f32 %v343_v42, %v342_v18  ;;  %v620_v42 = vld [vmem:[%s1158_s0 + $0x88] sm:$0xff]  }
  0x1b   :  { %v161_v49 = vadd.f32 %v160_v44, %v159_v45  ;;  %v616_v44 = vld [vmem:[%s1158_s0 + $0x68] sm:$0xff]  }
  0x1c   :  { %v824_v62 = vunpack.c.h.bf16 %v616_v44 }
  0x1d   :  { %v163_v52 = vadd.f32 %v162_v47, %v161_v49  ;;  %v807_v47 = vunpack.c.h.bf16 %v615_v11  ;;  %v278_v49 = vmul.f32 %v690_v25, %v690_v25 }
  0x1e   :  { %v190_v9 = vsel %vm136_vm0, %v824_v62, 0.0 }
  0x1f   :  { %v165_v56 = vadd.f32 %v164_v51, %v163_v52  ;;  %v345_v51 = vsel %vm136_vm0, %v276_v34, 0.0  ;;  %v186_v55 = vsel %vm136_vm0, %v807_v47, 0.0  ;;  %v349_v5 = vsel %vm136_vm0, %v278_v49, 0.0 }
  0x20   :  { %v346_v25 = vadd.f32 %v345_v51, %v344_v22  ;;  %v357_v34 = vsel %vm136_vm0, %v282_v17, 0.0 }
  0x21   :  { %v167_v59 = vadd.f32 %v166_v54, %v165_v56  ;;  %v814_v54 = vunpack.c.l.bf16 %v616_v44  ;;  %v279_v56 = vmul.f32 %v697_v29, %v697_v29 }
  0x23   :  { %v169_v63 = vadd.f32 %v168_v58, %v167_v59  ;;  %v347_v58 = vsel %vm136_vm0, %v277_v41, 0.0  ;;  %v617_v59 = vld [vmem:[%s1158_s0 + $0x70] sm:$0xff]   ;;  %v351_v13 = vsel %vm136_vm0, %v279_v56, 0.0 }
  0x24   :  { %v348_v29 = vadd.f32 %v347_v58, %v346_v25  ;;  %v621_v58 = vld [vmem:[%s1158_s0 + $0x90] sm:$0xff]  }
  0x25   :  { %v171_v8 = vadd.f32 %v170_v61, %v169_v63  ;;  %v188_v63 = vsel %vm136_vm0, %v814_v54, 0.0 }
  0x27   :  { %v173_v16 = vadd.f32 %v172_v1, %v171_v8  ;;  %v280_v1 = vmul.f32 %v701_v32, %v701_v32  ;;  %v831_v8 = vunpack.c.l.bf16 %v617_v59  ;;  %v350_v32 = vadd.f32 %v349_v5, %v348_v29 }
  0x29   :  { %v175_v20 = vadd.f32 %v174_v12, %v173_v16  ;;  %v281_v12 = vmul.f32 %v708_v36, %v708_v36  ;;  %v192_v4 = vsel %vm136_vm0, %v831_v8, 0.0  ;;  %v353_v19 = vsel %vm136_vm0, %v280_v1, 0.0 }
  0x2a   :  { %v352_v36 = vadd.f32 %v351_v13, %v350_v32  ;;  %v622_v13 = vld [vmem:[%s1158_s0 + $0x98] sm:$0xff]  }
  0x2b   :  { %v177_v28 = vadd.f32 %v176_v3, %v175_v20  ;;  %v841_v3 = vunpack.c.h.bf16 %v617_v59  ;;  %v355_v26 = vsel %vm136_vm0, %v281_v12, 0.0 }
  0x2c   :  { %v354_v39 = vadd.f32 %v353_v19, %v352_v36 }
  0x2d   :  { %v179_v37 = vadd.f32 %v178_v24, %v177_v28  ;;  %v194_v6 = vsel %vm136_vm0, %v841_v3, 0.0  ;;  %v283_v24 = vmul.f32 %v719_v43, %v719_v43  ;;  %v858_v28 = vunpack.c.h.bf16 %v618_v2 }
  0x2e   :  { %v356_v43 = vadd.f32 %v355_v26, %v354_v39  ;;  %v623_v26 = vld [vmem:[%s1158_s0 + $0xa0] sm:$0xff]  }
  0x2f   :  { %v181_v45 = vadd.f32 %v180_v33, %v179_v37  ;;  %v284_v33 = vmul.f32 %v723_v46, %v723_v46  ;;  %v865_v37 = vunpack.c.l.bf16 %v619_v27  ;;  %v198_v15 = vsel %vm136_vm0, %v858_v28, 0.0 }
  0x30   :  { %v359_v41 = vsel %vm136_vm0, %v283_v24, 0.0  ;;  %v358_v46 = vadd.f32 %v357_v34, %v356_v43 }
  0x31   :  { %v183_v52 = vadd.f32 %v182_v40, %v181_v45  ;;  %v285_v40 = vmul.f32 %v730_v50, %v730_v50  ;;  %v875_v45 = vunpack.c.h.bf16 %v619_v27  ;;  %v200_v18 = vsel %vm136_vm0, %v865_v37, 0.0 }
  0x32   :  { %v361_v49 = vsel %vm136_vm0, %v284_v33, 0.0  ;;  %v360_v50 = vadd.f32 %v359_v41, %v358_v46  ;;  %v624_v41 = vld [vmem:[%s1158_s0 + $0xa8] sm:$0xff]  }
  0x33   :  { %v185_v61 = vadd.f32 %v184_v48, %v183_v52  ;;  %v286_v48 = vmul.f32 %v734_v53, %v734_v53  ;;  %v882_v52 = vunpack.c.l.bf16 %v620_v42  ;;  %v202_v22 = vsel %vm136_vm0, %v875_v45, 0.0 }
  0x34   :  { %v363_v56 = vsel %vm136_vm0, %v285_v40, 0.0  ;;  %v362_v53 = vadd.f32 %v361_v49, %v360_v50 }
  0x35   :  { %v187_v7 = vadd.f32 %v186_v55, %v185_v61  ;;  %v287_v55 = vmul.f32 %v741_v57, %v741_v57  ;;  %v892_v61 = vunpack.c.h.bf16 %v620_v42  ;;  %v204_v25 = vsel %vm136_vm0, %v882_v52, 0.0 }
  0x36   :  { %v365_v1 = vsel %vm136_vm0, %v286_v48, 0.0  ;;  %v364_v57 = vadd.f32 %v363_v56, %v362_v53  ;;  %v625_v56 = vld [vmem:[%s1158_s0 + $0xb0] sm:$0xff]  }
  0x37   :  { %v189_v16 = vadd.f32 %v188_v63, %v187_v7  ;;  %v288_v63 = vmul.f32 %v745_v60, %v745_v60  ;;  %v899_v7 = vunpack.c.l.bf16 %v621_v58  ;;  %v206_v29 = vsel %vm136_vm0, %v892_v61, 0.0 }
  0x38   :  { %v367_v12 = vsel %vm136_vm0, %v287_v55, 0.0  ;;  %v366_v60 = vadd.f32 %v365_v1, %v364_v57 }
  0x39   :  { %v191_v20 = vadd.f32 %v190_v9, %v189_v16  ;;  %v289_v9 = vmul.f32 %v752_v0, %v752_v0  ;;  %v909_v16 = vunpack.c.h.bf16 %v621_v58  ;;  %v208_v32 = vsel %vm136_vm0, %v899_v7, 0.0 }
  0x3a   :  { %v369_v17 = vsel %vm136_vm0, %v288_v63, 0.0  ;;  %v368_v0 = vadd.f32 %v367_v12, %v366_v60  ;;  %v626_v12 = vld [vmem:[%s1158_s0 + $0xb8] sm:$0xff]  }
  0x3b   :  { %v193_v11 = vadd.f32 %v192_v4, %v191_v20  ;;  %v290_v4 = vmul.f32 %v762_v10, %v762_v10  ;;  %v916_v20 = vunpack.c.l.bf16 %v622_v13  ;;  %v210_v36 = vsel %vm136_vm0, %v909_v16, 0.0 }
  0x3c   :  { %v371_v24 = vsel %vm136_vm0, %v289_v9, 0.0  ;;  %v370_v10 = vadd.f32 %v369_v17, %v368_v0 }
  0x3d   :  { %v195_v35 = vadd.f32 %v194_v6, %v193_v11  ;;  %v291_v6 = vmul.f32 %v768_v14, %v768_v14  ;;  %v926_v11 = vunpack.c.h.bf16 %v622_v13  ;;  %v212_v39 = vsel %vm136_vm0, %v916_v20, 0.0 }
  0x3e   :  { %v373_v33 = vsel %vm136_vm0, %v290_v4, 0.0  ;;  %v372_v14 = vadd.f32 %v371_v24, %v370_v10  ;;  %v627_v24 = vld [vmem:[%s1158_s0 + $0xc0] sm:$0xff]  }
  0x3f   :  { %v197_v44 = vadd.f32 %v196_v30, %v195_v35  ;;  %v292_v30 = vmul.f32 %v780_v23, %v780_v23  ;;  %v933_v35 = vunpack.c.l.bf16 %v623_v26  ;;  %v214_v43 = vsel %vm136_vm0, %v926_v11, 0.0 }
  0x40   :  { %v375_v40 = vsel %vm136_vm0, %v291_v6, 0.0  ;;  %v374_v23 = vadd.f32 %v373_v33, %v372_v14 }
  0x41   :  { %v199_v51 = vadd.f32 %v198_v15, %v197_v44  ;;  %v293_v15 = vmul.f32 %v790_v31, %v790_v31  ;;  %v943_v44 = vunpack.c.h.bf16 %v623_v26  ;;  %v216_v46 = vsel %vm136_vm0, %v933_v35, 0.0 }
  0x42   :  { %v377_v48 = vsel %vm136_vm0, %v292_v30, 0.0  ;;  %v376_v31 = vadd.f32 %v375_v40, %v374_v23  ;;  %v628_v40 = vld [vmem:[%s1158_s0 + $0xc8] sm:$0xff]  }
  0x43   :  { %v201_v59 = vadd.f32 %v200_v18, %v199_v51  ;;  %v294_v18 = vmul.f32 %v797_v38, %v797_v38  ;;  %v950_v51 = vunpack.c.l.bf16 %v624_v41  ;;  %v218_v50 = vsel %vm136_vm0, %v943_v44, 0.0 }
  0x44   :  { %v379_v55 = vsel %vm136_vm0, %v293_v15, 0.0  ;;  %v378_v38 = vadd.f32 %v377_v48, %v376_v31 }
  0x45   :  { %v203_v5 = vadd.f32 %v202_v22, %v201_v59  ;;  %v295_v22 = vmul.f32 %v807_v47, %v807_v47  ;;  %v960_v59 = vunpack.c.h.bf16 %v624_v41  ;;  %v220_v53 = vsel %vm136_vm0, %v950_v51, 0.0 }
  0x46   :  { %v381_v63 = vsel %vm136_vm0, %v294_v18, 0.0  ;;  %v380_v47 = vadd.f32 %v379_v55, %v378_v38  ;;  %v629_v55 = vld [vmem:[%s1158_s0 + $0xd0] sm:$0xff]  }
  0x47   :  { %v205_v2 = vadd.f32 %v204_v25, %v203_v5  ;;  %v296_v25 = vmul.f32 %v814_v54, %v814_v54  ;;  %v967_v5 = vunpack.c.l.bf16 %v625_v56  ;;  %v222_v57 = vsel %vm136_vm0, %v960_v59, 0.0 }
  0x48   :  { %v383_v9 = vsel %vm136_vm0, %v295_v22, 0.0  ;;  %v382_v54 = vadd.f32 %v381_v63, %v380_v47 }
  0x49   :  { %v207_v19 = vadd.f32 %v206_v29, %v205_v2  ;;  %v297_v29 = vmul.f32 %v824_v62, %v824_v62  ;;  %v977_v2 = vunpack.c.h.bf16 %v625_v56  ;;  %v224_v60 = vsel %vm136_vm0, %v967_v5, 0.0 }
  0x4a   :  { %v385_v4 = vsel %vm136_vm0, %v296_v25, 0.0  ;;  %v384_v62 = vadd.f32 %v383_v9, %v382_v54 }
  0x4b   :  { %v209_v27 = vadd.f32 %v208_v32, %v207_v19  ;;  %v298_v32 = vmul.f32 %v831_v8, %v831_v8  ;;  %v984_v19 = vunpack.c.l.bf16 %v626_v12  ;;  %v226_v0 = vsel %vm136_vm0, %v977_v2, 0.0 }
  0x4c   :  { %v387_v6 = vsel %vm136_vm0, %v297_v29, 0.0  ;;  %v386_v8 = vadd.f32 %v385_v4, %v384_v62  ;;  %v1047_v4 = vunpack.c.h.bf16 %v629_v55  ;;  %v630_v62 = vld [vmem:[%s1158_s0 + $0xd8] sm:$0xff]  }
  0x4d   :  { %v211_v34 = vadd.f32 %v210_v36, %v209_v27  ;;  %v299_v36 = vmul.f32 %v841_v3, %v841_v3  ;;  %v994_v27 = vunpack.c.h.bf16 %v626_v12  ;;  %v228_v10 = vsel %vm136_vm0, %v984_v19, 0.0 }
  0x4e   :  { %v389_v30 = vsel %vm136_vm0, %v298_v32, 0.0  ;;  %v388_v3 = vadd.f32 %v387_v6, %v386_v8  ;;  %v308_v6 = vmul.f32 %v916_v20, %v916_v20  ;;  %v1060_v8 = vunpack.c.l.bf16 %v630_v62 }
  0x4f   :  { %v213_v42 = vadd.f32 %v212_v39, %v211_v34  ;;  %v300_v39 = vmul.f32 %v848_v21, %v848_v21  ;;  %v1001_v34 = vunpack.c.l.bf16 %v627_v24  ;;  %v230_v14 = vsel %vm136_vm0, %v994_v27, 0.0 }
  0x50   :  { %v391_v15 = vsel %vm136_vm0, %v299_v36, 0.0  ;;  %v390_v21 = vadd.f32 %v389_v30, %v388_v3  ;;  %v310_v3 = vmul.f32 %v933_v35, %v933_v35  ;;  %v409_v20 = vsel %vm136_vm0, %v308_v6, 0.0 }
  0x51   :  { %v215_v49 = vadd.f32 %v214_v43, %v213_v42  ;;  %v301_v43 = vmul.f32 %v858_v28, %v858_v28  ;;  %v1011_v42 = vunpack.c.h.bf16 %v627_v24  ;;  %v232_v23 = vsel %vm136_vm0, %v1001_v34, 0.0 }
  0x52   :  { %v393_v18 = vsel %vm136_vm0, %v300_v39, 0.0  ;;  %v392_v28 = vadd.f32 %v391_v15, %v390_v21  ;;  %v311_v15 = vmul.f32 %v943_v44, %v943_v44  ;;  %v312_v35 = vmul.f32 %v950_v51, %v950_v51 }
  0x53   :  { %v217_v58 = vadd.f32 %v216_v46, %v215_v49  ;;  %v302_v46 = vmul.f32 %v865_v37, %v865_v37  ;;  %v1018_v49 = vunpack.c.l.bf16 %v628_v40  ;;  %v234_v31 = vsel %vm136_vm0, %v1011_v42, 0.0 }
  0x54   :  { %v395_v22 = vsel %vm136_vm0, %v301_v43, 0.0  ;;  %v394_v37 = vadd.f32 %v393_v18, %v392_v28  ;;  %v1070_v43 = vunpack.c.h.bf16 %v630_v62  ;;  %v313_v44 = vmul.f32 %v960_v59, %v960_v59  ;;  %v632_v59 = vld [vmem:[%s1158_s0 + $0xe8] sm:$0xff]  }
  0x55   :  { %v219_v1 = vadd.f32 %v218_v50, %v217_v58  ;;  %v303_v50 = vmul.f32 %v875_v45, %v875_v45  ;;  %v1028_v58 = vunpack.c.h.bf16 %v628_v40  ;;  %v236_v38 = vsel %vm136_vm0, %v1018_v49, 0.0  ;;  %v631_v40 = vld [vmem:[%s1158_s0 + $0xe0] sm:$0xff]  }
  0x56   :  { %v397_v25 = vsel %vm136_vm0, %v302_v46, 0.0  ;;  %v396_v45 = vadd.f32 %v395_v22, %v394_v37  ;;  %v413_v46 = vsel %vm136_vm0, %v310_v3, 0.0  ;;  %v415_v28 = vsel %vm136_vm0, %v311_v15, 0.0 }
  0x57   :  { %v221_v13 = vadd.f32 %v220_v53, %v219_v1  ;;  %v304_v53 = vmul.f32 %v882_v52, %v882_v52  ;;  %v1035_v1 = vunpack.c.l.bf16 %v629_v55  ;;  %v238_v47 = vsel %vm136_vm0, %v1028_v58, 0.0 }
  0x58   :  { %v399_v29 = vsel %vm136_vm0, %v303_v50, 0.0  ;;  %v398_v12 = vadd.f32 %v397_v25, %v396_v45  ;;  %v306_v52 = vmul.f32 %v899_v7, %v899_v7  ;;  %v242_v7 = vsel %vm136_vm0, %v1047_v4, 0.0 }
  0x59   :  { %v223_v17 = vadd.f32 %v222_v57, %v221_v13  ;;  %v305_v57 = vmul.f32 %v892_v61, %v892_v61  ;;  %v240_v13 = vsel %vm136_vm0, %v1035_v1, 0.0  ;;  %v401_v54 = vsel %vm136_vm0, %v304_v53, 0.0 }
  0x5a   :  { %v400_v32 = vadd.f32 %v399_v29, %v398_v12  ;;  %v405_v24 = vsel %vm136_vm0, %v306_v52, 0.0  ;;  %v314_v55 = vmul.f32 %v967_v5, %v967_v5  ;;  %v417_v51 = vsel %vm136_vm0, %v312_v35, 0.0 }
  0x5b   :  { %v225_v26 = vadd.f32 %v224_v60, %v223_v17  ;;  %v307_v17 = vmul.f32 %v909_v16, %v909_v16  ;;  %v403_v61 = vsel %vm136_vm0, %v305_v57, 0.0  ;;  %v309_v16 = vmul.f32 %v926_v11, %v926_v11 }
  0x5c   :  { %v402_v36 = vadd.f32 %v401_v54, %v400_v32  ;;  %v591_v37 = vunpack.c.h.bf16 %v631_v40  ;;  %v419_v53 = vsel %vm136_vm0, %v313_v44, 0.0  ;;  %v316_v5 = vmul.f32 %v984_v19, %v984_v19 }
  0x5d   :  { %v227_v33 = vadd.f32 %v226_v0, %v225_v26  ;;  %v411_v11 = vsel %vm136_vm0, %v309_v16, 0.0  ;;  %v594_v29 = vunpack.c.l.bf16 %v632_v59  ;;  %v318_v54 = vmul.f32 %v1001_v34, %v1001_v34 }
  0x5e   :  { %v404_v26 = vadd.f32 %v403_v61, %v402_v36  ;;  %v250_v45 = vsel %vm136_vm0, %v591_v37, 0.0  ;;  %v595_v19 = vunpack.c.h.bf16 %v632_v59  ;;  %v320_v34 = vmul.f32 %v1018_v49, %v1018_v49 }
  0x5f   :  { %v229_v41 = vadd.f32 %v228_v10, %v227_v33  ;;  %v407_v10 = vsel %vm136_vm0, %v307_v17, 0.0  ;;  %v244_v33 = vsel %vm136_vm0, %v1060_v8, 0.0  ;;  %v252_v52 = vsel %vm136_vm0, %v594_v29, 0.0 }
  0x60   :  { %v406_v30 = vadd.f32 %v405_v24, %v404_v26  ;;  %v319_v17 = vmul.f32 %v1011_v42, %v1011_v42  ;;  %v254_v36 = vsel %vm136_vm0, %v595_v19, 0.0  ;;  %v321_v42 = vmul.f32 %v1028_v58, %v1028_v58  ;;  %v634_v58 = vld [vmem:[%s1158_s0 + $0xf8] sm:$0xff]  }
  0x61   :  { %v231_v48 = vadd.f32 %v230_v14, %v229_v41 }
  0x62   :  { %v408_v14 = vadd.f32 %v407_v10, %v406_v30  ;;  %v431_v26 = vsel %vm136_vm0, %v319_v17, 0.0  ;;  %v322_v30 = vmul.f32 %v1035_v1, %v1035_v1  ;;  %v324_v1 = vmul.f32 %v1060_v8, %v1060_v8 }
  0x63   :  { %v233_v56 = vadd.f32 %v232_v23, %v231_v48  ;;  %v246_v23 = vsel %vm136_vm0, %v1070_v43, 0.0  ;;  %v1083_v48 = vunpack.c.l.bf16 %v631_v40  ;;  %v603_v8 = vunpack.c.h.bf16 %v634_v58 }
  0x64   :  { %v410_v21 = vadd.f32 %v409_v20, %v408_v14  ;;  %v323_v20 = vmul.f32 %v1047_v4, %v1047_v4  ;;  %v435_v14 = vsel %vm136_vm0, %v321_v42, 0.0  ;;  %v325_v4 = vmul.f32 %v1070_v43, %v1070_v43 }
  0x65   :  { %v235_v63 = vadd.f32 %v234_v31, %v233_v56  ;;  %v248_v22 = vsel %vm136_vm0, %v1083_v48, 0.0  ;;  %v262_v43 = vsel %vm136_vm0, %v603_v8, 0.0 }
  0x66   :  { %v412_v18 = vadd.f32 %v411_v11, %v410_v21  ;;  %v439_v35 = vsel %vm136_vm0, %v323_v20, 0.0 }
  0x67   :  { %v237_v9 = vadd.f32 %v236_v38, %v235_v63  ;;  %v315_v38 = vmul.f32 %v977_v2, %v977_v2  ;;  %v317_v2 = vmul.f32 %v994_v27, %v994_v27  ;;  %v633_v27 = vld [vmem:[%s1158_s0 + $0xf0] sm:$0xff]  }
  0x68   :  { %v414_v50 = vadd.f32 %v413_v46, %v412_v18  ;;  %v598_v24 = vunpack.c.l.bf16 %v633_v27  ;;  %v599_v49 = vunpack.c.h.bf16 %v633_v27 }
  0x69   :  { %v239_v60 = vadd.f32 %v238_v47, %v237_v9  ;;  %v421_v47 = vsel %vm136_vm0, %v314_v55, 0.0  ;;  %v423_v9 = vsel %vm136_vm0, %v315_v38, 0.0  ;;  %v427_v61 = vsel %vm136_vm0, %v317_v2, 0.0 }
  0x6a   :  { %v416_v56 = vadd.f32 %v415_v28, %v414_v50  ;;  %v258_v40 = vsel %vm136_vm0, %v599_v49, 0.0  ;;  %v326_v28 = vmul.f32 %v1083_v48, %v1083_v48  ;;  %v443_v55 = vsel %vm136_vm0, %v325_v4, 0.0 }
  0x6b   :  { %v241_v0 = vadd.f32 %v240_v13, %v239_v60  ;;  %v425_v60 = vsel %vm136_vm0, %v316_v5, 0.0  ;;  %v328_v38 = vmul.f32 %v594_v29, %v594_v29  ;;  %v330_v5 = vmul.f32 %v598_v24, %v598_v24 }
  0x6c   :  { %v418_v63 = vadd.f32 %v417_v51, %v416_v56 }
  0x6d   :  { %v243_v39 = vadd.f32 %v242_v7, %v241_v0  ;;  %v429_v7 = vsel %vm136_vm0, %v318_v54, 0.0  ;;  %v453_v29 = vsel %vm136_vm0, %v330_v5, 0.0  ;;  %v333_v54 = vmul.f32 %v603_v8, %v603_v8 }
  0x6e   :  { %v420_v57 = vadd.f32 %v419_v53, %v418_v63  ;;  %v445_v53 = vsel %vm136_vm0, %v326_v28, 0.0 }
  0x6f   :  { %v245_v41 = vadd.f32 %v244_v33, %v243_v39  ;;  %v256_v39 = vsel %vm136_vm0, %v598_v24, 0.0  ;;  %v433_v33 = vsel %vm136_vm0, %v320_v34, 0.0  ;;  %v459_v27 = vsel %vm136_vm0, %v333_v54, 0.0 }
  0x70   :  { %v422_v13 = vadd.f32 %v421_v47, %v420_v57  ;;  %v449_v47 = vsel %vm136_vm0, %v328_v38, 0.0 }
  0x71   :  { %v247_v31 = vadd.f32 %v246_v23, %v245_v41  ;;  %v437_v41 = vsel %vm136_vm0, %v322_v30, 0.0  ;;  %v602_v23 = vunpack.c.l.bf16 %v634_v58 }
  0x72   :  { %v424_v32 = vadd.f32 %v423_v9, %v422_v13 }
  0x73   :  { %v249_v25 = vadd.f32 %v248_v22, %v247_v31  ;;  %v260_v44 = vsel %vm136_vm0, %v602_v23, 0.0  ;;  %v441_v31 = vsel %vm136_vm0, %v324_v1, 0.0  ;;  %v327_v22 = vmul.f32 %v591_v37, %v591_v37 }
  0x74   :  { %v426_v0 = vadd.f32 %v425_v60, %v424_v32  ;;  %v331_v37 = vmul.f32 %v599_v49, %v599_v49  ;;  %v332_v13 = vmul.f32 %v602_v23, %v602_v23 }
  0x75   :  { %v251_v12 = vadd.f32 %v250_v45, %v249_v25  ;;  %v329_v25 = vmul.f32 %v595_v19, %v595_v19  ;;  %v447_v63 = vsel %vm136_vm0, %v327_v22, 0.0 }
  0x76   :  { %v428_v6 = vadd.f32 %v427_v61, %v426_v0  ;;  %v455_v60 = vsel %vm136_vm0, %v331_v37, 0.0  ;;  %v457_v17 = vsel %vm136_vm0, %v332_v13, 0.0 }
  0x77   :  { %v253_v62 = vadd.f32 %v252_v52, %v251_v12  ;;  %v451_v2 = vsel %vm136_vm0, %v329_v25, 0.0 }
  0x78   :  { %v430_v10 = vadd.f32 %v429_v7, %v428_v6 }
  0x79   :  { %v255_v16 = vadd.f32 %v254_v36, %v253_v62 }
  0x7a   :  { %v432_v3 = vadd.f32 %v431_v26, %v430_v10 }
  0x7b   :  { %v257_v15 = vadd.f32 %v256_v39, %v255_v16 }
  0x7c   :  { %v434_v11 = vadd.f32 %v433_v33, %v432_v3 }
  0x7d   :  { %v259_v46 = vadd.f32 %v258_v40, %v257_v15 }
  0x7e   :  { %v436_v21 = vadd.f32 %v435_v14, %v434_v11 }
  0x7f   :  { %v261_v51 = vadd.f32 %v260_v44, %v259_v46 }
  0x80   :  { %v438_v18 = vadd.f32 %v437_v41, %v436_v21 }
  0x81   :  { %v263_v45 = vadd.f32 %v262_v43, %v261_v51 }
  0x82   :  { %v440_v50 = vadd.f32 %v439_v35, %v438_v18 }
  0x83   :  { %v264_v9 = vrot.slane %v263_v45, 4 }
  0x84   :  { %v442_v56 = vadd.f32 %v441_v31, %v440_v50 }
  0x85   :  { %v265_v32 = vadd.f32 %v264_v9, %v263_v45 }
  0x86   :  { %v444_v59 = vadd.f32 %v443_v55, %v442_v56 }
  0x87   :  { %v266_v62 = vrot.slane %v265_v32, 2 }
  0x88   :  { %v446_v48 = vadd.f32 %v445_v53, %v444_v59 }
  0x89   :  { %v267_v34 = vadd.f32 %v266_v62, %v265_v32 }
  0x8a   :  { %v448_v57 = vadd.f32 %v447_v63, %v446_v48 }
  0x8b   :  { %v268_v24 = vrot.slane %v267_v34, 1 }
  0x8c   :  { %v450_v12 = vadd.f32 %v449_v47, %v448_v57 }
  0x8d   :  { %v269_v16 = vadd.f32 %v268_v24, %v267_v34 }
  0x8e   :  { %v452_v52 = vadd.f32 %v451_v2, %v450_v12 }
  0x90   :  { %v454_v19 = vadd.f32 %v453_v29, %v452_v52 }
  0x92   :  { %v456_v61 = vadd.f32 %v455_v60, %v454_v19 }
  0x94   :  { %v458_v0 = vadd.f32 %v457_v17, %v456_v61 }
  0x96   :  { %v460_v36 = vadd.f32 %v459_v27, %v458_v0 }
  0x98   :  { %v461_v7 = vrot.slane %v460_v36, 4 }
  0x9a   :  { %v462_v6 = vadd.f32 %v461_v7, %v460_v36 }
  0x9c   :  { %v463_v42 = vrot.slane %v462_v6, 2 }
  0x9e   :  { %v464_v26 = vadd.f32 %v463_v42, %v462_v6 }
  0xa0   :  { %v465_v10 = vrot.slane %v464_v26, 1 }
  0xa2   :  { %v466_v39 = vadd.f32 %v465_v10, %v464_v26 }
  0xa4   :  { %v468_v30 = vsel %vm467_vm1, %v269_v16, %v466_v39 }
  0xa5   :  { %v470_v33 = vsel %vm469_vm2, %v468_v30, 0.0 }
  0xa6   :  { %471 = vst.msk [vmem:[%s1159_s1] sm:$0xff] %vm136_vm0, %v470_v33 }

// kernel: preact_bottleneck.5
= control target key start
LH: loop header
LB: loop body
LE: loop exit
PB: predicated region body
PF: predicated region fallthrough
CT: control target
= control target key end

     0   :  { %vm484_vm0 = vcmask 1041408   ;;  %vm387_vm1 = vcmask 31744   ;;  %vm1033_vm2 = vcmask 27648   ;;  %vm1492_vm3 = vcmask 1040384   ;;  %s2812_s3 = inlined_call_operand.vmem [shape: bf16[4,4], index: 3, kind: input, shape index: {}]   ;;  %s2813_s0 = inlined_call_operand.vmem [shape: bf16[512,4], index: 0, kind: input, shape index: {}]   ;;  %s2814_s1 = inlined_call_operand.vmem [shape: f32[1,4], index: 1, kind: input, shape index: {}]   ;;  %s2815_s2 = inlined_call_operand.vmem [shape: f32[1,4], index: 2, kind: input, shape index: {}]   ;;  %s2816_s4 = inlined_call_operand.vmem [shape: bf16[512,4], index: 4, kind: output, shape index: {0}]   ;;  %s2817_s5 = inlined_call_operand.vmem [shape: f32[1,8,4], index: 5, kind: output, shape index: {1}]  }
   0x1   :  { %v386_v0 = vld [vmem:[%s2812_s3] sm:$0x3]  ;;  %v1794_v6 = vld [vmem:[%s2813_s0 + $0x8] sm:$0xff]   ;;  %v1795_v7 = vld [vmem:[%s2813_s0 + $0x10] sm:$0xff]  }
   0x2   :  { %v1667_v1 = vld [vmem:[%s2813_s0] sm:$0xff]   ;;  %1926 = vmatprep.subr.msk.bf16.mxu0 %vm484_vm0, %v386_v0  ;;  %v486_v3 = vsel %vm484_vm0, %v386_v0, 0  ;;  %1927 = vmatprep.subr.msk.bf16.mxu1 %vm484_vm0, %v386_v0  ;;  %v1672_v9 = vunpack.c.l.bf16 %v1794_v6  ;;  %v1673_v10 = vunpack.c.h.bf16 %v1794_v6  ;;  %v1676_v11 = vunpack.c.l.bf16 %v1795_v7  ;;  %v1796_v13 = vld [vmem:[%s2813_s0 + $0x18] sm:$0xff]   ;;  %v1798_v35 = vld [vmem:[%s2813_s0 + $0x28] sm:$0xff]  }
   0x3   :  { %v1967_v2 = vld [vmem:[%s2814_s1] ss:$0 sm:$0xff]  ;;  %v1668_v4 = vunpack.c.l.bf16 %v1667_v1  ;;  %v1669_v5 = vunpack.c.h.bf16 %v1667_v1  ;;  %1859 = vmatpush3.bf16.msra.mxu0 %v486_v3  ;;  %v1677_v12 = vunpack.c.h.bf16 %v1795_v7  ;;  %1925 = vmatpush3.bf16.msra.mxu1 %v486_v3  ;;  %v1680_v16 = vunpack.c.l.bf16 %v1796_v13  ;;  %v1799_v40 = vld [vmem:[%s2813_s0 + $0x30] sm:$0xff]   ;;  %v1800_v51 = vld [vmem:[%s2813_s0 + $0x38] sm:$0xff]  }
   0x4   :  { %v1981_v8 = vld [vmem:[%s2815_s2] ss:$0 sm:$0xff]  ;;  %v1681_v17 = vunpack.c.h.bf16 %v1796_v13  ;;  %v157_v18 = vmul.f32 %v1672_v9, %v1967_v2  ;;  %v158_v19 = vmul.f32 %v1673_v10, %v1967_v2  ;;  %v159_v20 = vmul.f32 %v1676_v11, %v1967_v2  ;;  %v1802_v9 = vld [vmem:[%s2813_s0 + $0x48] sm:$0xff]   ;;  %v1803_v11 = vld [vmem:[%s2813_s0 + $0x50] sm:$0xff]  }
   0x5   :  { %v155_v14 = vmul.f32 %v1668_v4, %v1967_v2  ;;  %v156_v15 = vmul.f32 %v1669_v5, %v1967_v2  ;;  %v160_v21 = vmul.f32 %v1677_v12, %v1967_v2  ;;  %v161_v24 = vmul.f32 %v1680_v16, %v1967_v2  ;;  %v1797_v30 = vld [vmem:[%s2813_s0 + $0x20] sm:$0xff]  }
   0x6   :  { %v162_v25 = vmul.f32 %v1681_v17, %v1967_v2  ;;  %v228_v26 = vadd.f32 %v1981_v8, %v157_v18  ;;  %v229_v27 = vadd.f32 %v1981_v8, %v158_v19  ;;  %v230_v28 = vadd.f32 %v1981_v8, %v159_v20  ;;  %v1801_v63 = vld [vmem:[%s2813_s0 + $0x40] sm:$0xff]   ;;  %v1804_v20 = vld [vmem:[%s2813_s0 + $0x58] sm:$0xff]  }
   0x7   :  { %v226_v22 = vadd.f32 %v1981_v8, %v155_v14  ;;  %v227_v23 = vadd.f32 %v1981_v8, %v156_v15  ;;  %v231_v29 = vadd.f32 %v1981_v8, %v160_v21  ;;  %v232_v33 = vadd.f32 %v1981_v8, %v161_v24 }
   0x8   :  { %v233_v34 = vadd.f32 %v1981_v8, %v162_v25  ;;  %v292_v36 = vmax.f32 %v228_v26, 0.0  ;;  %v293_v37 = vmax.f32 %v229_v27, 0.0  ;;  %v294_v38 = vmax.f32 %v230_v28, 0.0 }
   0x9   :  { %v290_v31 = vmax.f32 %v226_v22, 0.0  ;;  %v291_v32 = vmax.f32 %v227_v23, 0.0  ;;  %v295_v39 = vmax.f32 %v231_v29, 0.0  ;;  %v1684_v42 = vunpack.c.l.bf16 %v1797_v30 }
   0xa   :  { %v355_v43 = vpack.c.bf16 %v293_v37, %v292_v36  ;;  %v1685_v45 = vunpack.c.h.bf16 %v1797_v30  ;;  %v1688_v46 = vunpack.c.l.bf16 %v1798_v35  ;;  %v296_v47 = vmax.f32 %v232_v33, 0.0 }
   0xb   :  { %v354_v41 = vpack.c.bf16 %v291_v32, %v290_v31  ;;  %v356_v44 = vpack.c.bf16 %v295_v39, %v294_v38  ;;  %v163_v48 = vmul.f32 %v1684_v42, %v1967_v2  ;;  %v1689_v49 = vunpack.c.h.bf16 %v1798_v35  ;;  %v1805_v31 = vld [vmem:[%s2813_s0 + $0x60] sm:$0xff]  }
   0xc   :  { %v1692_v50 = vunpack.c.l.bf16 %v1799_v40  ;;  %v297_v52 = vmax.f32 %v233_v34, 0.0  ;;  %v164_v53 = vmul.f32 %v1685_v45, %v1967_v2  ;;  %v165_v54 = vmul.f32 %v1688_v46, %v1967_v2 }
   0xd   :  { %1860 = vmatprep.mubr.msk.bf16.mxu0 %vm387_vm1, %v354_v41  ;;  %v1693_v55 = vunpack.c.h.bf16 %v1799_v40  ;;  %v234_v56 = vadd.f32 %v1981_v8, %v163_v48  ;;  %v166_v57 = vmul.f32 %v1689_v49, %v1967_v2  ;;  %v1696_v61 = vunpack.c.l.bf16 %v1800_v51 }
   0xe   :  { %1861 = vmatmul.mubr.msk.bf16.vlgmr.msra.gmra.mrb[0].mxu0 %vm387_vm1, %v355_v43  ;;  %v167_v58 = vmul.f32 %v1692_v50, %v1967_v2  ;;  %v235_v59 = vadd.f32 %v1981_v8, %v164_v53  ;;  %v1697_v62 = vunpack.c.h.bf16 %v1800_v51  ;;  %v236_v1 = vadd.f32 %v1981_v8, %v165_v54 }
   0xf   :  { %1864 = vmatprep.mubr.msk.bf16.mxu0 %vm387_vm1, %v356_v44  ;;  %v168_v60 = vmul.f32 %v1693_v55, %v1967_v2  ;;  %v298_v0 = vmax.f32 %v234_v56, 0.0  ;;  %v237_v3 = vadd.f32 %v1981_v8, %v166_v57  ;;  %v357_v5 = vpack.c.bf16 %v297_v52, %v296_v47  ;;  %v1806_v44 = vld [vmem:[%s2813_s0 + $0x68] sm:$0xff]   ;;  %v1807_v56 = vld [vmem:[%s2813_s0 + $0x70] sm:$0xff]  }
  0x10   :  { %v238_v4 = vadd.f32 %v1981_v8, %v167_v58  ;;  %v299_v6 = vmax.f32 %v235_v59, 0.0  ;;  %v1700_v10 = vunpack.c.l.bf16 %v1801_v63  ;;  %v169_v13 = vmul.f32 %v1696_v61, %v1967_v2 }
  0x11   :  { %v239_v7 = vadd.f32 %v1981_v8, %v168_v60  ;;  %v170_v14 = vmul.f32 %v1697_v62, %v1967_v2  ;;  %v1701_v15 = vunpack.c.h.bf16 %v1801_v63  ;;  %v300_v16 = vmax.f32 %v236_v1, 0.0  ;;  %v2080_v1 = vld [vmem:[%s2813_s0 + $0x78] sm:$0xff]  }
  0x12   :  { %v358_v12 = vpack.c.bf16 %v299_v6, %v298_v0  ;;  %v301_v17 = vmax.f32 %v237_v3, 0.0  ;;  %v302_v18 = vmax.f32 %v238_v4, 0.0  ;;  %v1704_v19 = vunpack.c.l.bf16 %v1802_v9  ;;  %v1809_v3 = vld [vmem:[%s2813_s0 + $0x80] sm:$0xff]  }
  0x13   :  { %v303_v21 = vmax.f32 %v239_v7, 0.0  ;;  %v171_v22 = vmul.f32 %v1700_v10, %v1967_v2  ;;  %v1705_v23 = vunpack.c.h.bf16 %v1802_v9  ;;  %v1708_v24 = vunpack.c.l.bf16 %v1803_v11 }
  0x14   :  { %v172_v25 = vmul.f32 %v1701_v15, %v1967_v2  ;;  %v173_v26 = vmul.f32 %v1704_v19, %v1967_v2  ;;  %v1709_v27 = vunpack.c.h.bf16 %v1803_v11  ;;  %v1712_v30 = vunpack.c.l.bf16 %v1804_v20  ;;  %v1810_v19 = vld [vmem:[%s2813_s0 + $0x88] sm:$0xff]  }
  0x15   :  { %v174_v28 = vmul.f32 %v1705_v23, %v1967_v2  ;;  %v175_v29 = vmul.f32 %v1708_v24, %v1967_v2  ;;  %v240_v32 = vadd.f32 %v1981_v8, %v169_v13  ;;  %v241_v33 = vadd.f32 %v1981_v8, %v170_v14  ;;  %v1811_v24 = vld [vmem:[%s2813_s0 + $0x90] sm:$0xff]  }
  0x16   :  { %1865 = vmatmul.mubr.msk.bf16.gmra.mrb[4].mxu0 %vm387_vm1, %v357_v5  ;;  %v176_v34 = vmul.f32 %v1709_v27, %v1967_v2  ;;  %v1713_v35 = vunpack.c.h.bf16 %v1804_v20  ;;  %v359_v36 = vpack.c.bf16 %v301_v17, %v300_v16  ;;  %v360_v37 = vpack.c.bf16 %v303_v21, %v302_v18 }
  0x17   :  { %1868 = vmatprep.mubr.msk.bf16.mxu0 %vm387_vm1, %v358_v12  ;;  %v242_v38 = vadd.f32 %v1981_v8, %v171_v22  ;;  %v177_v39 = vmul.f32 %v1712_v30, %v1967_v2  ;;  %v243_v40 = vadd.f32 %v1981_v8, %v172_v25  ;;  %v244_v41 = vadd.f32 %v1981_v8, %v173_v26 }
  0x18   :  { %v178_v42 = vmul.f32 %v1713_v35, %v1967_v2  ;;  %v1716_v43 = vunpack.c.l.bf16 %v1805_v31  ;;  %v245_v45 = vadd.f32 %v1981_v8, %v174_v28  ;;  %v246_v46 = vadd.f32 %v1981_v8, %v175_v29 }
  0x19   :  { %v247_v47 = vadd.f32 %v1981_v8, %v176_v34  ;;  %v248_v48 = vadd.f32 %v1981_v8, %v177_v39  ;;  %v1717_v50 = vunpack.c.h.bf16 %v1805_v31  ;;  %v304_v52 = vmax.f32 %v240_v32, 0.0 }
  0x1a   :  { %v249_v49 = vadd.f32 %v1981_v8, %v178_v42  ;;  %v179_v51 = vmul.f32 %v1716_v43, %v1967_v2  ;;  %v305_v53 = vmax.f32 %v241_v33, 0.0  ;;  %v1720_v54 = vunpack.c.l.bf16 %v1806_v44  ;;  %v1812_v33 = vld [vmem:[%s2813_s0 + $0x98] sm:$0xff]  }
  0x1b   :  { %v1721_v55 = vunpack.c.h.bf16 %v1806_v44  ;;  %v306_v57 = vmax.f32 %v242_v38, 0.0  ;;  %v307_v58 = vmax.f32 %v243_v40, 0.0  ;;  %v308_v59 = vmax.f32 %v244_v41, 0.0 }
  0x1c   :  { %v180_v60 = vmul.f32 %v1717_v50, %v1967_v2  ;;  %v309_v61 = vmax.f32 %v245_v45, 0.0  ;;  %v310_v62 = vmax.f32 %v246_v46, 0.0  ;;  %v311_v63 = vmax.f32 %v247_v47, 0.0  ;;  %v1813_v46 = vld [vmem:[%s2813_s0 + $0xa0] sm:$0xff]  }
  0x1d   :  { %v181_v0 = vmul.f32 %v1720_v54, %v1967_v2  ;;  %v312_v4 = vmax.f32 %v248_v48, 0.0  ;;  %v313_v5 = vmax.f32 %v249_v49, 0.0  ;;  %v2086_v6 = vadd.f32 %v1981_v8, %v179_v51 }
  0x1e   :  { %1869 = vmatmul.mubr.msk.bf16.gmra.mrb[8].mxu0 %vm387_vm1, %v359_v36  ;;  %v1724_v7 = vunpack.c.l.bf16 %v1807_v56  ;;  %v361_v9 = vpack.c.bf16 %v305_v53, %v304_v52  ;;  %v2089_v10 = vadd.f32 %v1981_v8, %v180_v60  ;;  %v182_v11 = vmul.f32 %v1721_v55, %v1967_v2  ;;  %v1814_v55 = vld [vmem:[%s2813_s0 + $0xa8] sm:$0xff]  }
  0x1f   :  { %1872 = vmatprep.mubr.msk.bf16.mxu0 %vm387_vm1, %v360_v37  ;;  %v1725_v12 = vunpack.c.h.bf16 %v1807_v56  ;;  %v362_v13 = vpack.c.bf16 %v307_v58, %v306_v57  ;;  %v1728_v14 = vunpack.c.l.bf16 %v2080_v1  ;;  %v1732_v15 = vunpack.c.l.bf16 %v1809_v3 }
  0x20   :  { %v363_v16 = vpack.c.bf16 %v309_v61, %v308_v59  ;;  %v364_v17 = vpack.c.bf16 %v311_v63, %v310_v62  ;;  %v2094_v18 = vadd.f32 %v1981_v8, %v181_v0  ;;  %v2099_v20 = vpack.c.bf16 %v313_v5, %v312_v4 }
  0x21   :  { %v314_v21 = vmax.f32 %v2086_v6, 0.0  ;;  %v183_v22 = vmul.f32 %v1724_v7, %v1967_v2  ;;  %v1733_v23 = vunpack.c.h.bf16 %v1809_v3  ;;  %v315_v25 = vmax.f32 %v2089_v10, 0.0  ;;  %v1815_v7 = vld [vmem:[%s2813_s0 + $0xb0] sm:$0xff]   ;;  %v1817_v6 = vld [vmem:[%s2813_s0 + $0xc0] sm:$0xff]  }
  0x22   :  { %v2109_v26 = vadd.f32 %v1981_v8, %v182_v11  ;;  %v184_v27 = vmul.f32 %v1725_v12, %v1967_v2  ;;  %v187_v28 = vmul.f32 %v1732_v15, %v1967_v2  ;;  %v1729_v29 = vunpack.c.h.bf16 %v2080_v1 }
  0x23   :  { %v2116_v30 = vmul.f32 %v1728_v14, %v1967_v2  ;;  %v188_v31 = vmul.f32 %v1733_v23, %v1967_v2  ;;  %v1736_v32 = vunpack.c.l.bf16 %v1810_v19  ;;  %v316_v34 = vmax.f32 %v2094_v18, 0.0  ;;  %v1819_v18 = vld [vmem:[%s2813_s0 + $0xd0] sm:$0xff]  }
  0x24   :  { %v258_v35 = vadd.f32 %v1981_v8, %v187_v28  ;;  %v1737_v36 = vunpack.c.h.bf16 %v1810_v19  ;;  %v1740_v37 = vunpack.c.l.bf16 %v1811_v24  ;;  %v2125_v38 = vadd.f32 %v1981_v8, %v183_v22 }
  0x25   :  { %v259_v39 = vadd.f32 %v1981_v8, %v188_v31  ;;  %v189_v40 = vmul.f32 %v1736_v32, %v1967_v2  ;;  %v1741_v41 = vunpack.c.h.bf16 %v1811_v24  ;;  %v1744_v45 = vunpack.c.l.bf16 %v1812_v33  ;;  %v1816_v24 = vld [vmem:[%s2813_s0 + $0xb8] sm:$0xff]  }
  0x26   :  { %1873 = vmatmul.mubr.msk.bf16.gmra.mrb[12].mxu0 %vm387_vm1, %v361_v9  ;;  %v322_v42 = vmax.f32 %v258_v35, 0.0  ;;  %v190_v43 = vmul.f32 %v1737_v36, %v1967_v2  ;;  %v191_v44 = vmul.f32 %v1740_v37, %v1967_v2  ;;  %v2135_v47 = vadd.f32 %v1981_v8, %v184_v27 }
  0x27   :  { %1876 = vmatprep.mubr.msk.bf16.mxu0 %vm387_vm1, %v362_v13  ;;  %v323_v48 = vmax.f32 %v259_v39, 0.0  ;;  %v260_v49 = vadd.f32 %v1981_v8, %v189_v40  ;;  %v192_v50 = vmul.f32 %v1741_v41, %v1967_v2  ;;  %v1745_v53 = vunpack.c.h.bf16 %v1812_v33 }
  0x28   :  { %v261_v51 = vadd.f32 %v1981_v8, %v190_v43  ;;  %v262_v52 = vadd.f32 %v1981_v8, %v191_v44  ;;  %v193_v54 = vmul.f32 %v1744_v45, %v1967_v2  ;;  %v1748_v59 = vunpack.c.l.bf16 %v1813_v46 }
  0x29   :  { %v370_v56 = vpack.c.bf16 %v323_v48, %v322_v42  ;;  %v324_v57 = vmax.f32 %v260_v49, 0.0  ;;  %v263_v58 = vadd.f32 %v1981_v8, %v192_v50  ;;  %v194_v62 = vmul.f32 %v1745_v53, %v1967_v2 }
  0x2a   :  { %v325_v60 = vmax.f32 %v261_v51, 0.0  ;;  %v326_v61 = vmax.f32 %v262_v52, 0.0  ;;  %v264_v63 = vadd.f32 %v1981_v8, %v193_v54  ;;  %v1749_v3 = vunpack.c.h.bf16 %v1813_v46  ;;  %v1818_v52 = vld [vmem:[%s2813_s0 + $0xc8] sm:$0xff]  }
  0x2b   :  { %1892 = vmatprep.mubr.msk.bf16.mxu1 %vm387_vm1, %v370_v56  ;;  %v327_v0 = vmax.f32 %v263_v58, 0.0  ;;  %v195_v4 = vmul.f32 %v1748_v59, %v1967_v2  ;;  %v1752_v5 = vunpack.c.l.bf16 %v1814_v55  ;;  %v265_v10 = vadd.f32 %v1981_v8, %v194_v62 }
  0x2c   :  { %v371_v9 = vpack.c.bf16 %v325_v60, %v324_v57  ;;  %v328_v11 = vmax.f32 %v264_v63, 0.0  ;;  %v1753_v12 = vunpack.c.h.bf16 %v1814_v55  ;;  %v196_v14 = vmul.f32 %v1749_v3, %v1967_v2 }
  0x2d   :  { %v372_v13 = vpack.c.bf16 %v327_v0, %v326_v61  ;;  %v266_v15 = vadd.f32 %v1981_v8, %v195_v4  ;;  %v1756_v22 = vunpack.c.l.bf16 %v1815_v7  ;;  %v1757_v23 = vunpack.c.h.bf16 %v1815_v7 }
  0x2e   :  { %1877 = vmatmul.mubr.msk.bf16.gmra.mrb[16].mxu0 %vm387_vm1, %v363_v16  ;;  %v197_v16 = vmul.f32 %v1752_v5, %v1967_v2  ;;  %1893 = vmatmul.mubr.msk.bf16.vlgmr.msra.gmra.mrb[0].mxu1 %vm387_vm1, %v371_v9  ;;  %v198_v19 = vmul.f32 %v1753_v12, %v1967_v2  ;;  %v366_v27 = vpack.c.bf16 %v315_v25, %v314_v21  ;;  %v317_v28 = vmax.f32 %v2109_v26, 0.0 }
  0x2f   :  { %1880 = vmatprep.mubr.msk.bf16.mxu0 %vm387_vm1, %v364_v17  ;;  %v329_v17 = vmax.f32 %v265_v10, 0.0  ;;  %1896 = vmatprep.mubr.msk.bf16.mxu1 %vm387_vm1, %v372_v13  ;;  %v267_v31 = vadd.f32 %v1981_v8, %v196_v14  ;;  %v330_v32 = vmax.f32 %v266_v15, 0.0  ;;  %v318_v33 = vmax.f32 %v2125_v38, 0.0  ;;  %v1820_v14 = vld [vmem:[%s2813_s0 + $0xd8] sm:$0xff]  }
  0x30   :  { %v186_v35 = vmul.f32 %v1729_v29, %v1967_v2  ;;  %v199_v36 = vmul.f32 %v1756_v22, %v1967_v2  ;;  %v200_v37 = vmul.f32 %v1757_v23, %v1967_v2  ;;  %v319_v21 = vmax.f32 %v2135_v47, 0.0 }
  0x31   :  { %v331_v25 = vmax.f32 %v267_v31, 0.0  ;;  %v1760_v26 = vunpack.c.l.bf16 %v1816_v24  ;;  %v1761_v39 = vunpack.c.h.bf16 %v1816_v24  ;;  %v373_v38 = vpack.c.bf16 %v329_v17, %v328_v11  ;;  %v1821_v17 = vld [vmem:[%s2813_s0 + $0xe0] sm:$0xff]  }
  0x32   :  { %v268_v1 = vadd.f32 %v1981_v8, %v197_v16  ;;  %v269_v29 = vadd.f32 %v1981_v8, %v198_v19  ;;  %v270_v40 = vadd.f32 %v1981_v8, %v199_v36  ;;  %v271_v42 = vadd.f32 %v1981_v8, %v200_v37 }
  0x33   :  { %v374_v41 = vpack.c.bf16 %v331_v25, %v330_v32  ;;  %v1764_v43 = vunpack.c.l.bf16 %v1817_v6  ;;  %v1765_v44 = vunpack.c.h.bf16 %v1817_v6  ;;  %v256_v45 = vadd.f32 %v1981_v8, %v2116_v30 }
  0x34   :  { %v257_v46 = vadd.f32 %v1981_v8, %v186_v35  ;;  %v202_v47 = vmul.f32 %v1761_v39, %v1967_v2  ;;  %v367_v48 = vpack.c.bf16 %v317_v28, %v316_v34  ;;  %v368_v49 = vpack.c.bf16 %v319_v21, %v318_v33  ;;  %v1822_v39 = vld [vmem:[%s2813_s0 + $0xe8] sm:$0xff]  }
  0x35   :  { %v332_v50 = vmax.f32 %v268_v1, 0.0  ;;  %v333_v51 = vmax.f32 %v269_v29, 0.0  ;;  %v334_v30 = vmax.f32 %v270_v40, 0.0  ;;  %v335_v53 = vmax.f32 %v271_v42, 0.0  ;;  %v1823_v29 = vld [vmem:[%s2813_s0 + $0xf0] sm:$0xff]  }
  0x36   :  { %1881 = vmatmul.mubr.msk.bf16.gmra.mrb[20].mxu0 %vm387_vm1, %v2099_v20  ;;  %v201_v20 = vmul.f32 %v1760_v26, %v1967_v2  ;;  %1897 = vmatmul.mubr.msk.bf16.gmra.mrb[4].mxu1 %vm387_vm1, %v373_v38  ;;  %v203_v54 = vmul.f32 %v1764_v43, %v1967_v2  ;;  %v204_v55 = vmul.f32 %v1765_v44, %v1967_v2  ;;  %v320_v34 = vmax.f32 %v256_v45, 0.0 }
  0x37   :  { %1884 = vmatprep.mubr.msk.bf16.mxu0 %vm387_vm1, %v366_v27  ;;  %1900 = vmatprep.mubr.msk.bf16.mxu1 %vm387_vm1, %v374_v41  ;;  %v321_v56 = vmax.f32 %v257_v46, 0.0  ;;  %v273_v58 = vadd.f32 %v1981_v8, %v202_v47  ;;  %v1768_v59 = vunpack.c.l.bf16 %v1818_v52  ;;  %v375_v60 = vpack.c.bf16 %v333_v51, %v332_v50 }
  0x38   :  { %v272_v57 = vadd.f32 %v1981_v8, %v201_v20  ;;  %v1769_v61 = vunpack.c.h.bf16 %v1818_v52  ;;  %v1772_v62 = vunpack.c.l.bf16 %v1819_v18  ;;  %v1773_v63 = vunpack.c.h.bf16 %v1819_v18  ;;  %v1824_v18 = vld [vmem:[%s2813_s0 + $0xf8] sm:$0xff]  }
  0x39   :  { %v376_v0 = vpack.c.bf16 %v335_v53, %v334_v30  ;;  %v274_v3 = vadd.f32 %v1981_v8, %v203_v54  ;;  %v275_v4 = vadd.f32 %v1981_v8, %v204_v55  ;;  %v337_v7 = vmax.f32 %v273_v58, 0.0 }
  0x3a   :  { %v336_v5 = vmax.f32 %v272_v57, 0.0  ;;  %v205_v9 = vmul.f32 %v1768_v59, %v1967_v2  ;;  %v369_v10 = vpack.c.bf16 %v321_v56, %v320_v34  ;;  %v206_v11 = vmul.f32 %v1769_v61, %v1967_v2 }
  0x3b   :  { %v207_v12 = vmul.f32 %v1772_v62, %v1967_v2  ;;  %v208_v13 = vmul.f32 %v1773_v63, %v1967_v2  ;;  %v338_v15 = vmax.f32 %v274_v3, 0.0  ;;  %v339_v16 = vmax.f32 %v275_v4, 0.0 }
  0x3c   :  { %v377_v19 = vpack.c.bf16 %v337_v7, %v336_v5  ;;  %v276_v22 = vadd.f32 %v1981_v8, %v205_v9  ;;  %v1776_v23 = vunpack.c.l.bf16 %v1820_v14  ;;  %v277_v24 = vadd.f32 %v1981_v8, %v206_v11 }
  0x3d   :  { %v278_v27 = vadd.f32 %v1981_v8, %v207_v12  ;;  %v279_v28 = vadd.f32 %v1981_v8, %v208_v13  ;;  %v1777_v31 = vunpack.c.h.bf16 %v1820_v14  ;;  %v378_v32 = vpack.c.bf16 %v339_v16, %v338_v15 }
  0x3e   :  { %1885 = vmatmul.mubr.msk.bf16.gmra.mrb[24].mxu0 %vm387_vm1, %v367_v48  ;;  %1901 = vmatmul.mubr.msk.bf16.gmra.mrb[8].mxu1 %vm387_vm1, %v375_v60  ;;  %v1780_v33 = vunpack.c.l.bf16 %v1821_v17  ;;  %v1781_v35 = vunpack.c.h.bf16 %v1821_v17  ;;  %v340_v36 = vmax.f32 %v276_v22, 0.0  ;;  %v209_v37 = vmul.f32 %v1776_v23, %v1967_v2 }
  0x3f   :  { %1888 = vmatprep.mubr.msk.bf16.mxu0 %vm387_vm1, %v368_v49  ;;  %1904 = vmatprep.mubr.msk.bf16.mxu1 %vm387_vm1, %v376_v0  ;;  %v341_v6 = vmax.f32 %v277_v24, 0.0  ;;  %v342_v21 = vmax.f32 %v278_v27, 0.0  ;;  %v343_v25 = vmax.f32 %v279_v28, 0.0  ;;  %v210_v26 = vmul.f32 %v1777_v31, %v1967_v2 }
  0x40   :  { %v211_v38 = vmul.f32 %v1780_v33, %v1967_v2  ;;  %v212_v1 = vmul.f32 %v1781_v35, %v1967_v2  ;;  %v280_v40 = vadd.f32 %v1981_v8, %v209_v37  ;;  %v1784_v41 = vunpack.c.l.bf16 %v1822_v39 }
  0x41   :  { %v379_v42 = vpack.c.bf16 %v341_v6, %v340_v36  ;;  %v380_v43 = vpack.c.bf16 %v343_v25, %v342_v21  ;;  %v281_v44 = vadd.f32 %v1981_v8, %v210_v26  ;;  %v1785_v45 = vunpack.c.h.bf16 %v1822_v39 }
  0x42   :  { %v282_v46 = vadd.f32 %v1981_v8, %v211_v38  ;;  %v283_v20 = vadd.f32 %v1981_v8, %v212_v1  ;;  %v1788_v47 = vunpack.c.l.bf16 %v1823_v29  ;;  %v1789_v48 = vunpack.c.h.bf16 %v1823_v29 }
  0x43   :  { %v213_v49 = vmul.f32 %v1784_v41, %v1967_v2  ;;  %v344_v50 = vmax.f32 %v280_v40, 0.0  ;;  %v345_v51 = vmax.f32 %v281_v44, 0.0  ;;  %v214_v52 = vmul.f32 %v1785_v45, %v1967_v2 }
  0x44   :  { %v346_v30 = vmax.f32 %v282_v46, 0.0  ;;  %v347_v53 = vmax.f32 %v283_v20, 0.0  ;;  %v215_v54 = vmul.f32 %v1788_v47, %v1967_v2  ;;  %v216_v55 = vmul.f32 %v1789_v48, %v1967_v2 }
  0x45   :  { %v284_v34 = vadd.f32 %v1981_v8, %v213_v49  ;;  %v381_v56 = vpack.c.bf16 %v345_v51, %v344_v50  ;;  %v285_v57 = vadd.f32 %v1981_v8, %v214_v52  ;;  %v1792_v58 = vunpack.c.l.bf16 %v1824_v18 }
  0x46   :  { %1889 = vmatmul.mubr.msk.bf16.gmra.mrb[28].mxu0 %vm387_vm1, %v369_v10  ;;  %1905 = vmatmul.mubr.msk.bf16.gmra.mrb[12].mxu1 %vm387_vm1, %v377_v19  ;;  %v1793_v59 = vunpack.c.h.bf16 %v1824_v18  ;;  %v382_v60 = vpack.c.bf16 %v347_v53, %v346_v30  ;;  %v286_v61 = vadd.f32 %v1981_v8, %v215_v54  ;;  %v287_v62 = vadd.f32 %v1981_v8, %v216_v55 }
  0x47   :  { %1908 = vmatprep.mubr.msk.bf16.mxu1 %vm387_vm1, %v378_v32  ;;  %v348_v63 = vmax.f32 %v284_v34, 0.0  ;;  %v349_v0 = vmax.f32 %v285_v57, 0.0  ;;  %v217_v3 = vmul.f32 %v1792_v58, %v1967_v2 }
  0x48   :  { %v218_v4 = vmul.f32 %v1793_v59, %v1967_v2  ;;  %v350_v5 = vmax.f32 %v286_v61, 0.0  ;;  %v351_v7 = vmax.f32 %v287_v62, 0.0 }
  0x49   :  { %v383_v9 = vpack.c.bf16 %v349_v0, %v348_v63  ;;  %v288_v10 = vadd.f32 %v1981_v8, %v217_v3 }
  0x4a   :  { %v289_v11 = vadd.f32 %v1981_v8, %v218_v4  ;;  %v384_v12 = vpack.c.bf16 %v351_v7, %v350_v5 }
  0x4b   :  { %v352_v13 = vmax.f32 %v288_v10, 0.0 }
  0x4c   :  { %v353_v14 = vmax.f32 %v289_v11, 0.0 }
  0x4e   :  { %1909 = vmatmul.mubr.msk.bf16.gmra.mrb[16].mxu1 %vm387_vm1, %v379_v42  ;;  %v385_v15 = vpack.c.bf16 %v353_v14, %v352_v13 }
  0x4f   :  { %1912 = vmatprep.mubr.msk.bf16.mxu1 %vm387_vm1, %v380_v43 }
  0x56   :  { %1913 = vmatmul.mubr.msk.bf16.gmra.mrb[20].mxu1 %vm387_vm1, %v381_v56 }
  0x57   :  { %1916 = vmatprep.mubr.msk.bf16.mxu1 %vm387_vm1, %v382_v60 }
  0x5e   :  { %1917 = vmatmul.mubr.msk.bf16.gmra.mrb[24].mxu1 %vm387_vm1, %v383_v9 }
  0x5f   :  { %1920 = vmatprep.mubr.msk.bf16.mxu1 %vm387_vm1, %v384_v12 }
  0x66   :  { %1921 = vmatmul.mubr.msk.bf16.gmra.mrb[28].mxu1 %vm387_vm1, %v385_v15 }
  0xe1   :  { %v1862_v2 = vpop.f32.mrb[0].mxu0 }
  0xe2   :  { %v1604_v16 = vpack.c.bf16 %v1862_v2, %v1862_v2  ;;  %v522_v17 = vpop.f32.mrb[1].mxu0 }
  0xe3   :  { %v1602_v19 = vpack.c.bf16 %v522_v17, %v522_v17  ;;  %v1863_v22 = vpop.f32.mrb[2].mxu0 }
  0xe4   :  { %1036 = vst.msk [vmem:[%s2816_s4 + $0x8] sm:$0xf] %vm1033_vm2, %v1604_v16  ;;  %v778_v8 = vpack.c.bf16 %v1863_v22, %v1862_v2  ;;  %v1605_v23 = vpack.c.bf16 %v1863_v22, %v1863_v22  ;;  %v525_v24 = vpop.f32.mrb[3].mxu0 }
  0xe5   :  { %1034 = vst.msk [vmem:[%s2816_s4] sm:$0xf] %vm1033_vm2, %v1602_v19  ;;  %v777_v27 = vpack.c.bf16 %v525_v24, %v522_v17  ;;  %v1603_v28 = vpack.c.bf16 %v525_v24, %v525_v24 }
  0xe6   :  { %1037 = vst.msk [vmem:[%s2816_s4 + $0xc] sm:$0xf] %vm1033_vm2, %v1605_v23  ;;  %v1100_v31 = vunpack.c.l.bf16 %v778_v8  ;;  %v1101_v32 = vunpack.c.h.bf16 %v778_v8 }
  0xe7   :  { %1035 = vst.msk [vmem:[%s2816_s4 + $0x4] sm:$0xf] %vm1033_vm2, %v1603_v28  ;;  %v1098_v33 = vunpack.c.l.bf16 %v777_v27  ;;  %v1099_v35 = vunpack.c.h.bf16 %v777_v27 }
  0xe8   :  { %v1297_v36 = vmul.f32 %v1100_v31, %v1100_v31  ;;  %v1165_v39 = vsel %vm387_vm1, %v1100_v31, 0.0  ;;  %v1298_v40 = vmul.f32 %v1101_v32, %v1101_v32  ;;  %v1167_v49 = vsel %vm387_vm1, %v1101_v32, 0.0 }
  0xe9   :  { %v1162_v37 = vsel %vm387_vm1, %v1098_v33, 0.0  ;;  %v1163_v6 = vsel %vm387_vm1, %v1099_v35, 0.0  ;;  %v1295_v21 = vmul.f32 %v1098_v33, %v1098_v33  ;;  %v1296_v25 = vmul.f32 %v1099_v35, %v1099_v35  ;;  %v1866_v26 = vpop.f32.mrb[4].mxu0 }
  0xea   :  { %v1164_v38 = vadd.f32 %v1163_v6, %v1162_v37  ;;  %v1608_v1 = vpack.c.bf16 %v1866_v26, %v1866_v26  ;;  %v538_v29 = vpop.f32.mrb[5].mxu0  ;;  %v1362_v50 = vsel %vm387_vm1, %v1297_v36, 0.0  ;;  %v1364_v34 = vsel %vm387_vm1, %v1298_v40, 0.0 }
  0xeb   :  { %v1359_v41 = vsel %vm387_vm1, %v1295_v21, 0.0  ;;  %v1360_v42 = vsel %vm387_vm1, %v1296_v25, 0.0  ;;  %v1606_v43 = vpack.c.bf16 %v538_v29, %v538_v29  ;;  %v1867_v44 = vpop.f32.mrb[6].mxu0 }
  0xec   :  { %v1166_v45 = vadd.f32 %v1165_v39, %v1164_v38  ;;  %v1361_v46 = vadd.f32 %v1360_v42, %v1359_v41  ;;  %1040 = vst.msk [vmem:[%s2816_s4 + $0x18] sm:$0xf] %vm1033_vm2, %v1608_v1  ;;  %v780_v20 = vpack.c.bf16 %v1867_v44, %v1866_v26  ;;  %v1609_v47 = vpack.c.bf16 %v1867_v44, %v1867_v44  ;;  %v541_v48 = vpop.f32.mrb[7].mxu0 }
  0xed   :  { %1038 = vst.msk [vmem:[%s2816_s4 + $0x10] sm:$0xf] %vm1033_vm2, %v1606_v43  ;;  %v779_v51 = vpack.c.bf16 %v541_v48, %v538_v29  ;;  %v1607_v52 = vpack.c.bf16 %v541_v48, %v541_v48 }
  0xee   :  { %v1363_v30 = vadd.f32 %v1362_v50, %v1361_v46  ;;  %1041 = vst.msk [vmem:[%s2816_s4 + $0x1c] sm:$0xf] %vm1033_vm2, %v1609_v47  ;;  %v1104_v53 = vunpack.c.l.bf16 %v780_v20  ;;  %v1168_v54 = vadd.f32 %v1167_v49, %v1166_v45  ;;  %v1105_v56 = vunpack.c.h.bf16 %v780_v20 }
  0xef   :  { %1039 = vst.msk [vmem:[%s2816_s4 + $0x14] sm:$0xf] %vm1033_vm2, %v1607_v52  ;;  %v1102_v55 = vunpack.c.l.bf16 %v779_v51  ;;  %v1103_v18 = vunpack.c.h.bf16 %v779_v51 }
  0xf0   :  { %v1173_v61 = vsel %vm387_vm1, %v1104_v53, 0.0  ;;  %v1301_v62 = vmul.f32 %v1104_v53, %v1104_v53  ;;  %v1365_v0 = vadd.f32 %v1364_v34, %v1363_v30  ;;  %v1302_v2 = vmul.f32 %v1105_v56, %v1105_v56 }
  0xf1   :  { %v1169_v57 = vsel %vm387_vm1, %v1102_v55, 0.0  ;;  %v1299_v58 = vmul.f32 %v1102_v55, %v1102_v55  ;;  %v1300_v59 = vmul.f32 %v1103_v18, %v1103_v18  ;;  %v1870_v60 = vpop.f32.mrb[8].mxu0  ;;  %v1171_v4 = vsel %vm387_vm1, %v1103_v18, 0.0 }
  0xf2   :  { %v1170_v63 = vadd.f32 %v1169_v57, %v1168_v54  ;;  %v554_v3 = vpop.f32.mrb[9].mxu0  ;;  %v1612_v7 = vpack.c.bf16 %v1870_v60, %v1870_v60  ;;  %v1370_v24 = vsel %vm387_vm1, %v1301_v62, 0.0  ;;  %v1175_v32 = vsel %vm387_vm1, %v1105_v56, 0.0 }
  0xf3   :  { %v1366_v5 = vsel %vm387_vm1, %v1299_v58, 0.0  ;;  %v1610_v9 = vpack.c.bf16 %v554_v3, %v554_v3  ;;  %v1871_v10 = vpop.f32.mrb[10].mxu0  ;;  %v1368_v16 = vsel %vm387_vm1, %v1300_v59, 0.0  ;;  %v1372_v35 = vsel %vm387_vm1, %v1302_v2, 0.0 }
  0xf4   :  { %v1172_v11 = vadd.f32 %v1171_v4, %v1170_v63  ;;  %v1367_v12 = vadd.f32 %v1366_v5, %v1365_v0  ;;  %v782_v13 = vpack.c.bf16 %v1871_v10, %v1870_v60  ;;  %v1613_v14 = vpack.c.bf16 %v1871_v10, %v1871_v10  ;;  %v557_v15 = vpop.f32.mrb[11].mxu0  ;;  %1044 = vst.msk [vmem:[%s2816_s4 + $0x28] sm:$0xf] %vm1033_vm2, %v1612_v7 }
  0xf5   :  { %1042 = vst.msk [vmem:[%s2816_s4 + $0x20] sm:$0xf] %vm1033_vm2, %v1610_v9  ;;  %v781_v17 = vpack.c.bf16 %v557_v15, %v554_v3  ;;  %v1611_v19 = vpack.c.bf16 %v557_v15, %v557_v15 }
  0xf6   :  { %v1174_v22 = vadd.f32 %v1173_v61, %v1172_v11  ;;  %v1369_v8 = vadd.f32 %v1368_v16, %v1367_v12  ;;  %1045 = vst.msk [vmem:[%s2816_s4 + $0x2c] sm:$0xf] %vm1033_vm2, %v1613_v14  ;;  %v1108_v23 = vunpack.c.l.bf16 %v782_v13  ;;  %v1109_v27 = vunpack.c.h.bf16 %v782_v13 }
  0xf7   :  { %1043 = vst.msk [vmem:[%s2816_s4 + $0x24] sm:$0xf] %vm1033_vm2, %v1611_v19  ;;  %v1106_v28 = vunpack.c.l.bf16 %v781_v17  ;;  %v1107_v31 = vunpack.c.h.bf16 %v781_v17 }
  0xf8   :  { %v1371_v33 = vadd.f32 %v1370_v24, %v1369_v8  ;;  %v1176_v36 = vadd.f32 %v1175_v32, %v1174_v22  ;;  %v1305_v21 = vmul.f32 %v1108_v23, %v1108_v23  ;;  %v1306_v1 = vmul.f32 %v1109_v27, %v1109_v27 }
  0xf9   :  { %v1177_v37 = vsel %vm387_vm1, %v1106_v28, 0.0  ;;  %v1874_v6 = vpop.f32.mrb[12].mxu0  ;;  %v1303_v25 = vmul.f32 %v1106_v28, %v1106_v28  ;;  %v1304_v26 = vmul.f32 %v1107_v31, %v1107_v31  ;;  %v1179_v43 = vsel %vm387_vm1, %v1107_v31, 0.0 }
  0xfa   :  { %v1373_v39 = vadd.f32 %v1372_v35, %v1371_v33  ;;  %v570_v38 = vpop.f32.mrb[13].mxu0  ;;  %v1178_v29 = vadd.f32 %v1177_v37, %v1176_v36  ;;  %v1616_v40 = vpack.c.bf16 %v1874_v6, %v1874_v6  ;;  %v1181_v51 = vsel %vm387_vm1, %v1108_v23, 0.0 }
  0xfb   :  { %v1614_v41 = vpack.c.bf16 %v570_v38, %v570_v38  ;;  %v1875_v42 = vpop.f32.mrb[14].mxu0  ;;  %v1374_v44 = vsel %vm387_vm1, %v1303_v25, 0.0  ;;  %v1376_v52 = vsel %vm387_vm1, %v1304_v26, 0.0  ;;  %v1183_v56 = vsel %vm387_vm1, %v1109_v27, 0.0 }
  0xfc   :  { %v784_v45 = vpack.c.bf16 %v1875_v42, %v1874_v6  ;;  %v1617_v46 = vpack.c.bf16 %v1875_v42, %v1875_v42  ;;  %v573_v20 = vpop.f32.mrb[15].mxu0  ;;  %v1180_v47 = vadd.f32 %v1179_v43, %v1178_v29  ;;  %v1375_v48 = vadd.f32 %v1374_v44, %v1373_v39  ;;  %1048 = vst.msk [vmem:[%s2816_s4 + $0x38] sm:$0xf] %vm1033_vm2, %v1616_v40 }
  0xfd   :  { %1046 = vst.msk [vmem:[%s2816_s4 + $0x30] sm:$0xf] %vm1033_vm2, %v1614_v41  ;;  %v783_v49 = vpack.c.bf16 %v573_v20, %v570_v38  ;;  %v1615_v50 = vpack.c.bf16 %v573_v20, %v573_v20  ;;  %v1378_v57 = vsel %vm387_vm1, %v1305_v21, 0.0  ;;  %v1380_v58 = vsel %vm387_vm1, %v1306_v1, 0.0 }
  0xfe   :  { %1049 = vst.msk [vmem:[%s2816_s4 + $0x3c] sm:$0xf] %vm1033_vm2, %v1617_v46  ;;  %v1112_v30 = vunpack.c.l.bf16 %v784_v45  ;;  %v1113_v53 = vunpack.c.h.bf16 %v784_v45  ;;  %v1182_v54 = vadd.f32 %v1181_v51, %v1180_v47  ;;  %v1377_v55 = vadd.f32 %v1376_v52, %v1375_v48 }
  0xff   :  { %1047 = vst.msk [vmem:[%s2816_s4 + $0x34] sm:$0xf] %vm1033_vm2, %v1615_v50  ;;  %v1110_v18 = vunpack.c.l.bf16 %v783_v49  ;;  %v1111_v34 = vunpack.c.h.bf16 %v783_v49 }
 0x100   :  { %v1379_v59 = vadd.f32 %v1378_v57, %v1377_v55  ;;  %v1189_v60 = vsel %vm387_vm1, %v1112_v30, 0.0  ;;  %v1184_v61 = vadd.f32 %v1183_v56, %v1182_v54  ;;  %v1309_v0 = vmul.f32 %v1112_v30, %v1112_v30 }
 0x101   :  { %v1185_v62 = vsel %vm387_vm1, %v1110_v18, 0.0  ;;  %v1878_v63 = vpop.f32.mrb[16].mxu0  ;;  %v1310_v3 = vmul.f32 %v1113_v53, %v1113_v53  ;;  %v1307_v4 = vmul.f32 %v1110_v18, %v1110_v18  ;;  %v1308_v5 = vmul.f32 %v1111_v34, %v1111_v34  ;;  %v1894_v24 = vpop.f32.mrb[0].mxu1 }
 0x102   :  { %v586_v7 = vpop.f32.mrb[17].mxu0  ;;  %v1186_v9 = vadd.f32 %v1185_v62, %v1184_v61  ;;  %v1381_v10 = vadd.f32 %v1380_v58, %v1379_v59  ;;  %v1620_v11 = vpack.c.bf16 %v1878_v63, %v1878_v63  ;;  %v1187_v14 = vsel %vm387_vm1, %v1111_v34, 0.0  ;;  %v2369_v33 = vpop.f32.mrb[1].mxu1 }
 0x103   :  { %v1618_v12 = vpack.c.bf16 %v586_v7, %v586_v7  ;;  %v1879_v13 = vpop.f32.mrb[18].mxu0  ;;  %v1382_v15 = vsel %vm387_vm1, %v1307_v4, 0.0  ;;  %v1384_v27 = vsel %vm387_vm1, %v1308_v5, 0.0  ;;  %v1636_v32 = vpack.c.bf16 %v1894_v24, %v1894_v24  ;;  %v2375_v21 = vpop.f32.mrb[2].mxu1 }
 0x104   :  { %v786_v2 = vpack.c.bf16 %v1879_v13, %v1878_v63  ;;  %v1621_v16 = vpack.c.bf16 %v1879_v13, %v1879_v13  ;;  %v589_v17 = vpop.f32.mrb[19].mxu0  ;;  %v1188_v19 = vadd.f32 %v1187_v14, %v1186_v9  ;;  %v1383_v22 = vadd.f32 %v1382_v15, %v1381_v10  ;;  %1052 = vst.msk [vmem:[%s2816_s4 + $0x48] sm:$0xf] %vm1033_vm2, %v1620_v11  ;;  %v2385_v1 = vpop.f32.mrb[3].mxu1 }
 0x105   :  { %1050 = vst.msk [vmem:[%s2816_s4 + $0x40] sm:$0xf] %vm1033_vm2, %v1618_v12  ;;  %v785_v8 = vpack.c.bf16 %v589_v17, %v586_v7  ;;  %v1619_v23 = vpack.c.bf16 %v589_v17, %v589_v17  ;;  %v1191_v25 = vsel %vm387_vm1, %v1113_v53, 0.0  ;;  %v1386_v26 = vsel %vm387_vm1, %v1309_v0, 0.0  ;;  %1068 = vst.msk [vmem:[%s2816_s4 + $0x88] sm:$0xf] %vm1033_vm2, %v1636_v32 }
 0x106   :  { %1053 = vst.msk [vmem:[%s2816_s4 + $0x4c] sm:$0xf] %vm1033_vm2, %v1621_v16  ;;  %v1116_v28 = vunpack.c.l.bf16 %v786_v2  ;;  %v1117_v31 = vunpack.c.h.bf16 %v786_v2  ;;  %v1190_v35 = vadd.f32 %v1189_v60, %v1188_v19  ;;  %v1385_v36 = vadd.f32 %v1384_v27, %v1383_v22 }
 0x107   :  { %1051 = vst.msk [vmem:[%s2816_s4 + $0x44] sm:$0xf] %vm1033_vm2, %v1619_v23  ;;  %v1114_v37 = vunpack.c.l.bf16 %v785_v8  ;;  %v1115_v6 = vunpack.c.h.bf16 %v785_v8  ;;  %v1388_v39 = vsel %vm387_vm1, %v1310_v3, 0.0  ;;  %v1634_v62 = vpack.c.bf16 %v2369_v33, %v2369_v33 }
 0x108   :  { %v1197_v38 = vsel %vm387_vm1, %v1116_v28, 0.0  ;;  %v1387_v29 = vadd.f32 %v1386_v26, %v1385_v36  ;;  %v1313_v40 = vmul.f32 %v1116_v28, %v1116_v28  ;;  %v1192_v41 = vadd.f32 %v1191_v25, %v1190_v35 }
 0x109   :  { %v1193_v42 = vsel %vm387_vm1, %v1114_v37, 0.0  ;;  %v1882_v43 = vpop.f32.mrb[20].mxu0  ;;  %v1314_v44 = vmul.f32 %v1117_v31, %v1117_v31  ;;  %v1195_v45 = vsel %vm387_vm1, %v1115_v6, 0.0  ;;  %v1311_v46 = vmul.f32 %v1114_v37, %v1114_v37  ;;  %v2399_v59 = vpop.f32.mrb[4].mxu1  ;;  %1066 = vst.msk [vmem:[%s2816_s4 + $0x80] sm:$0xf] %vm1033_vm2, %v1634_v62 }
 0x10a   :  { %v1312_v20 = vmul.f32 %v1115_v6, %v1115_v6  ;;  %v602_v47 = vpop.f32.mrb[21].mxu0  ;;  %v1194_v48 = vadd.f32 %v1193_v42, %v1192_v41  ;;  %v1389_v49 = vadd.f32 %v1388_v39, %v1387_v29  ;;  %v1624_v50 = vpack.c.bf16 %v1882_v43, %v1882_v43  ;;  %v2410_v0 = vpop.f32.mrb[5].mxu1 }
 0x10b   :  { %v1622_v51 = vpack.c.bf16 %v602_v47, %v602_v47  ;;  %v1883_v52 = vpop.f32.mrb[22].mxu0  ;;  %v1390_v30 = vsel %vm387_vm1, %v1311_v46, 0.0  ;;  %v2408_v63 = vpack.c.bf16 %v2375_v21, %v1894_v24  ;;  %v2416_v9 = vpop.f32.mrb[6].mxu1  ;;  %v1199_v10 = vsel %vm387_vm1, %v1117_v31, 0.0 }
 0x10c   :  { %v1392_v53 = vsel %vm387_vm1, %v1312_v20, 0.0  ;;  %v788_v54 = vpack.c.bf16 %v1883_v52, %v1882_v43  ;;  %v1625_v55 = vpack.c.bf16 %v1883_v52, %v1883_v52  ;;  %v605_v18 = vpop.f32.mrb[23].mxu0  ;;  %v1196_v34 = vadd.f32 %v1195_v45, %v1194_v48  ;;  %1056 = vst.msk [vmem:[%s2816_s4 + $0x58] sm:$0xf] %vm1033_vm2, %v1624_v50  ;;  %v2424_v12 = vpop.f32.mrb[7].mxu1 }
 0x10d   :  { %v1391_v56 = vadd.f32 %v1390_v30, %v1389_v49  ;;  %1054 = vst.msk [vmem:[%s2816_s4 + $0x50] sm:$0xf] %vm1033_vm2, %v1622_v51  ;;  %v787_v57 = vpack.c.bf16 %v605_v18, %v602_v47  ;;  %v1623_v58 = vpack.c.bf16 %v605_v18, %v605_v18  ;;  %v1394_v11 = vsel %vm387_vm1, %v1313_v40, 0.0 }
 0x10e   :  { %1057 = vst.msk [vmem:[%s2816_s4 + $0x5c] sm:$0xf] %vm1033_vm2, %v1625_v55  ;;  %v1120_v60 = vunpack.c.l.bf16 %v788_v54  ;;  %v1121_v61 = vunpack.c.h.bf16 %v788_v54  ;;  %v1198_v3 = vadd.f32 %v1197_v38, %v1196_v34  ;;  %v1396_v13 = vsel %vm387_vm1, %v1314_v44, 0.0 }
 0x10f   :  { %v1393_v4 = vadd.f32 %v1392_v53, %v1391_v56  ;;  %1055 = vst.msk [vmem:[%s2816_s4 + $0x54] sm:$0xf] %vm1033_vm2, %v1623_v58  ;;  %v1118_v5 = vunpack.c.l.bf16 %v787_v57  ;;  %v1119_v7 = vunpack.c.h.bf16 %v787_v57  ;;  %v1637_v44 = vpack.c.bf16 %v2375_v21, %v2375_v21 }
 0x110   :  { %v1200_v15 = vadd.f32 %v1199_v10, %v1198_v3  ;;  %v1317_v17 = vmul.f32 %v1120_v60, %v1120_v60  ;;  %v1318_v19 = vmul.f32 %v1121_v61, %v1121_v61  ;;  %v1205_v41 = vsel %vm387_vm1, %v1120_v60, 0.0 }
 0x111   :  { %v1395_v14 = vadd.f32 %v1394_v11, %v1393_v4  ;;  %v1201_v2 = vsel %vm387_vm1, %v1118_v5, 0.0  ;;  %v1886_v16 = vpop.f32.mrb[24].mxu0  ;;  %v1315_v22 = vmul.f32 %v1118_v5, %v1118_v5  ;;  %v1316_v8 = vmul.f32 %v1119_v7, %v1119_v7  ;;  %v2438_v40 = vpop.f32.mrb[8].mxu1  ;;  %1069 = vst.msk [vmem:[%s2816_s4 + $0x8c] sm:$0xf] %vm1033_vm2, %v1637_v44 }
 0x112   :  { %v618_v23 = vpop.f32.mrb[25].mxu0  ;;  %v1202_v24 = vadd.f32 %v1201_v2, %v1200_v15  ;;  %v1628_v28 = vpack.c.bf16 %v1886_v16, %v1886_v16  ;;  %v1203_v35 = vsel %vm387_vm1, %v1119_v7, 0.0  ;;  %v2448_v45 = vpop.f32.mrb[9].mxu1  ;;  %v1207_v50 = vsel %vm387_vm1, %v1121_v61, 0.0 }
 0x113   :  { %v1397_v27 = vadd.f32 %v1396_v13, %v1395_v14  ;;  %v1626_v31 = vpack.c.bf16 %v618_v23, %v618_v23  ;;  %v1887_v32 = vpop.f32.mrb[26].mxu0  ;;  %v1398_v36 = vsel %vm387_vm1, %v1315_v22, 0.0  ;;  %v1400_v42 = vsel %vm387_vm1, %v1316_v8, 0.0  ;;  %v2454_v49 = vpop.f32.mrb[10].mxu1 }
 0x114   :  { %v790_v37 = vpack.c.bf16 %v1887_v32, %v1886_v16  ;;  %v1629_v6 = vpack.c.bf16 %v1887_v32, %v1887_v32  ;;  %v621_v25 = vpop.f32.mrb[27].mxu0  ;;  %v1204_v26 = vadd.f32 %v1203_v35, %v1202_v24  ;;  %1060 = vst.msk [vmem:[%s2816_s4 + $0x68] sm:$0xf] %vm1033_vm2, %v1628_v28  ;;  %v1402_v51 = vsel %vm387_vm1, %v1317_v17, 0.0  ;;  %v2462_v21 = vpop.f32.mrb[11].mxu1 }
 0x115   :  { %v1399_v39 = vadd.f32 %v1398_v36, %v1397_v27  ;;  %1058 = vst.msk [vmem:[%s2816_s4 + $0x60] sm:$0xf] %vm1033_vm2, %v1626_v31  ;;  %v789_v38 = vpack.c.bf16 %v621_v25, %v618_v23  ;;  %v1627_v29 = vpack.c.bf16 %v621_v25, %v621_v25  ;;  %v1404_v52 = vsel %vm387_vm1, %v1318_v19, 0.0 }
 0x116   :  { %1061 = vst.msk [vmem:[%s2816_s4 + $0x6c] sm:$0xf] %vm1033_vm2, %v1629_v6  ;;  %v1124_v43 = vunpack.c.l.bf16 %v790_v37  ;;  %v1206_v46 = vadd.f32 %v1205_v41, %v1204_v26  ;;  %v1125_v18 = vunpack.c.h.bf16 %v790_v37 }
 0x117   :  { %v1401_v20 = vadd.f32 %v1400_v42, %v1399_v39  ;;  %1059 = vst.msk [vmem:[%s2816_s4 + $0x64] sm:$0xf] %vm1033_vm2, %v1627_v29  ;;  %v1122_v47 = vunpack.c.l.bf16 %v789_v38  ;;  %v1123_v48 = vunpack.c.h.bf16 %v789_v38 }
 0x118   :  { %v1208_v53 = vadd.f32 %v1207_v50, %v1206_v46  ;;  %v1321_v34 = vmul.f32 %v1124_v43, %v1124_v43  ;;  %v1213_v19 = vsel %vm387_vm1, %v1124_v43, 0.0  ;;  %v1322_v22 = vmul.f32 %v1125_v18, %v1125_v18 }
 0x119   :  { %v1403_v30 = vadd.f32 %v1402_v51, %v1401_v20  ;;  %v1209_v54 = vsel %vm387_vm1, %v1122_v47, 0.0  ;;  %v1890_v55 = vpop.f32.mrb[28].mxu0  ;;  %v1319_v56 = vmul.f32 %v1122_v47, %v1122_v47  ;;  %v1320_v57 = vmul.f32 %v1123_v48, %v1123_v48  ;;  %v2476_v17 = vpop.f32.mrb[12].mxu1 }
 0x11a   :  { %v634_v58 = vpop.f32.mrb[29].mxu0  ;;  %v1210_v60 = vadd.f32 %v1209_v54, %v1208_v53  ;;  %v1632_v62 = vpack.c.bf16 %v1890_v55, %v1890_v55  ;;  %v1211_v5 = vsel %vm387_vm1, %v1123_v48, 0.0  ;;  %v2484_v24 = vpop.f32.mrb[13].mxu1  ;;  %v1215_v36 = vsel %vm387_vm1, %v1125_v18, 0.0 }
 0x11b   :  { %v1405_v61 = vadd.f32 %v1404_v52, %v1403_v30  ;;  %v1630_v3 = vpack.c.bf16 %v634_v58, %v634_v58  ;;  %v1891_v4 = vpop.f32.mrb[30].mxu0  ;;  %v1406_v7 = vsel %vm387_vm1, %v1319_v56, 0.0  ;;  %v1408_v8 = vsel %vm387_vm1, %v1320_v57, 0.0  ;;  %v2490_v35 = vpop.f32.mrb[14].mxu1 }
 0x11c   :  { %v792_v10 = vpack.c.bf16 %v1891_v4, %v1890_v55  ;;  %v1633_v11 = vpack.c.bf16 %v1891_v4, %v1891_v4  ;;  %v637_v13 = vpop.f32.mrb[31].mxu0  ;;  %v1212_v14 = vadd.f32 %v1211_v5, %v1210_v60  ;;  %1064 = vst.msk [vmem:[%s2816_s4 + $0x78] sm:$0xf] %vm1033_vm2, %v1632_v62  ;;  %v1410_v37 = vsel %vm387_vm1, %v1321_v34, 0.0  ;;  %v2494_v6 = vpop.f32.mrb[15].mxu1 }
 0x11d   :  { %v1407_v15 = vadd.f32 %v1406_v7, %v1405_v61  ;;  %1062 = vst.msk [vmem:[%s2816_s4 + $0x70] sm:$0xf] %vm1033_vm2, %v1630_v3  ;;  %v791_v2 = vpack.c.bf16 %v637_v13, %v634_v58  ;;  %v1631_v16 = vpack.c.bf16 %v637_v13, %v637_v13  ;;  %v1412_v29 = vsel %vm387_vm1, %v1322_v22, 0.0 }
 0x11e   :  { %1065 = vst.msk [vmem:[%s2816_s4 + $0x7c] sm:$0xf] %vm1033_vm2, %v1633_v11  ;;  %v1128_v23 = vunpack.c.l.bf16 %v792_v10  ;;  %v1214_v27 = vadd.f32 %v1213_v19, %v1212_v14  ;;  %v1129_v26 = vunpack.c.h.bf16 %v792_v10  ;;  %v1132_v43 = vunpack.c.l.bf16 %v2408_v63 }
 0x11f   :  { %v1409_v28 = vadd.f32 %v1408_v8, %v1407_v15  ;;  %1063 = vst.msk [vmem:[%s2816_s4 + $0x74] sm:$0xf] %vm1033_vm2, %v1631_v16  ;;  %v1126_v31 = vunpack.c.l.bf16 %v791_v2  ;;  %v1127_v32 = vunpack.c.h.bf16 %v791_v2  ;;  %v1133_v47 = vunpack.c.h.bf16 %v2408_v63 }
 0x120   :  { %v1216_v39 = vadd.f32 %v1215_v36, %v1214_v27  ;;  %v1221_v44 = vsel %vm387_vm1, %v1128_v23, 0.0  ;;  %v1325_v48 = vmul.f32 %v1128_v23, %v1128_v23  ;;  %v793_v52 = vpack.c.bf16 %v2385_v1, %v2369_v33 }
 0x121   :  { %v1411_v25 = vadd.f32 %v1410_v37, %v1409_v28  ;;  %v1217_v38 = vsel %vm387_vm1, %v1126_v31, 0.0  ;;  %v1323_v41 = vmul.f32 %v1126_v31, %v1126_v31  ;;  %v1324_v42 = vmul.f32 %v1127_v32, %v1127_v32  ;;  %v2507_v18 = vpop.f32.mrb[16].mxu1 }
 0x122   :  { %v1218_v46 = vadd.f32 %v1217_v38, %v1216_v39  ;;  %v1219_v50 = vsel %vm387_vm1, %v1127_v32, 0.0  ;;  %v1326_v30 = vmul.f32 %v1129_v26, %v1129_v26  ;;  %v1635_v55 = vpack.c.bf16 %v2385_v1, %v2385_v1  ;;  %v2512_v58 = vpop.f32.mrb[17].mxu1 }
 0x123   :  { %v1413_v20 = vadd.f32 %v1412_v29, %v1411_v25  ;;  %v1414_v51 = vsel %vm387_vm1, %v1323_v41, 0.0  ;;  %v1416_v34 = vsel %vm387_vm1, %v1324_v42, 0.0  ;;  %v1130_v56 = vunpack.c.l.bf16 %v793_v52  ;;  %v2522_v62 = vpop.f32.mrb[18].mxu1 }
 0x124   :  { %v1220_v53 = vadd.f32 %v1219_v50, %v1218_v46  ;;  %v1131_v63 = vunpack.c.h.bf16 %v793_v52  ;;  %v1640_v57 = vpack.c.bf16 %v2399_v59, %v2399_v59  ;;  %1067 = vst.msk [vmem:[%s2816_s4 + $0x84] sm:$0xf] %vm1033_vm2, %v1635_v55  ;;  %v1638_v33 = vpack.c.bf16 %v2410_v0, %v2410_v0  ;;  %v2530_v7 = vpop.f32.mrb[19].mxu1 }
 0x125   :  { %v1415_v54 = vadd.f32 %v1414_v51, %v1413_v20  ;;  %v796_v1 = vpack.c.bf16 %v2416_v9, %v2399_v59  ;;  %v1223_v3 = vsel %vm387_vm1, %v1129_v26, 0.0  ;;  %v1418_v4 = vsel %vm387_vm1, %v1325_v48, 0.0 }
 0x126   :  { %v1222_v60 = vadd.f32 %v1221_v44, %v1220_v53  ;;  %v1327_v5 = vmul.f32 %v1130_v56, %v1130_v56  ;;  %1072 = vst.msk [vmem:[%s2816_s4 + $0x98] sm:$0xf] %vm1033_vm2, %v1640_v57  ;;  %v1420_v10 = vsel %vm387_vm1, %v1326_v30, 0.0  ;;  %1070 = vst.msk [vmem:[%s2816_s4 + $0x90] sm:$0xf] %vm1033_vm2, %v1638_v33  ;;  %v1641_v59 = vpack.c.bf16 %v2416_v9, %v2416_v9 }
 0x127   :  { %v1417_v61 = vadd.f32 %v1416_v34, %v1415_v54  ;;  %v1329_v14 = vmul.f32 %v1132_v43, %v1132_v43  ;;  %v1225_v15 = vsel %vm387_vm1, %v1130_v56, 0.0  ;;  %v1328_v2 = vmul.f32 %v1131_v63, %v1131_v63 }
 0x128   :  { %v1224_v13 = vadd.f32 %v1223_v3, %v1222_v60  ;;  %v795_v16 = vpack.c.bf16 %v2424_v12, %v2410_v0  ;;  %v1330_v19 = vmul.f32 %v1133_v47, %v1133_v47  ;;  %1073 = vst.msk [vmem:[%s2816_s4 + $0x9c] sm:$0xf] %vm1033_vm2, %v1641_v59  ;;  %v1227_v23 = vsel %vm387_vm1, %v1131_v63, 0.0 }
 0x129   :  { %v1419_v11 = vadd.f32 %v1418_v4, %v1417_v61  ;;  %v1422_v27 = vsel %vm387_vm1, %v1327_v5, 0.0  ;;  %v1639_v9 = vpack.c.bf16 %v2424_v12, %v2424_v12  ;;  %v1229_v31 = vsel %vm387_vm1, %v1132_v43, 0.0  ;;  %v2552_v37 = vpop.f32.mrb[20].mxu1 }
 0x12a   :  { %v1226_v22 = vadd.f32 %v1225_v15, %v1224_v13  ;;  %v1134_v28 = vunpack.c.l.bf16 %v795_v16  ;;  %v1231_v0 = vsel %vm387_vm1, %v1133_v47, 0.0  ;;  %v1426_v25 = vsel %vm387_vm1, %v1329_v14, 0.0  ;;  %v2562_v38 = vpop.f32.mrb[21].mxu1 }
 0x12b   :  { %v1421_v8 = vadd.f32 %v1420_v10, %v1419_v11  ;;  %v1424_v26 = vsel %vm387_vm1, %v1328_v2, 0.0  ;;  %1071 = vst.msk [vmem:[%s2816_s4 + $0x94] sm:$0xf] %vm1033_vm2, %v1639_v9  ;;  %v1135_v39 = vunpack.c.h.bf16 %v795_v16  ;;  %v1644_v12 = vpack.c.bf16 %v2438_v40, %v2438_v40  ;;  %v2565_v44 = vpop.f32.mrb[22].mxu1 }
 0x12c   :  { %v1228_v32 = vadd.f32 %v1227_v23, %v1226_v22  ;;  %v1428_v29 = vsel %vm387_vm1, %v1330_v19, 0.0  ;;  %v1136_v43 = vunpack.c.l.bf16 %v796_v1  ;;  %v1331_v46 = vmul.f32 %v1134_v28, %v1134_v28  ;;  %v2577_v50 = vpop.f32.mrb[23].mxu1 }
 0x12d   :  { %v1423_v36 = vadd.f32 %v1422_v27, %v1421_v8  ;;  %1076 = vst.msk [vmem:[%s2816_s4 + $0xa8] sm:$0xf] %vm1033_vm2, %v1644_v12  ;;  %v1642_v20 = vpack.c.bf16 %v2448_v45, %v2448_v45  ;;  %v798_v47 = vpack.c.bf16 %v2454_v49, %v2438_v40  ;;  %v1645_v48 = vpack.c.bf16 %v2454_v49, %v2454_v49 }
 0x12e   :  { %v1230_v41 = vadd.f32 %v1229_v31, %v1228_v32  ;;  %v1137_v52 = vunpack.c.h.bf16 %v796_v1  ;;  %v797_v53 = vpack.c.bf16 %v2462_v21, %v2448_v45  ;;  %v1233_v54 = vsel %vm387_vm1, %v1134_v28, 0.0 }
 0x12f   :  { %v1425_v42 = vadd.f32 %v1424_v26, %v1423_v36  ;;  %v1332_v55 = vmul.f32 %v1135_v39, %v1135_v39  ;;  %1074 = vst.msk [vmem:[%s2816_s4 + $0xa0] sm:$0xf] %vm1033_vm2, %v1642_v20  ;;  %1077 = vst.msk [vmem:[%s2816_s4 + $0xac] sm:$0xf] %vm1033_vm2, %v1645_v48  ;;  %v1643_v40 = vpack.c.bf16 %v2462_v21, %v2462_v21  ;;  %v1235_v63 = vsel %vm387_vm1, %v1135_v39, 0.0 }
 0x130   :  { %v1232_v30 = vadd.f32 %v1231_v0, %v1230_v41  ;;  %v1648_v49 = vpack.c.bf16 %v2476_v17, %v2476_v17  ;;  %v1333_v56 = vmul.f32 %v1136_v43, %v1136_v43  ;;  %v1430_v57 = vsel %vm387_vm1, %v1331_v46, 0.0 }
 0x131   :  { %v1427_v51 = vadd.f32 %v1426_v25, %v1425_v42  ;;  %1075 = vst.msk [vmem:[%s2816_s4 + $0xa4] sm:$0xf] %vm1033_vm2, %v1643_v40  ;;  %v1138_v60 = vunpack.c.l.bf16 %v797_v53  ;;  %v1237_v21 = vsel %vm387_vm1, %v1136_v43, 0.0  ;;  %v1334_v61 = vmul.f32 %v1137_v52, %v1137_v52  ;;  %v2605_v3 = vpop.f32.mrb[24].mxu1 }
 0x132   :  { %v1234_v45 = vadd.f32 %v1233_v54, %v1232_v30  ;;  %1080 = vst.msk [vmem:[%s2816_s4 + $0xb8] sm:$0xf] %vm1033_vm2, %v1648_v49  ;;  %v1239_v4 = vsel %vm387_vm1, %v1137_v52, 0.0  ;;  %v1432_v5 = vsel %vm387_vm1, %v1332_v55, 0.0  ;;  %v1140_v10 = vunpack.c.l.bf16 %v798_v47  ;;  %v2609_v13 = vpop.f32.mrb[25].mxu1 }
 0x133   :  { %v1429_v34 = vadd.f32 %v1428_v29, %v1427_v51  ;;  %v1139_v11 = vunpack.c.h.bf16 %v797_v53  ;;  %v1646_v15 = vpack.c.bf16 %v2484_v24, %v2484_v24  ;;  %v800_v2 = vpack.c.bf16 %v2490_v35, %v2476_v17  ;;  %v2615_v16 = vpop.f32.mrb[26].mxu1 }
 0x134   :  { %v1236_v33 = vadd.f32 %v1235_v63, %v1234_v45  ;;  %v1434_v19 = vsel %vm387_vm1, %v1333_v56, 0.0  ;;  %v1335_v22 = vmul.f32 %v1138_v60, %v1138_v60  ;;  %v1649_v8 = vpack.c.bf16 %v2490_v35, %v2490_v35  ;;  %v2622_v27 = vpop.f32.mrb[27].mxu1 }
 0x135   :  { %v1431_v1 = vadd.f32 %v1430_v57, %v1429_v34  ;;  %v799_v23 = vpack.c.bf16 %v2494_v6, %v2484_v24  ;;  %v1436_v9 = vsel %vm387_vm1, %v1334_v61, 0.0  ;;  %v1141_v31 = vunpack.c.h.bf16 %v798_v47  ;;  %1078 = vst.msk [vmem:[%s2816_s4 + $0xb0] sm:$0xf] %vm1033_vm2, %v1646_v15 }
 0x136   :  { %v1238_v59 = vadd.f32 %v1237_v21, %v1236_v33  ;;  %v1241_v17 = vsel %vm387_vm1, %v1138_v60, 0.0  ;;  %v1336_v32 = vmul.f32 %v1139_v11, %v1139_v11  ;;  %1081 = vst.msk [vmem:[%s2816_s4 + $0xbc] sm:$0xf] %vm1033_vm2, %v1649_v8  ;;  %v1647_v24 = vpack.c.bf16 %v2494_v6, %v2494_v6 }
 0x137   :  { %v1433_v14 = vadd.f32 %v1432_v5, %v1431_v1  ;;  %v1652_v35 = vpack.c.bf16 %v2507_v18, %v2507_v18  ;;  %v1337_v36 = vmul.f32 %v1140_v10, %v1140_v10  ;;  %v1245_v39 = vsel %vm387_vm1, %v1140_v10, 0.0 }
 0x138   :  { %v1240_v0 = vadd.f32 %v1239_v4, %v1238_v59  ;;  %v1243_v12 = vsel %vm387_vm1, %v1139_v11, 0.0  ;;  %v1438_v29 = vsel %vm387_vm1, %v1335_v22, 0.0  ;;  %1079 = vst.msk [vmem:[%s2816_s4 + $0xb4] sm:$0xf] %vm1033_vm2, %v1647_v24  ;;  %v1142_v41 = vunpack.c.l.bf16 %v799_v23 }
 0x139   :  { %v1435_v28 = vadd.f32 %v1434_v19, %v1433_v14  ;;  %1084 = vst.msk [vmem:[%s2816_s4 + $0xc8] sm:$0xf] %vm1033_vm2, %v1652_v35  ;;  %v1247_v6 = vsel %vm387_vm1, %v1141_v31, 0.0  ;;  %v1338_v42 = vmul.f32 %v1141_v31, %v1141_v31  ;;  %v2650_v20 = vpop.f32.mrb[28].mxu1  ;;  %v1440_v47 = vsel %vm387_vm1, %v1336_v32, 0.0 }
 0x13a   :  { %v1242_v25 = vadd.f32 %v1241_v17, %v1240_v0  ;;  %v1143_v48 = vunpack.c.h.bf16 %v799_v23  ;;  %v1650_v51 = vpack.c.bf16 %v2512_v58, %v2512_v58  ;;  %v802_v52 = vpack.c.bf16 %v2522_v62, %v2507_v18  ;;  %v2657_v30 = vpop.f32.mrb[29].mxu1 }
 0x13b   :  { %v1437_v26 = vadd.f32 %v1436_v9, %v1435_v28  ;;  %v1442_v53 = vsel %vm387_vm1, %v1337_v36, 0.0  ;;  %v1144_v40 = vunpack.c.l.bf16 %v800_v2  ;;  %v2660_v49 = vpop.f32.mrb[30].mxu1  ;;  %v1145_v45 = vunpack.c.h.bf16 %v800_v2 }
 0x13c   :  { %v1244_v43 = vadd.f32 %v1243_v12, %v1242_v25  ;;  %v1339_v34 = vmul.f32 %v1142_v41, %v1142_v41  ;;  %1082 = vst.msk [vmem:[%s2816_s4 + $0xc0] sm:$0xf] %vm1033_vm2, %v1650_v51  ;;  %v1653_v56 = vpack.c.bf16 %v2522_v62, %v2522_v62  ;;  %v801_v18 = vpack.c.bf16 %v2530_v7, %v2512_v58  ;;  %v2670_v63 = vpop.f32.mrb[31].mxu1 }
 0x13d   :  { %v1439_v46 = vadd.f32 %v1438_v29, %v1437_v26  ;;  %v1651_v21 = vpack.c.bf16 %v2530_v7, %v2530_v7  ;;  %v1656_v61 = vpack.c.bf16 %v2552_v37, %v2552_v37  ;;  %v1444_v33 = vsel %vm387_vm1, %v1338_v42, 0.0 }
 0x13e   :  { %v1246_v54 = vadd.f32 %v1245_v39, %v1244_v43  ;;  %v1249_v1 = vsel %vm387_vm1, %v1142_v41, 0.0  ;;  %v1340_v4 = vmul.f32 %v1143_v48, %v1143_v48  ;;  %1085 = vst.msk [vmem:[%s2816_s4 + $0xcc] sm:$0xf] %vm1033_vm2, %v1653_v56  ;;  %v1341_v58 = vmul.f32 %v1144_v40, %v1144_v40 }
 0x13f   :  { %v1441_v55 = vadd.f32 %v1440_v47, %v1439_v46  ;;  %v1251_v5 = vsel %vm387_vm1, %v1143_v48, 0.0  ;;  %1083 = vst.msk [vmem:[%s2816_s4 + $0xc4] sm:$0xf] %vm1033_vm2, %v1651_v21  ;;  %1088 = vst.msk [vmem:[%s2816_s4 + $0xd8] sm:$0xf] %vm1033_vm2, %v1656_v61  ;;  %v1446_v7 = vsel %vm387_vm1, %v1339_v34, 0.0  ;;  %v1146_v11 = vunpack.c.l.bf16 %v801_v18 }
 0x140   :  { %v1248_v60 = vadd.f32 %v1247_v6, %v1246_v54  ;;  %v1654_v59 = vpack.c.bf16 %v2562_v38, %v2562_v38  ;;  %v804_v14 = vpack.c.bf16 %v2565_v44, %v2552_v37  ;;  %v1253_v15 = vsel %vm387_vm1, %v1144_v40, 0.0 }
 0x141   :  { %v1443_v57 = vadd.f32 %v1442_v53, %v1441_v55  ;;  %v1342_v2 = vmul.f32 %v1145_v45, %v1145_v45  ;;  %v1448_v8 = vsel %vm387_vm1, %v1340_v4, 0.0  ;;  %v1148_v23 = vunpack.c.l.bf16 %v802_v52 }
 0x142   :  { %v1250_v62 = vadd.f32 %v1249_v1, %v1248_v60  ;;  %v1147_v9 = vunpack.c.h.bf16 %v801_v18  ;;  %1086 = vst.msk [vmem:[%s2816_s4 + $0xd0] sm:$0xf] %vm1033_vm2, %v1654_v59  ;;  %v1657_v28 = vpack.c.bf16 %v2565_v44, %v2565_v44  ;;  %v803_v37 = vpack.c.bf16 %v2577_v50, %v2562_v38 }
 0x143   :  { %v1445_v10 = vadd.f32 %v1444_v33, %v1443_v57  ;;  %v1255_v17 = vsel %vm387_vm1, %v1145_v45, 0.0  ;;  %v1450_v32 = vsel %vm387_vm1, %v1341_v58, 0.0  ;;  %v1149_v24 = vunpack.c.h.bf16 %v802_v52 }
 0x144   :  { %v1252_v19 = vadd.f32 %v1251_v5, %v1250_v62  ;;  %v1343_v35 = vmul.f32 %v1146_v11, %v1146_v11  ;;  %1089 = vst.msk [vmem:[%s2816_s4 + $0xdc] sm:$0xf] %vm1033_vm2, %v1657_v28  ;;  %v1452_v36 = vsel %vm387_vm1, %v1342_v2, 0.0  ;;  %v1261_v26 = vsel %vm387_vm1, %v1148_v23, 0.0 }
 0x145   :  { %v1447_v22 = vadd.f32 %v1446_v7, %v1445_v10  ;;  %v1257_v39 = vsel %vm387_vm1, %v1146_v11, 0.0  ;;  %v1344_v38 = vmul.f32 %v1147_v9, %v1147_v9  ;;  %v1655_v12 = vpack.c.bf16 %v2577_v50, %v2577_v50 }
 0x146   :  { %v1254_v31 = vadd.f32 %v1253_v15, %v1252_v19  ;;  %v1345_v29 = vmul.f32 %v1148_v23, %v1148_v23  ;;  %v1660_v42 = vpack.c.bf16 %v2605_v3, %v2605_v3  ;;  %v1346_v43 = vmul.f32 %v1149_v24, %v1149_v24 }
 0x147   :  { %v1449_v0 = vadd.f32 %v1448_v8, %v1447_v22  ;;  %v1259_v46 = vsel %vm387_vm1, %v1147_v9, 0.0  ;;  %v1454_v47 = vsel %vm387_vm1, %v1343_v35, 0.0  ;;  %1087 = vst.msk [vmem:[%s2816_s4 + $0xd4] sm:$0xf] %vm1033_vm2, %v1655_v12  ;;  %v1150_v48 = vunpack.c.l.bf16 %v803_v37 }
 0x148   :  { %v1256_v44 = vadd.f32 %v1255_v17, %v1254_v31  ;;  %1092 = vst.msk [vmem:[%s2816_s4 + $0xe8] sm:$0xf] %vm1033_vm2, %v1660_v42  ;;  %v1658_v50 = vpack.c.bf16 %v2609_v13, %v2609_v13  ;;  %v806_v53 = vpack.c.bf16 %v2615_v16, %v2605_v3  ;;  %v1456_v54 = vsel %vm387_vm1, %v1344_v38, 0.0 }
 0x149   :  { %v1451_v25 = vadd.f32 %v1450_v32, %v1449_v0  ;;  %v1151_v55 = vunpack.c.h.bf16 %v803_v37  ;;  %v1661_v40 = vpack.c.bf16 %v2615_v16, %v2615_v16  ;;  %v805_v45 = vpack.c.bf16 %v2622_v27, %v2609_v13 }
 0x14a   :  { %v1258_v41 = vadd.f32 %v1257_v39, %v1256_v44  ;;  %v1263_v34 = vsel %vm387_vm1, %v1149_v24, 0.0  ;;  %v1152_v57 = vunpack.c.l.bf16 %v804_v14  ;;  %1090 = vst.msk [vmem:[%s2816_s4 + $0xe0] sm:$0xf] %vm1033_vm2, %v1658_v50  ;;  %v1458_v3 = vsel %vm387_vm1, %v1345_v29, 0.0 }
 0x14b   :  { %v1453_v6 = vadd.f32 %v1452_v36, %v1451_v25  ;;  %v1347_v60 = vmul.f32 %v1150_v48, %v1150_v48  ;;  %1093 = vst.msk [vmem:[%s2816_s4 + $0xec] sm:$0xf] %vm1033_vm2, %v1661_v40  ;;  %v1659_v13 = vpack.c.bf16 %v2622_v27, %v2622_v27  ;;  %v1664_v16 = vpack.c.bf16 %v2650_v20, %v2650_v20 }
 0x14c   :  { %v1260_v51 = vadd.f32 %v1259_v46, %v1258_v41  ;;  %v1153_v61 = vunpack.c.h.bf16 %v804_v14  ;;  %v1460_v1 = vsel %vm387_vm1, %v1346_v43, 0.0  ;;  %v1265_v4 = vsel %vm387_vm1, %v1150_v48, 0.0 }
 0x14d   :  { %v1455_v52 = vadd.f32 %v1454_v47, %v1453_v6  ;;  %v1348_v58 = vmul.f32 %v1151_v55, %v1151_v55  ;;  %1091 = vst.msk [vmem:[%s2816_s4 + $0xe4] sm:$0xf] %vm1033_vm2, %v1659_v13  ;;  %1096 = vst.msk [vmem:[%s2816_s4 + $0xf8] sm:$0xf] %vm1033_vm2, %v1664_v16  ;;  %v1349_v27 = vmul.f32 %v1152_v57, %v1152_v57  ;;  %v1267_v5 = vsel %vm387_vm1, %v1151_v55, 0.0 }
 0x14e   :  { %v1262_v56 = vadd.f32 %v1261_v26, %v1260_v51  ;;  %v1462_v7 = vsel %vm387_vm1, %v1347_v60, 0.0  ;;  %v1154_v11 = vunpack.c.l.bf16 %v805_v45  ;;  %v1662_v59 = vpack.c.bf16 %v2657_v30, %v2657_v30 }
 0x14f   :  { %v1457_v18 = vadd.f32 %v1456_v54, %v1455_v52  ;;  %v808_v14 = vpack.c.bf16 %v2660_v49, %v2650_v20  ;;  %v1269_v15 = vsel %vm387_vm1, %v1152_v57, 0.0  ;;  %v1350_v2 = vmul.f32 %v1153_v61, %v1153_v61 }
 0x150   :  { %v1264_v33 = vadd.f32 %v1263_v34, %v1262_v56  ;;  %v1464_v8 = vsel %vm387_vm1, %v1348_v58, 0.0  ;;  %v1155_v23 = vunpack.c.h.bf16 %v805_v45  ;;  %1094 = vst.msk [vmem:[%s2816_s4 + $0xf0] sm:$0xf] %vm1033_vm2, %v1662_v59  ;;  %v1665_v9 = vpack.c.bf16 %v2660_v49, %v2660_v49 }
 0x151   :  { %v1459_v21 = vadd.f32 %v1458_v3, %v1457_v18  ;;  %v807_v28 = vpack.c.bf16 %v2670_v63, %v2657_v30  ;;  %v1663_v0 = vpack.c.bf16 %v2670_v63, %v2670_v63  ;;  %v1271_v37 = vsel %vm387_vm1, %v1153_v61, 0.0 }
 0x152   :  { %v1266_v62 = vadd.f32 %v1265_v4, %v1264_v33  ;;  %v1466_v17 = vsel %vm387_vm1, %v1349_v27, 0.0  ;;  %v1156_v32 = vunpack.c.l.bf16 %v806_v53  ;;  %v1351_v24 = vmul.f32 %v1154_v11, %v1154_v11  ;;  %1097 = vst.msk [vmem:[%s2816_s4 + $0xfc] sm:$0xf] %vm1033_vm2, %v1665_v9 }
 0x153   :  { %v1461_v10 = vadd.f32 %v1460_v1, %v1459_v21  ;;  %1095 = vst.msk [vmem:[%s2816_s4 + $0xf4] sm:$0xf] %vm1033_vm2, %v1663_v0  ;;  %v1468_v30 = vsel %vm387_vm1, %v1350_v2, 0.0  ;;  %v1157_v63 = vunpack.c.h.bf16 %v806_v53  ;;  %v1273_v36 = vsel %vm387_vm1, %v1154_v11, 0.0 }
 0x154   :  { %v1268_v19 = vadd.f32 %v1267_v5, %v1266_v62  ;;  %v1352_v25 = vmul.f32 %v1155_v23, %v1155_v23  ;;  %v1353_v39 = vmul.f32 %v1156_v32, %v1156_v32  ;;  %v1275_v38 = vsel %vm387_vm1, %v1155_v23, 0.0 }
 0x155   :  { %v1463_v22 = vadd.f32 %v1462_v7, %v1461_v10  ;;  %v1470_v12 = vsel %vm387_vm1, %v1351_v24, 0.0  ;;  %v1158_v29 = vunpack.c.l.bf16 %v807_v28  ;;  %v1277_v42 = vsel %vm387_vm1, %v1156_v32, 0.0 }
 0x156   :  { %v1270_v20 = vadd.f32 %v1269_v15, %v1268_v19  ;;  %v1354_v43 = vmul.f32 %v1157_v63, %v1157_v63  ;;  %v1472_v46 = vsel %vm387_vm1, %v1352_v25, 0.0  ;;  %v1159_v47 = vunpack.c.h.bf16 %v807_v28 }
 0x157   :  { %v1465_v31 = vadd.f32 %v1464_v8, %v1463_v22  ;;  %v1279_v52 = vsel %vm387_vm1, %v1157_v63, 0.0  ;;  %v1474_v50 = vsel %vm387_vm1, %v1353_v39, 0.0  ;;  %v1160_v53 = vunpack.c.l.bf16 %v808_v14 }
 0x158   :  { %v1272_v35 = vadd.f32 %v1271_v37, %v1270_v20  ;;  %v1355_v54 = vmul.f32 %v1158_v29, %v1158_v29  ;;  %v1476_v45 = vsel %vm387_vm1, %v1354_v43, 0.0  ;;  %v1161_v34 = vunpack.c.h.bf16 %v808_v14 }
 0x159   :  { %v1467_v49 = vadd.f32 %v1466_v17, %v1465_v31  ;;  %v1281_v56 = vsel %vm387_vm1, %v1158_v29, 0.0  ;;  %v1356_v18 = vmul.f32 %v1159_v47, %v1159_v47  ;;  %v1357_v60 = vmul.f32 %v1160_v53, %v1160_v53 }
 0x15a   :  { %v1274_v44 = vadd.f32 %v1273_v36, %v1272_v35  ;;  %v1283_v13 = vsel %vm387_vm1, %v1159_v47, 0.0  ;;  %v1478_v16 = vsel %vm387_vm1, %v1355_v54, 0.0  ;;  %v1285_v33 = vsel %vm387_vm1, %v1160_v53, 0.0 }
 0x15b   :  { %v1469_v26 = vadd.f32 %v1468_v30, %v1467_v49  ;;  %v1358_v1 = vmul.f32 %v1161_v34, %v1161_v34  ;;  %v1480_v4 = vsel %vm387_vm1, %v1356_v18, 0.0  ;;  %v1287_v62 = vsel %vm387_vm1, %v1161_v34, 0.0 }
 0x15c   :  { %v1276_v41 = vadd.f32 %v1275_v38, %v1274_v44  ;;  %v1482_v5 = vsel %vm387_vm1, %v1357_v60, 0.0 }
 0x15d   :  { %v1471_v6 = vadd.f32 %v1470_v12, %v1469_v26  ;;  %v1484_v11 = vsel %vm387_vm1, %v1358_v1, 0.0 }
 0x15e   :  { %v1278_v48 = vadd.f32 %v1277_v42, %v1276_v41 }
 0x15f   :  { %v1473_v51 = vadd.f32 %v1472_v46, %v1471_v6 }
 0x160   :  { %v1280_v40 = vadd.f32 %v1279_v52, %v1278_v48 }
 0x161   :  { %v1475_v55 = vadd.f32 %v1474_v50, %v1473_v51 }
 0x162   :  { %v1282_v57 = vadd.f32 %v1281_v56, %v1280_v40 }
 0x163   :  { %v1477_v3 = vadd.f32 %v1476_v45, %v1475_v55 }
 0x164   :  { %v1284_v21 = vadd.f32 %v1283_v13, %v1282_v57 }
 0x165   :  { %v1479_v61 = vadd.f32 %v1478_v16, %v1477_v3 }
 0x166   :  { %v1286_v58 = vadd.f32 %v1285_v33, %v1284_v21 }
 0x167   :  { %v1481_v27 = vadd.f32 %v1480_v4, %v1479_v61 }
 0x168   :  { %v1288_v10 = vadd.f32 %v1287_v62, %v1286_v58 }
 0x169   :  { %v1483_v7 = vadd.f32 %v1482_v5, %v1481_v27 }
 0x16a   :  { %v1289_v59 = vrot.slane %v1288_v10, 4 }
 0x16b   :  { %v1485_v14 = vadd.f32 %v1484_v11, %v1483_v7 }
 0x16c   :  { %v1290_v15 = vadd.f32 %v1289_v59, %v1288_v10 }
 0x16d   :  { %v1486_v2 = vrot.slane %v1485_v14, 4 }
 0x16e   :  { %v1291_v19 = vrot.slane %v1290_v15, 2 }
 0x16f   :  { %v1487_v22 = vadd.f32 %v1486_v2, %v1485_v14 }
 0x170   :  { %v1292_v8 = vadd.f32 %v1291_v19, %v1290_v15 }
 0x171   :  { %v1488_v23 = vrot.slane %v1487_v22, 2 }
 0x172   :  { %v1293_v9 = vrot.slane %v1292_v8, 1 }
 0x173   :  { %v1489_v28 = vadd.f32 %v1488_v23, %v1487_v22 }
 0x174   :  { %v1294_v31 = vadd.f32 %v1293_v9, %v1292_v8 }
 0x175   :  { %v1490_v20 = vrot.slane %v1489_v28, 1 }
 0x177   :  { %v1491_v0 = vadd.f32 %v1490_v20, %v1489_v28 }
 0x179   :  { %v1493_v37 = vsel %vm1492_vm3, %v1294_v31, %v1491_v0 }
 0x17a   :  { %v1494_v17 = vsel %vm484_vm0, %v1493_v37, 0.0 }
 0x17b   :  { %1495 = vst.msk [vmem:[%s2817_s5] sm:$0xff] %vm387_vm1, %v1494_v17 }

// kernel: preact_bottleneck.6
= control target key start
LH: loop header
LB: loop body
LE: loop exit
PB: predicated region body
PF: predicated region fallthrough
CT: control target
= control target key end

     0   :  { %s4608_s18 = smov 0   ;;  %s5395_s0 = inlined_call_operand.vmem [shape: bf16[2,16,16,4], index: 0, kind: input, shape index: {}]   ;;  %s5396_s1 = inlined_call_operand.vmem [shape: f32[1,4], index: 1, kind: input, shape index: {}]   ;;  %s5397_s2 = inlined_call_operand.vmem [shape: f32[1,4], index: 2, kind: input, shape index: {}]   ;;  %s5398_s3 = inlined_call_operand.vmem [shape: bf16[9,4,4], index: 3, kind: input, shape index: {}]   ;;  %s5399_s4 = inlined_call_operand.vmem [shape: bf16[2,256,4], index: 4, kind: output, shape index: {0}]   ;;  %s5400_s5 = inlined_call_operand.vmem [shape: f32[2,8,4], index: 5, kind: output, shape index: {1}]  }
   0x1 LB: > { %s3522_s19 = sadd.s32 4294967295, %s4575_s18   ;;  %p3526_p0 = scmp.ge.s32.totalorder %s4575_s18, 1  ;;  %s4575_s18 = sphi %s4608_s18, %s16_s18  }
   0x2   : > { %p190_p1 = scmp.lt.s32.totalorder %s4575_s18, 3 }
   0x4   : > { %p191_p2 = pnand %p3526_p0, %p190_p1 }
   0x5   : > { %v3534_v0 = vld [vmem:[%s5398_s3 + $0x2] sm:$0x3] (!%p191_p2)  ;;  %vm633_vm0 = vcmask (!%p191_p2), 1041408   ;;  %v4622_v1 = vld [vmem:[%s5398_s3 + $0x8] sm:$0x3] (!%p191_p2)  ;;  %vm412_vm1 = vcmask (!%p191_p2), 31744  }
   0x6   : > { %194 = sbr.rel (%p191_p2) target bundleno = 568 (0x238), region = 36  ;;  %4550 = vmatprep.subr.msk.bf16.mxu1 (!%p191_p2), %vm633_vm0, %v3534_v0  ;;  %4554 = vmatprep.subr.msk.bf16.mxu0 (!%p191_p2), %vm633_vm0, %v4622_v1  ;;  %v635_v2 = vsel (!%p191_p2), %vm633_vm0, %v3534_v0, 0  ;;  %v4630_v3 = vsel (!%p191_p2), %vm633_vm0, %v4622_v1, 0  ;;  %vm447_vm2 = vcmask (!%p191_p2), 25600   ;;  %p222_p3 = scmp.lt.s32.totalorder (!%p191_p2), %s3522_s19, 1  ;;  %v4577_v4 = vmov (!%p191_p2), 0.0  }
   0x7   : > { %3987 = vmatpush3.bf16.msra.mxu1 (!%p191_p2), %v635_v2  ;;  %4123 = vmatpush3.bf16.msra.mxu0 (!%p191_p2), %v4630_v3  ;;  %445 = vst.msk [vmem:[#allocation2] sm:$0xff] (!%p191_p2), %vm412_vm1, %v4577_v4  ;;  %446 = vst.msk [vmem:[#allocation2 + $0x8] sm:$0xff] (!%p191_p2), %vm412_vm1, %v4577_v4  ;;  %v534_v5 = vld [vmem:[%s5398_s3] sm:$0x3] (!%p191_p2)  ;;  %v3618_v6 = vld [vmem:[%s5398_s3 + $0xa] sm:$0x3] (!%p191_p2) }
   0x8   : > { %448 = vst.msk [vmem:[#allocation2 + $0x10] sm:$0x3] (!%p191_p2), %vm447_vm2, %v4577_v4  ;;  %452 = vst.msk [vmem:[#allocation2 + $0x1a8] sm:$0x3] (!%p191_p2), %vm447_vm2, %v4577_v4  ;;  %4551 = vmatprep.subr.msk.bf16.mxu1 (!%p191_p2), %vm633_vm0, %v534_v5  ;;  %vm453_vm3 = vcmask (!%p191_p2), 24576   ;;  %4556 = vmatprep.subr.msk.bf16.mxu0 (!%p191_p2), %vm633_vm0, %v3618_v6  ;;  %v4694_v9 = vsel (!%p191_p2), %vm633_vm0, %v534_v5, 0 }
   0x9   : > { %450 = vst.msk [vmem:[#allocation2 + $0x198] sm:$0xff] (!%p191_p2), %vm412_vm1, %v4577_v4  ;;  %451 = vst.msk [vmem:[#allocation2 + $0x1a0] sm:$0xff] (!%p191_p2), %vm412_vm1, %v4577_v4  ;;  %v4690_v7 = vld [vmem:[%s5396_s1] ss:$0 sm:$0xff] (!%p191_p2)  ;;  %v4698_v11 = vsel (!%p191_p2), %vm633_vm0, %v3618_v6, 0  ;;  %vm3197_vm4 = vcmask (!%p191_p2), 27648  }
   0xa   : > { %470 = vst.msk [vmem:[#allocation2 + $0x29] sm:$0x1] (!%p191_p2), %vm453_vm3, %v4577_v4  ;;  %454 = vst.msk [vmem:[#allocation2 + $0x18] sm:$0x1] (!%p191_p2), %vm453_vm3, %v4577_v4  ;;  %v4705_v20 = vld [vmem:[%s5397_s2] ss:$0 sm:$0xff] (!%p191_p2) }
   0xb   : > { %455 = vst.msk [vmem:[#allocation2 + $0x30] sm:$0x1] (!%p191_p2), %vm453_vm3, %v4577_v4  ;;  %456 = vst.msk [vmem:[#allocation2 + $0x48] sm:$0x1] (!%p191_p2), %vm453_vm3, %v4577_v4  ;;  %vm3432_vm5 = vcmask (!%p191_p2), 1040384  }
   0xc   : > { %457 = vst.msk [vmem:[#allocation2 + $0x60] sm:$0x1] (!%p191_p2), %vm453_vm3, %v4577_v4  ;;  %458 = vst.msk [vmem:[#allocation2 + $0x78] sm:$0x1] (!%p191_p2), %vm453_vm3, %v4577_v4 }
   0xd   : > { %s5402_s19 = smov (!%p222_p3, %s3522_s19), 1  ;;  %459 = vst.msk [vmem:[#allocation2 + $0x90] sm:$0x1] %vm453_vm3, %v4577_v4  ;;  %460 = vst.msk [vmem:[#allocation2 + $0xa8] sm:$0x1] %vm453_vm3, %v4577_v4 }
   0xe   : > { %461 = vst.msk [vmem:[#allocation2 + $0xc0] sm:$0x1] %vm453_vm3, %v4577_v4  ;;  %462 = vst.msk [vmem:[#allocation2 + $0xd8] sm:$0x1] %vm453_vm3, %v4577_v4  ;;  %s3720_s28 = sshll.u32 %s5402_s19, 7  ;;  %v535_v18 = vld [vmem:[#allocation2 + $0x1] sm:$0xff] }
   0xf   : > { %463 = vst.msk [vmem:[#allocation2 + $0xf0] sm:$0x1] %vm453_vm3, %v4577_v4  ;;  %464 = vst.msk [vmem:[#allocation2 + $0x108] sm:$0x1] %vm453_vm3, %v4577_v4  ;;  %s4685_s6 = scalar_lea.vmem %s5395_s0, %s3720_s28  ;;  %v536_v19 = vld [vmem:[#allocation2 + $0x9] sm:$0xff]  ;;  %s5248_s25 = scalar_lea.vmem %s5399_s4, %s3720_s28 }
  0x10   : > { %465 = vst.msk [vmem:[#allocation2 + $0x120] sm:$0x1] %vm453_vm3, %v4577_v4  ;;  %466 = vst.msk [vmem:[#allocation2 + $0x138] sm:$0x1] %vm453_vm3, %v4577_v4  ;;  %v3755_v8 = vld [vmem:[%s4685_s6] sm:$0xff]   ;;  %v3818_v10 = vld [vmem:[%s4685_s6 + $0x8] sm:$0xff]   ;;  %v567_v25 = vpack.c.bf16 %v536_v19, %v535_v18 }
  0x11   : > { %467 = vst.msk [vmem:[#allocation2 + $0x150] sm:$0x1] %vm453_vm3, %v4577_v4  ;;  %468 = vst.msk [vmem:[#allocation2 + $0x168] sm:$0x1] %vm453_vm3, %v4577_v4  ;;  %v3819_v12 = vld [vmem:[%s4685_s6 + $0x10] sm:$0xff]   ;;  %v3756_v13 = vunpack.c.l.bf16 %v3755_v8  ;;  %v3757_v14 = vunpack.c.h.bf16 %v3755_v8  ;;  %v3760_v15 = vunpack.c.l.bf16 %v3818_v10  ;;  %v3761_v16 = vunpack.c.h.bf16 %v3818_v10  ;;  %v3820_v17 = vld [vmem:[%s4685_s6 + $0x18] sm:$0xff]  }
  0x12   : > { %469 = vst.msk [vmem:[#allocation2 + $0x180] sm:$0x1] %vm453_vm3, %v4577_v4  ;;  %471 = vst.msk [vmem:[#allocation2 + $0x41] sm:$0x1] %vm453_vm3, %v4577_v4  ;;  %v3764_v21 = vunpack.c.l.bf16 %v3819_v12  ;;  %v3765_v22 = vunpack.c.h.bf16 %v3819_v12  ;;  %v3768_v23 = vunpack.c.l.bf16 %v3820_v17  ;;  %v3769_v24 = vunpack.c.h.bf16 %v3820_v17  ;;  %3988 = vmatprep.mubr.msk.bf16.mxu1 %vm412_vm1, %v567_v25  ;;  %v3821_v41 = vld [vmem:[%s4685_s6 + $0x20] sm:$0xff]   ;;  %v3822_v42 = vld [vmem:[%s4685_s6 + $0x28] sm:$0xff]  }
  0x13   : > { %472 = vst.msk [vmem:[#allocation2 + $0x59] sm:$0x1] %vm453_vm3, %v4577_v4  ;;  %473 = vst.msk [vmem:[#allocation2 + $0x71] sm:$0x1] %vm453_vm3, %v4577_v4  ;;  %v308_v26 = vmul.f32 %v3756_v13, %v4690_v7  ;;  %v309_v27 = vmul.f32 %v3757_v14, %v4690_v7  ;;  %v310_v28 = vmul.f32 %v3760_v15, %v4690_v7  ;;  %v3823_v47 = vld [vmem:[%s4685_s6 + $0x30] sm:$0xff]   ;;  %v3824_v48 = vld [vmem:[%s4685_s6 + $0x38] sm:$0xff]   ;;  %v3772_v54 = vunpack.c.l.bf16 %v3821_v41 }
  0x14   : > { %474 = vst.msk [vmem:[#allocation2 + $0x89] sm:$0x1] %vm453_vm3, %v4577_v4  ;;  %475 = vst.msk [vmem:[#allocation2 + $0xa1] sm:$0x1] %vm453_vm3, %v4577_v4  ;;  %v311_v29 = vmul.f32 %v3761_v16, %v4690_v7  ;;  %v312_v30 = vmul.f32 %v3764_v21, %v4690_v7  ;;  %v313_v31 = vmul.f32 %v3765_v22, %v4690_v7  ;;  %v3773_v55 = vunpack.c.h.bf16 %v3821_v41  ;;  %v3825_v14 = vld [vmem:[%s4685_s6 + $0x40] sm:$0xff]   ;;  %v3827_v25 = vld [vmem:[%s4685_s6 + $0x50] sm:$0xff]  }
  0x15   : > { %476 = vst.msk [vmem:[#allocation2 + $0xb9] sm:$0x1] %vm453_vm3, %v4577_v4  ;;  %477 = vst.msk [vmem:[#allocation2 + $0xd1] sm:$0x1] %vm453_vm3, %v4577_v4  ;;  %v314_v32 = vmul.f32 %v3768_v23, %v4690_v7  ;;  %v347_v33 = vadd.f32 %v4705_v20, %v308_v26  ;;  %v348_v34 = vadd.f32 %v4705_v20, %v309_v27  ;;  %v3776_v56 = vunpack.c.l.bf16 %v3822_v42  ;;  %s3531_s26 = sshll.u32 %s5402_s19, 3 }
  0x16   : > { %478 = vst.msk [vmem:[#allocation2 + $0xe9] sm:$0x1] %vm453_vm3, %v4577_v4  ;;  %479 = vst.msk [vmem:[#allocation2 + $0x101] sm:$0x1] %vm453_vm3, %v4577_v4  ;;  %v349_v35 = vadd.f32 %v4705_v20, %v310_v28  ;;  %v315_v36 = vmul.f32 %v3769_v24, %v4690_v7  ;;  %v350_v37 = vadd.f32 %v4705_v20, %v311_v29  ;;  %v3777_v57 = vunpack.c.h.bf16 %v3822_v42  ;;  %v3826_v24 = vld [vmem:[%s4685_s6 + $0x48] sm:$0xff]   ;;  %s235_s29 = scalar_lea.vmem %s5400_s5, %s3531_s26 }
  0x17   : > { %480 = vst.msk [vmem:[#allocation2 + $0x119] sm:$0x1] %vm453_vm3, %v4577_v4  ;;  %481 = vst.msk [vmem:[#allocation2 + $0x131] sm:$0x1] %vm453_vm3, %v4577_v4  ;;  %v351_v38 = vadd.f32 %v4705_v20, %v312_v30  ;;  %v352_v39 = vadd.f32 %v4705_v20, %v313_v31  ;;  %v353_v40 = vadd.f32 %v4705_v20, %v314_v32  ;;  %v379_v43 = vmax.f32 %v347_v33, 0.0 }
  0x18   : > { %482 = vst.msk [vmem:[#allocation2 + $0x149] sm:$0x1] %vm453_vm3, %v4577_v4  ;;  %483 = vst.msk [vmem:[#allocation2 + $0x161] sm:$0x1] %vm453_vm3, %v4577_v4  ;;  %v380_v44 = vmax.f32 %v348_v34, 0.0  ;;  %v381_v45 = vmax.f32 %v349_v35, 0.0  ;;  %v354_v46 = vadd.f32 %v4705_v20, %v315_v36  ;;  %v3780_v58 = vunpack.c.l.bf16 %v3823_v47 }
  0x19   : > { %484 = vst.msk [vmem:[#allocation2 + $0x179] sm:$0x1] %vm453_vm3, %v4577_v4  ;;  %485 = vst.msk [vmem:[#allocation2 + $0x191] sm:$0x1] %vm453_vm3, %v4577_v4  ;;  %v382_v49 = vmax.f32 %v350_v37, 0.0  ;;  %v383_v50 = vmax.f32 %v351_v38, 0.0  ;;  %v3781_v59 = vunpack.c.h.bf16 %v3823_v47  ;;  %v3784_v60 = vunpack.c.l.bf16 %v3824_v48 }
  0x1a   : > { %v384_v51 = vmax.f32 %v352_v39, 0.0  ;;  %v385_v52 = vmax.f32 %v353_v40, 0.0  ;;  %413 = vst.msk [vmem:[#allocation2 + $0x19] sm:$0xff] %vm412_vm1, %v379_v43  ;;  %414 = vst.msk [vmem:[#allocation2 + $0x21] sm:$0xff] %vm412_vm1, %v380_v44  ;;  %v386_v53 = vmax.f32 %v354_v46, 0.0  ;;  %v316_v61 = vmul.f32 %v3772_v54, %v4690_v7  ;;  %v3828_v44 = vld [vmem:[%s4685_s6 + $0x58] sm:$0xff]  }
  0x1b   : > { %415 = vst.msk [vmem:[#allocation2 + $0x31] sm:$0xff] %vm412_vm1, %v381_v45  ;;  %416 = vst.msk [vmem:[#allocation2 + $0x39] sm:$0xff] %vm412_vm1, %v382_v49  ;;  %v317_v62 = vmul.f32 %v3773_v55, %v4690_v7  ;;  %v318_v63 = vmul.f32 %v3776_v56, %v4690_v7  ;;  %v3785_v0 = vunpack.c.h.bf16 %v3824_v48  ;;  %v319_v2 = vmul.f32 %v3777_v57, %v4690_v7  ;;  %v4773_v46 = vld [vmem:[%s5398_s3 + $0xc] sm:$0x3] }
  0x1c   : > { %417 = vst.msk [vmem:[#allocation2 + $0x49] sm:$0xff] %vm412_vm1, %v383_v50  ;;  %418 = vst.msk [vmem:[#allocation2 + $0x51] sm:$0xff] %vm412_vm1, %v384_v51  ;;  %v320_v4 = vmul.f32 %v3780_v58, %v4690_v7  ;;  %v321_v5 = vmul.f32 %v3781_v59, %v4690_v7  ;;  %v322_v6 = vmul.f32 %v3784_v60, %v4690_v7  ;;  %v3788_v32 = vunpack.c.l.bf16 %v3825_v14  ;;  %v3829_v59 = vld [vmem:[%s4685_s6 + $0x60] sm:$0xff]  }
  0x1d   : > { %419 = vst.msk [vmem:[#allocation2 + $0x61] sm:$0xff] %vm412_vm1, %v385_v52  ;;  %420 = vst.msk [vmem:[#allocation2 + $0x69] sm:$0xff] %vm412_vm1, %v386_v53  ;;  %v355_v8 = vadd.f32 %v4705_v20, %v316_v61  ;;  %v356_v10 = vadd.f32 %v4705_v20, %v317_v62  ;;  %v357_v12 = vadd.f32 %v4705_v20, %v318_v63  ;;  %v3789_v39 = vunpack.c.h.bf16 %v3825_v14  ;;  %v4781_v53 = vld [vmem:[%s5398_s3 + $0x4] sm:$0x3] }
  0x1e   : > { %v323_v13 = vmul.f32 %v3785_v0, %v4690_v7  ;;  %v358_v15 = vadd.f32 %v4705_v20, %v319_v2  ;;  %v359_v16 = vadd.f32 %v4705_v20, %v320_v4  ;;  %v360_v17 = vadd.f32 %v4705_v20, %v321_v5 }
  0x1f   : > { %v361_v18 = vadd.f32 %v4705_v20, %v322_v6  ;;  %v387_v19 = vmax.f32 %v355_v8, 0.0  ;;  %v388_v21 = vmax.f32 %v356_v10, 0.0  ;;  %v389_v22 = vmax.f32 %v357_v12, 0.0 }
  0x20   : > { %v362_v23 = vadd.f32 %v4705_v20, %v323_v13  ;;  %v390_v29 = vmax.f32 %v358_v15, 0.0  ;;  %v391_v30 = vmax.f32 %v359_v16, 0.0  ;;  %v392_v31 = vmax.f32 %v360_v17, 0.0  ;;  %v3830_v15 = vld [vmem:[%s4685_s6 + $0x68] sm:$0xff]  }
  0x21   : > { %v537_v26 = vld [vmem:[#allocation2 + $0x19] sm:$0xff]  ;;  %v538_v27 = vld [vmem:[#allocation2 + $0x21] sm:$0xff]  ;;  %421 = vst.msk [vmem:[#allocation2 + $0x79] sm:$0xff] %vm412_vm1, %v387_v19  ;;  %422 = vst.msk [vmem:[#allocation2 + $0x81] sm:$0xff] %vm412_vm1, %v388_v21  ;;  %v393_v37 = vmax.f32 %v361_v18, 0.0  ;;  %v324_v42 = vmul.f32 %v3788_v32, %v4690_v7  ;;  %v3792_v43 = vunpack.c.l.bf16 %v3826_v24  ;;  %v325_v45 = vmul.f32 %v3789_v39, %v4690_v7 }
  0x22   : > { %v1600_v28 = vld [vmem:[#allocation2 + $0x31] sm:$0xff]  ;;  %v568_v33 = vpack.c.bf16 %v538_v27, %v537_v26  ;;  %v1601_v34 = vld [vmem:[#allocation2 + $0x39] sm:$0xff]  ;;  %423 = vst.msk [vmem:[#allocation2 + $0x91] sm:$0xff] %vm412_vm1, %v389_v22  ;;  %v394_v38 = vmax.f32 %v362_v23, 0.0  ;;  %424 = vst.msk [vmem:[#allocation2 + $0x99] sm:$0xff] %vm412_vm1, %v390_v29  ;;  %v3793_v47 = vunpack.c.h.bf16 %v3826_v24  ;;  %v3796_v48 = vunpack.c.l.bf16 %v3827_v25 }
  0x23   : > { %v541_v35 = vld [vmem:[#allocation2 + $0x49] sm:$0xff]  ;;  %v542_v36 = vld [vmem:[#allocation2 + $0x51] sm:$0xff]  ;;  %v1631_v40 = vpack.c.bf16 %v1601_v34, %v1600_v28  ;;  %425 = vst.msk [vmem:[#allocation2 + $0xa9] sm:$0xff] %vm412_vm1, %v391_v30  ;;  %426 = vst.msk [vmem:[#allocation2 + $0xb1] sm:$0xff] %vm412_vm1, %v392_v31  ;;  %v363_v51 = vadd.f32 %v4705_v20, %v324_v42  ;;  %v3797_v52 = vunpack.c.h.bf16 %v3827_v25  ;;  %v364_v54 = vadd.f32 %v4705_v20, %v325_v45 }
  0x24   : > { %v4758_v41 = vpack.c.bf16 %v542_v36, %v541_v35  ;;  %3989 = vmatmul.mubr.msk.bf16.vlgmr.msra.gmra.mrb[0].mxu1 %vm412_vm1, %v568_v33  ;;  %4124 = vmatprep.mubr.msk.bf16.mxu0 %vm412_vm1, %v568_v33  ;;  %427 = vst.msk [vmem:[#allocation2 + $0xc1] sm:$0xff] %vm412_vm1, %v393_v37  ;;  %428 = vst.msk [vmem:[#allocation2 + $0xc9] sm:$0xff] %vm412_vm1, %v394_v38  ;;  %v1604_v49 = vld [vmem:[#allocation2 + $0x61] sm:$0xff]  ;;  %v1605_v50 = vld [vmem:[#allocation2 + $0x69] sm:$0xff]  ;;  %v327_v55 = vmul.f32 %v3793_v47, %v4690_v7  ;;  %v3800_v56 = vunpack.c.l.bf16 %v3828_v44 }
  0x25   : > { %4021 = vmatpush3.bf16.msra.mxu1 %v4694_v9  ;;  %4125 = vmatmul.mubr.msk.bf16.vlgmr.msra.gmra.mrb[0].mxu0 %vm412_vm1, %v1631_v40  ;;  %v326_v9 = vmul.f32 %v3792_v43, %v4690_v7  ;;  %v395_v57 = vmax.f32 %v363_v51, 0.0  ;;  %v328_v58 = vmul.f32 %v3796_v48, %v4690_v7  ;;  %v4795_v60 = vpack.c.bf16 %v1605_v50, %v1604_v49  ;;  %v3831_v22 = vld [vmem:[%s4685_s6 + $0x70] sm:$0xff]  }
  0x26   : > { %4157 = vmatpush3.bf16.msra.mxu0 %v4698_v11  ;;  %3992 = vmatprep.mubr.msk.bf16.mxu1 %vm412_vm1, %v1631_v40  ;;  %v329_v11 = vmul.f32 %v3797_v52, %v4690_v7  ;;  %v396_v61 = vmax.f32 %v364_v54, 0.0  ;;  %v366_v63 = vadd.f32 %v4705_v20, %v327_v55  ;;  %v3801_v6 = vunpack.c.h.bf16 %v3828_v44 }
  0x27   : > { %4128 = vmatprep.mubr.msk.bf16.mxu0 %vm412_vm1, %v4758_v41  ;;  %4557 = vmatprep.subr.msk.bf16.mxu0 %vm633_vm0, %v4773_v46  ;;  %v365_v62 = vadd.f32 %v4705_v20, %v326_v9  ;;  %429 = vst.msk [vmem:[#allocation2 + $0xd9] sm:$0xff] %vm412_vm1, %v395_v57  ;;  %v367_v4 = vadd.f32 %v4705_v20, %v328_v58  ;;  %v3804_v14 = vunpack.c.l.bf16 %v3829_v59  ;;  %v3805_v21 = vunpack.c.h.bf16 %v3829_v59  ;;  %v3832_v9 = vld [vmem:[%s4685_s6 + $0x78] sm:$0xff]   ;;  %v1893_v59 = vld [vmem:[#allocation2 + $0x22] sm:$0xff] }
  0x28   : > { %4552 = vmatprep.subr.msk.bf16.mxu1 %vm633_vm0, %v4781_v53  ;;  %v545_v0 = vld [vmem:[#allocation2 + $0x79] sm:$0xff]  ;;  %v546_v2 = vld [vmem:[#allocation2 + $0x81] sm:$0xff]  ;;  %v368_v5 = vadd.f32 %v4705_v20, %v329_v11  ;;  %v330_v8 = vmul.f32 %v3800_v56, %v4690_v7  ;;  %430 = vst.msk [vmem:[#allocation2 + $0xe1] sm:$0xff] %vm412_vm1, %v396_v61  ;;  %v398_v13 = vmax.f32 %v366_v63, 0.0  ;;  %v331_v18 = vmul.f32 %v3801_v6, %v4690_v7 }
  0x29   : > { %v4805_v10 = vpack.c.bf16 %v546_v2, %v545_v0  ;;  %v397_v12 = vmax.f32 %v365_v62, 0.0  ;;  %v399_v16 = vmax.f32 %v367_v4, 0.0  ;;  %v1608_v23 = vld [vmem:[#allocation2 + $0x91] sm:$0xff]  ;;  %v1609_v24 = vld [vmem:[#allocation2 + $0x99] sm:$0xff]  ;;  %v332_v25 = vmul.f32 %v3804_v14, %v4690_v7 }
  0x2a   : > { %v400_v17 = vmax.f32 %v368_v5, 0.0  ;;  %432 = vst.msk [vmem:[#allocation2 + $0xf9] sm:$0xff] %vm412_vm1, %v398_v13  ;;  %v369_v19 = vadd.f32 %v4705_v20, %v330_v8  ;;  %v3808_v26 = vunpack.c.l.bf16 %v3830_v15  ;;  %v370_v27 = vadd.f32 %v4705_v20, %v331_v18  ;;  %v549_v31 = vld [vmem:[#allocation2 + $0xa9] sm:$0xff]  ;;  %v550_v32 = vld [vmem:[#allocation2 + $0xb1] sm:$0xff]  ;;  %v1892_v11 = vld [vmem:[#allocation2 + $0x1a] sm:$0xff] }
  0x2b   : > { %431 = vst.msk [vmem:[#allocation2 + $0xf1] sm:$0xff] %vm412_vm1, %v397_v12  ;;  %433 = vst.msk [vmem:[#allocation2 + $0x109] sm:$0xff] %vm412_vm1, %v399_v16  ;;  %v333_v29 = vmul.f32 %v3805_v21, %v4690_v7  ;;  %v3809_v30 = vunpack.c.h.bf16 %v3830_v15  ;;  %v371_v33 = vadd.f32 %v4705_v20, %v332_v25  ;;  %v3812_v35 = vunpack.c.l.bf16 %v3831_v22  ;;  %v1612_v57 = vld [vmem:[#allocation2 + $0xc1] sm:$0xff]  ;;  %v1613_v58 = vld [vmem:[#allocation2 + $0xc9] sm:$0xff] }
  0x2c   : > { %3993 = vmatmul.mubr.msk.bf16.gmra.mrb[4].mxu1 %vm412_vm1, %v4758_v41  ;;  %434 = vst.msk [vmem:[#allocation2 + $0x111] sm:$0xff] %vm412_vm1, %v400_v17  ;;  %v401_v28 = vmax.f32 %v369_v19, 0.0  ;;  %v334_v34 = vmul.f32 %v3808_v26, %v4690_v7  ;;  %v3813_v36 = vunpack.c.h.bf16 %v3831_v22  ;;  %v4829_v37 = vpack.c.bf16 %v1609_v24, %v1608_v23  ;;  %v1894_v13 = vld [vmem:[#allocation2 + $0x32] sm:$0xff]  ;;  %v1896_v18 = vld [vmem:[#allocation2 + $0x4a] sm:$0xff] }
  0x2d   : > { %4129 = vmatmul.mubr.msk.bf16.gmra.mrb[4].mxu0 %vm412_vm1, %v4795_v60  ;;  %3996 = vmatprep.mubr.msk.bf16.mxu1 %vm412_vm1, %v4795_v60  ;;  %v402_v38 = vmax.f32 %v370_v27, 0.0  ;;  %v372_v39 = vadd.f32 %v4705_v20, %v333_v29  ;;  %v335_v40 = vmul.f32 %v3809_v30, %v4690_v7  ;;  %v403_v42 = vmax.f32 %v371_v33, 0.0  ;;  %v1897_v19 = vld [vmem:[#allocation2 + $0x52] sm:$0xff]  ;;  %v4891_v25 = vld [vmem:[%s5398_s3 + $0xe] sm:$0x3] }
  0x2e   : > { %4132 = vmatprep.mubr.msk.bf16.mxu0 %vm412_vm1, %v4805_v10  ;;  %435 = vst.msk [vmem:[#allocation2 + $0x121] sm:$0xff] %vm412_vm1, %v401_v28  ;;  %v373_v43 = vadd.f32 %v4705_v20, %v334_v34  ;;  %v336_v44 = vmul.f32 %v3812_v35, %v4690_v7  ;;  %v337_v45 = vmul.f32 %v3813_v36, %v4690_v7  ;;  %v3816_v61 = vunpack.c.l.bf16 %v3832_v9  ;;  %v553_v8 = vld [vmem:[#allocation2 + $0xd9] sm:$0xff]  ;;  %v1898_v28 = vld [vmem:[#allocation2 + $0x62] sm:$0xff] }
  0x2f   : > { %v4837_v47 = vpack.c.bf16 %v550_v32, %v549_v31  ;;  %436 = vst.msk [vmem:[#allocation2 + $0x129] sm:$0xff] %vm412_vm1, %v402_v38  ;;  %v404_v48 = vmax.f32 %v372_v39, 0.0  ;;  %v374_v49 = vadd.f32 %v4705_v20, %v335_v40  ;;  %437 = vst.msk [vmem:[#allocation2 + $0x139] sm:$0xff] %vm412_vm1, %v403_v42  ;;  %v3817_v62 = vunpack.c.h.bf16 %v3832_v9  ;;  %v554_v12 = vld [vmem:[#allocation2 + $0xe1] sm:$0xff]  ;;  %v1902_v40 = vld [vmem:[#allocation2 + $0x92] sm:$0xff] }
  0x30   : > { %v405_v50 = vmax.f32 %v373_v43, 0.0  ;;  %v375_v51 = vadd.f32 %v4705_v20, %v336_v44  ;;  %v376_v52 = vadd.f32 %v4705_v20, %v337_v45  ;;  %v4858_v63 = vpack.c.bf16 %v1613_v58, %v1612_v57  ;;  %v1900_v31 = vld [vmem:[#allocation2 + $0x7a] sm:$0xff]  ;;  %v1901_v32 = vld [vmem:[#allocation2 + $0x82] sm:$0xff]  ;;  %v1904_v45 = vld [vmem:[#allocation2 + $0xaa] sm:$0xff] }
  0x31   : > { %438 = vst.msk [vmem:[#allocation2 + $0x141] sm:$0xff] %vm412_vm1, %v404_v48  ;;  %v406_v54 = vmax.f32 %v374_v49, 0.0  ;;  %v338_v0 = vmul.f32 %v3816_v61, %v4690_v7  ;;  %v4861_v2 = vpack.c.bf16 %v1893_v59, %v1892_v11  ;;  %v339_v4 = vmul.f32 %v3817_v62, %v4690_v7  ;;  %v1895_v7 = vld [vmem:[#allocation2 + $0x3a] sm:$0xff]  ;;  %v1905_v48 = vld [vmem:[#allocation2 + $0xb2] sm:$0xff]  ;;  %v1907_v57 = vld [vmem:[#allocation2 + $0xca] sm:$0xff] }
  0x32   : > { %439 = vst.msk [vmem:[#allocation2 + $0x151] sm:$0xff] %vm412_vm1, %v405_v50  ;;  %v407_v55 = vmax.f32 %v375_v51, 0.0  ;;  %v408_v56 = vmax.f32 %v376_v52, 0.0  ;;  %v555_v15 = vld [vmem:[#allocation2 + $0xf1] sm:$0xff]  ;;  %v556_v16 = vld [vmem:[#allocation2 + $0xf9] sm:$0xff]  ;;  %v4878_v21 = vpack.c.bf16 %v1895_v7, %v1894_v13  ;;  %v4882_v23 = vpack.c.bf16 %v1897_v19, %v1896_v18  ;;  %v557_v26 = vld [vmem:[#allocation2 + $0x109] sm:$0xff] }
  0x33   : > { %440 = vst.msk [vmem:[#allocation2 + $0x159] sm:$0xff] %vm412_vm1, %v406_v54  ;;  %v377_v5 = vadd.f32 %v4705_v20, %v338_v0  ;;  %v378_v6 = vadd.f32 %v4705_v20, %v339_v4  ;;  %v4875_v20 = vpack.c.bf16 %v554_v12, %v553_v8  ;;  %v4880_v22 = vpack.c.bf16 %v556_v16, %v555_v15  ;;  %v558_v27 = vld [vmem:[#allocation2 + $0x111] sm:$0xff]  ;;  %v1903_v42 = vld [vmem:[#allocation2 + $0x9a] sm:$0xff]  ;;  %v487_v58 = vld [vmem:[#allocation2 + $0x8] sm:$0xff] }
  0x34   : > { %3997 = vmatmul.mubr.msk.bf16.gmra.mrb[8].mxu1 %vm412_vm1, %v4805_v10  ;;  %441 = vst.msk [vmem:[#allocation2 + $0x169] sm:$0xff] %vm412_vm1, %v407_v55  ;;  %442 = vst.msk [vmem:[#allocation2 + $0x171] sm:$0xff] %vm412_vm1, %v408_v56  ;;  %v2286_v24 = vsel %vm633_vm0, %v4773_v46, 0  ;;  %v1899_v46 = vld [vmem:[#allocation2 + $0x6a] sm:$0xff]  ;;  %v4901_v33 = vpack.c.bf16 %v558_v27, %v557_v26  ;;  %v4907_v36 = vpack.c.bf16 %v1901_v32, %v1900_v31  ;;  %v486_v55 = vld [vmem:[#allocation2] sm:$0xff]  ;;  %v1109_v18 = vsel %vm633_vm0, %v4781_v53, 0 }
  0x35   : > { %4133 = vmatmul.mubr.msk.bf16.gmra.mrb[8].mxu0 %vm412_vm1, %v4829_v37  ;;  %4000 = vmatprep.mubr.msk.bf16.mxu1 %vm412_vm1, %v4829_v37  ;;  %v409_v14 = vmax.f32 %v377_v5, 0.0  ;;  %v410_v17 = vmax.f32 %v378_v6, 0.0  ;;  %v559_v29 = vld [vmem:[#allocation2 + $0x121] sm:$0xff]  ;;  %v4903_v34 = vpack.c.bf16 %v1899_v46, %v1898_v28  ;;  %v4919_v50 = vpack.c.bf16 %v1903_v42, %v1902_v40  ;;  %v488_v5 = vld [vmem:[#allocation2 + $0x18] sm:$0xff]  ;;  %v490_v13 = vld [vmem:[#allocation2 + $0x30] sm:$0xff] }
  0x36   : > { %4136 = vmatprep.mubr.msk.bf16.mxu0 %vm412_vm1, %v4837_v47  ;;  %v560_v30 = vld [vmem:[#allocation2 + $0x129] sm:$0xff]  ;;  %v561_v38 = vld [vmem:[#allocation2 + $0x139] sm:$0xff]  ;;  %v4923_v52 = vpack.c.bf16 %v1905_v48, %v1904_v45  ;;  %v518_v0 = vpack.c.bf16 %v487_v58, %v486_v55  ;;  %v4961_v26 = vld [vmem:[%s5398_s3 + $0x6] sm:$0x3] }
  0x37   : > { %443 = vst.msk [vmem:[#allocation2 + $0x181] sm:$0xff] %vm412_vm1, %v409_v14  ;;  %444 = vst.msk [vmem:[#allocation2 + $0x189] sm:$0xff] %vm412_vm1, %v410_v17  ;;  %v4905_v35 = vpack.c.bf16 %v560_v30, %v559_v29  ;;  %v1906_v56 = vld [vmem:[#allocation2 + $0xc2] sm:$0xff]  ;;  %v1908_v11 = vld [vmem:[#allocation2 + $0xda] sm:$0xff] }
  0x38   : > { %v562_v39 = vld [vmem:[#allocation2 + $0x141] sm:$0xff]  ;;  %v4935_v62 = vpack.c.bf16 %v1907_v57, %v1906_v56  ;;  %v1910_v8 = vld [vmem:[#allocation2 + $0xf2] sm:$0xff]  ;;  %v1912_v7 = vld [vmem:[#allocation2 + $0x10a] sm:$0xff] }
  0x39   : > { %v563_v43 = vld [vmem:[#allocation2 + $0x151] sm:$0xff]  ;;  %v4917_v49 = vpack.c.bf16 %v562_v39, %v561_v38  ;;  %v1909_v59 = vld [vmem:[#allocation2 + $0xe2] sm:$0xff]  ;;  %v1911_v12 = vld [vmem:[#allocation2 + $0xfa] sm:$0xff] }
  0x3a   : > { %v564_v44 = vld [vmem:[#allocation2 + $0x159] sm:$0xff]  ;;  %v4937_v4 = vpack.c.bf16 %v1909_v59, %v1908_v11  ;;  %v4948_v17 = vpack.c.bf16 %v1911_v12, %v1910_v8  ;;  %v492_v27 = vld [vmem:[#allocation2 + $0x48] sm:$0xff]  ;;  %v493_v28 = vld [vmem:[#allocation2 + $0x50] sm:$0xff] }
  0x3b   : > { %v4921_v51 = vpack.c.bf16 %v564_v44, %v563_v43  ;;  %v565_v54 = vld [vmem:[#allocation2 + $0x169] sm:$0xff]  ;;  %v566_v9 = vld [vmem:[#allocation2 + $0x171] sm:$0xff]  ;;  %v489_v6 = vld [vmem:[#allocation2 + $0x20] sm:$0xff]  ;;  %v4971_v38 = vpack.c.bf16 %v493_v28, %v492_v27 }
  0x3c   : > { %4001 = vmatmul.mubr.msk.bf16.gmra.mrb[12].mxu1 %vm412_vm1, %v4837_v47  ;;  %v4933_v61 = vpack.c.bf16 %v566_v9, %v565_v54  ;;  %v491_v14 = vld [vmem:[#allocation2 + $0x38] sm:$0xff]  ;;  %v4946_v16 = vpack.c.bf16 %v489_v6, %v488_v5  ;;  %v494_v46 = vld [vmem:[#allocation2 + $0x60] sm:$0xff]  ;;  %v1915_v29 = vld [vmem:[#allocation2 + $0x12a] sm:$0xff] }
  0x3d   : > { %4137 = vmatmul.mubr.msk.bf16.gmra.mrb[12].mxu0 %vm412_vm1, %v4858_v63  ;;  %4004 = vmatprep.mubr.msk.bf16.mxu1 %vm412_vm1, %v4858_v63  ;;  %v1913_v15 = vld [vmem:[#allocation2 + $0x112] sm:$0xff]  ;;  %v4952_v19 = vpack.c.bf16 %v491_v14, %v490_v13  ;;  %v1914_v53 = vld [vmem:[#allocation2 + $0x122] sm:$0xff]  ;;  %v1916_v31 = vld [vmem:[#allocation2 + $0x13a] sm:$0xff] }
  0x3e   : > { %4158 = vmatprep.mubr.msk.bf16.mxu0 %vm412_vm1, %v4861_v2  ;;  %v495_v30 = vld [vmem:[#allocation2 + $0x68] sm:$0xff]  ;;  %v4973_v39 = vpack.c.bf16 %v1915_v29, %v1914_v53  ;;  %v496_v43 = vld [vmem:[#allocation2 + $0x78] sm:$0xff]  ;;  %v497_v44 = vld [vmem:[#allocation2 + $0x80] sm:$0xff] }
  0x3f   : > { %v1917_v32 = vld [vmem:[#allocation2 + $0x142] sm:$0xff]  ;;  %v4975_v40 = vpack.c.bf16 %v495_v30, %v494_v46  ;;  %v498_v45 = vld [vmem:[#allocation2 + $0x90] sm:$0xff]  ;;  %v1919_v54 = vld [vmem:[#allocation2 + $0x15a] sm:$0xff]  ;;  %v4987_v57 = vpack.c.bf16 %v497_v44, %v496_v43  ;;  %v2580_v30 = vsel %vm633_vm0, %v4891_v25, 0 }
  0x40   : > { %v4977_v42 = vpack.c.bf16 %v1917_v32, %v1916_v31  ;;  %v1918_v48 = vld [vmem:[#allocation2 + $0x152] sm:$0xff]  ;;  %v1920_v55 = vld [vmem:[#allocation2 + $0x16a] sm:$0xff]  ;;  %v502_v6 = vld [vmem:[#allocation2 + $0xc0] sm:$0xff] }
  0x41   : > { %v499_v9 = vld [vmem:[#allocation2 + $0x98] sm:$0xff]  ;;  %v4989_v58 = vpack.c.bf16 %v1919_v54, %v1918_v48  ;;  %v501_v5 = vld [vmem:[#allocation2 + $0xb0] sm:$0xff]  ;;  %v1922_v8 = vld [vmem:[#allocation2 + $0x182] sm:$0xff] }
  0x42   : > { %v1921_v56 = vld [vmem:[#allocation2 + $0x172] sm:$0xff]  ;;  %v4991_v11 = vpack.c.bf16 %v499_v9, %v498_v45  ;;  %v1923_v12 = vld [vmem:[#allocation2 + $0x18a] sm:$0xff]  ;;  %v505_v27 = vld [vmem:[#allocation2 + $0xe0] sm:$0xff] }
  0x43   : > { %v4993_v59 = vpack.c.bf16 %v1921_v56, %v1920_v55  ;;  %v503_v13 = vld [vmem:[#allocation2 + $0xc8] sm:$0xff]  ;;  %v506_v28 = vld [vmem:[#allocation2 + $0xf0] sm:$0xff]  ;;  %v507_v46 = vld [vmem:[#allocation2 + $0xf8] sm:$0xff] }
  0x44   : > { %4005 = vmatmul.mubr.msk.bf16.gmra.mrb[16].mxu1 %vm412_vm1, %v4875_v20  ;;  %v5019_v29 = vpack.c.bf16 %v507_v46, %v506_v28  ;;  %v5028_v31 = vld [vmem:[%s5398_s3 + $0x10] sm:$0x3]  ;;  %v508_v32 = vld [vmem:[#allocation2 + $0x108] sm:$0xff]  ;;  %v512_v54 = vld [vmem:[#allocation2 + $0x138] sm:$0xff]  ;;  %v1403_v28 = vsel %vm633_vm0, %v4961_v26, 0 }
  0x45   : > { %4159 = vmatmul.mubr.msk.bf16.vlgmr.msra.gmra.mrb[0].mxu0 %vm412_vm1, %v4878_v21  ;;  %4008 = vmatprep.mubr.msk.bf16.mxu1 %vm412_vm1, %v4880_v22  ;;  %v509_v43 = vld [vmem:[#allocation2 + $0x110] sm:$0xff]  ;;  %v511_v44 = vld [vmem:[#allocation2 + $0x128] sm:$0xff]  ;;  %v513_v9 = vld [vmem:[#allocation2 + $0x140] sm:$0xff] }
  0x46   : > { %4191 = vmatpush3.bf16.msra.mxu0 %v2286_v24  ;;  %4162 = vmatprep.mubr.msk.bf16.mxu0 %vm412_vm1, %v4882_v23  ;;  %v4954_v24 = vpack.c.bf16 %v1913_v15, %v1912_v7  ;;  %v5005_v7 = vpack.c.bf16 %v1923_v12, %v1922_v8  ;;  %v5007_v15 = vpack.c.bf16 %v503_v13, %v502_v6  ;;  %v514_v55 = vld [vmem:[#allocation2 + $0x150] sm:$0xff]  ;;  %v515_v56 = vld [vmem:[#allocation2 + $0x158] sm:$0xff]  ;;  %v516_v6 = vld [vmem:[#allocation2 + $0x168] sm:$0xff] }
  0x47   : > { %4558 = vmatprep.subr.msk.bf16.mxu0 %vm633_vm0, %v4891_v25  ;;  %v510_v25 = vld [vmem:[#allocation2 + $0x120] sm:$0xff]  ;;  %v5038_v45 = vpack.c.bf16 %v509_v43, %v508_v32  ;;  %v517_v8 = vld [vmem:[#allocation2 + $0x170] sm:$0xff] }
  0x48   : > { %v5040_v48 = vpack.c.bf16 %v511_v44, %v510_v25  ;;  %v1010_v12 = vld [vmem:[#allocation2 + $0x2] sm:$0xff]  ;;  %v1011_v13 = vld [vmem:[#allocation2 + $0xa] sm:$0xff]  ;;  %v2482_v43 = vld [vmem:[#allocation2 + $0x39] sm:$0xff] }
  0x49   : > { %v2481_v32 = vld [vmem:[#allocation2 + $0x31] sm:$0xff] }
  0x4a   : > { %v2513_v44 = vpack.c.bf16 %v2482_v43, %v2481_v32 }
  0x4c   : > { %4009 = vmatmul.mubr.msk.bf16.gmra.mrb[20].mxu1 %vm412_vm1, %v4901_v33 }
  0x4d   : > { %4163 = vmatmul.mubr.msk.bf16.gmra.mrb[4].mxu0 %vm412_vm1, %v4903_v34  ;;  %4012 = vmatprep.mubr.msk.bf16.mxu1 %vm412_vm1, %v4905_v35 }
  0x4e   : > { %4166 = vmatprep.mubr.msk.bf16.mxu0 %vm412_vm1, %v4907_v36 }
  0x54   : > { %4013 = vmatmul.mubr.msk.bf16.gmra.mrb[24].mxu1 %vm412_vm1, %v4917_v49 }
  0x55   : > { %4167 = vmatmul.mubr.msk.bf16.gmra.mrb[8].mxu0 %vm412_vm1, %v4919_v50  ;;  %4016 = vmatprep.mubr.msk.bf16.mxu1 %vm412_vm1, %v4921_v51 }
  0x56   : > { %4170 = vmatprep.mubr.msk.bf16.mxu0 %vm412_vm1, %v4923_v52 }
  0x5c   : > { %4017 = vmatmul.mubr.msk.bf16.gmra.mrb[28].mxu1 %vm412_vm1, %v4933_v61 }
  0x5d   : > { %4171 = vmatmul.mubr.msk.bf16.gmra.mrb[12].mxu0 %vm412_vm1, %v4935_v62  ;;  %4022 = vmatprep.mubr.msk.bf16.mxu1 %vm412_vm1, %v518_v0  ;;  %v500_v0 = vld [vmem:[#allocation2 + $0xa8] sm:$0xff] }
  0x5e   : > { %4174 = vmatprep.mubr.msk.bf16.mxu0 %vm412_vm1, %v4937_v4  ;;  %v5003_v14 = vpack.c.bf16 %v501_v5, %v500_v0  ;;  %v5050_v0 = vpack.c.bf16 %v513_v9, %v512_v54  ;;  %v5052_v5 = vpack.c.bf16 %v515_v56, %v514_v55  ;;  %v2874_v54 = vsel %vm633_vm0, %v5028_v31, 0 }
  0x64   : > { %4023 = vmatmul.mubr.msk.bf16.vlgmr.msra.gmra.mrb[0].mxu1 %vm412_vm1, %v4946_v16 }
  0x65   : > { %4055 = vmatpush3.bf16.msra.mxu1 %v1109_v18  ;;  %4175 = vmatmul.mubr.msk.bf16.gmra.mrb[16].mxu0 %vm412_vm1, %v4948_v17  ;;  %v504_v18 = vld [vmem:[#allocation2 + $0xd8] sm:$0xff] }
  0x66   : > { %4026 = vmatprep.mubr.msk.bf16.mxu1 %vm412_vm1, %v4952_v19  ;;  %4178 = vmatprep.mubr.msk.bf16.mxu0 %vm412_vm1, %v4954_v24  ;;  %v5017_v53 = vpack.c.bf16 %v505_v27, %v504_v18  ;;  %v5062_v18 = vpack.c.bf16 %v517_v8, %v516_v6  ;;  %v1042_v27 = vpack.c.bf16 %v1011_v13, %v1010_v12 }
  0x67   : > { %4553 = vmatprep.subr.msk.bf16.mxu1 %vm633_vm0, %v4961_v26  ;;  %v2216_v26 = vld [vmem:[#allocation2 + $0x188] sm:$0xff] }
  0x6c   : > { %4027 = vmatmul.mubr.msk.bf16.gmra.mrb[4].mxu1 %vm412_vm1, %v4971_v38 }
  0x6d   : > { %4179 = vmatmul.mubr.msk.bf16.gmra.mrb[20].mxu0 %vm412_vm1, %v4973_v39  ;;  %4030 = vmatprep.mubr.msk.bf16.mxu1 %vm412_vm1, %v4975_v40 }
  0x6e   : > { %4182 = vmatprep.mubr.msk.bf16.mxu0 %vm412_vm1, %v4977_v42 }
  0x74   : > { %4031 = vmatmul.mubr.msk.bf16.gmra.mrb[8].mxu1 %vm412_vm1, %v4987_v57 }
  0x75   : > { %4183 = vmatmul.mubr.msk.bf16.gmra.mrb[24].mxu0 %vm412_vm1, %v4989_v58  ;;  %4034 = vmatprep.mubr.msk.bf16.mxu1 %vm412_vm1, %v4991_v11 }
  0x76   : > { %4186 = vmatprep.mubr.msk.bf16.mxu0 %vm412_vm1, %v4993_v59 }
  0x7c   : > { %4035 = vmatmul.mubr.msk.bf16.gmra.mrb[12].mxu1 %vm412_vm1, %v5003_v14 }
  0x7d   : > { %4187 = vmatmul.mubr.msk.bf16.gmra.mrb[28].mxu0 %vm412_vm1, %v5005_v7  ;;  %4038 = vmatprep.mubr.msk.bf16.mxu1 %vm412_vm1, %v5007_v15 }
  0x7e   : > { %4192 = vmatprep.mubr.msk.bf16.mxu0 %vm412_vm1, %v4952_v19 }
  0x84   : > { %4039 = vmatmul.mubr.msk.bf16.gmra.mrb[16].mxu1 %vm412_vm1, %v5017_v53 }
  0x85   : > { %4193 = vmatmul.mubr.msk.bf16.vlgmr.msra.gmra.mrb[0].mxu0 %vm412_vm1, %v4971_v38  ;;  %4042 = vmatprep.mubr.msk.bf16.mxu1 %vm412_vm1, %v5019_v29 }
  0x86   : > { %4225 = vmatpush3.bf16.msra.mxu0 %v2580_v30  ;;  %4196 = vmatprep.mubr.msk.bf16.mxu0 %vm412_vm1, %v4975_v40  ;;  %v2218_v30 = vld [vmem:[#allocation2 + $0x1a0] sm:$0xff] }
  0x87   : > { %4559 = vmatprep.subr.msk.bf16.mxu0 %vm633_vm0, %v5028_v31 }
  0x8c   : > { %4043 = vmatmul.mubr.msk.bf16.gmra.mrb[20].mxu1 %vm412_vm1, %v5038_v45 }
  0x8d   : > { %4197 = vmatmul.mubr.msk.bf16.gmra.mrb[4].mxu0 %vm412_vm1, %v4987_v57  ;;  %4046 = vmatprep.mubr.msk.bf16.mxu1 %vm412_vm1, %v5040_v48 }
  0x8e   : > { %4200 = vmatprep.mubr.msk.bf16.mxu0 %vm412_vm1, %v4991_v11 }
  0x94   : > { %4047 = vmatmul.mubr.msk.bf16.gmra.mrb[24].mxu1 %vm412_vm1, %v5050_v0 }
  0x95   : > { %4201 = vmatmul.mubr.msk.bf16.gmra.mrb[8].mxu0 %vm412_vm1, %v5003_v14  ;;  %4050 = vmatprep.mubr.msk.bf16.mxu1 %vm412_vm1, %v5052_v5 }
  0x96   : > { %4204 = vmatprep.mubr.msk.bf16.mxu0 %vm412_vm1, %v5007_v15 }
  0x9c   : > { %4051 = vmatmul.mubr.msk.bf16.gmra.mrb[28].mxu1 %vm412_vm1, %v5062_v18 }
  0x9d   : > { %4205 = vmatmul.mubr.msk.bf16.gmra.mrb[12].mxu0 %vm412_vm1, %v5017_v53  ;;  %4056 = vmatprep.mubr.msk.bf16.mxu1 %vm412_vm1, %v1042_v27 }
  0x9e   : > { %4208 = vmatprep.mubr.msk.bf16.mxu0 %vm412_vm1, %v5019_v29 }
  0xa4   : > { %4057 = vmatmul.mubr.msk.bf16.vlgmr.msra.gmra.mrb[0].mxu1 %vm412_vm1, %v4861_v2  ;;  %v2215_v2 = vld [vmem:[#allocation2 + $0x180] sm:$0xff] }
  0xa5   : > { %4089 = vmatpush3.bf16.msra.mxu1 %v1403_v28  ;;  %4209 = vmatmul.mubr.msk.bf16.gmra.mrb[16].mxu0 %vm412_vm1, %v5038_v45  ;;  %v5091_v46 = vpack.c.bf16 %v2216_v26, %v2215_v2 }
  0xa6   : > { %4060 = vmatprep.mubr.msk.bf16.mxu1 %vm412_vm1, %v4878_v21  ;;  %4212 = vmatprep.mubr.msk.bf16.mxu0 %vm412_vm1, %v5040_v48 }
  0xa7   : > { %4555 = vmatprep.subr.msk.bf16.mxu1 %vm633_vm0, %v4622_v1  ;;  %v2217_v1 = vld [vmem:[#allocation2 + $0x198] sm:$0xff] }
  0xa8   : > { %v2234_v25 = vpack.c.bf16 %v2218_v30, %v2217_v1 }
  0xac   : > { %4061 = vmatmul.mubr.msk.bf16.gmra.mrb[4].mxu1 %vm412_vm1, %v4882_v23 }
  0xad   : > { %4213 = vmatmul.mubr.msk.bf16.gmra.mrb[20].mxu0 %vm412_vm1, %v5050_v0  ;;  %4064 = vmatprep.mubr.msk.bf16.mxu1 %vm412_vm1, %v4903_v34 }
  0xae   : > { %4216 = vmatprep.mubr.msk.bf16.mxu0 %vm412_vm1, %v5052_v5 }
  0xb4   : > { %4065 = vmatmul.mubr.msk.bf16.gmra.mrb[8].mxu1 %vm412_vm1, %v4907_v36 }
  0xb5   : > { %4217 = vmatmul.mubr.msk.bf16.gmra.mrb[24].mxu0 %vm412_vm1, %v5062_v18  ;;  %4068 = vmatprep.mubr.msk.bf16.mxu1 %vm412_vm1, %v4919_v50 }
  0xb6   : > { %4220 = vmatprep.mubr.msk.bf16.mxu0 %vm412_vm1, %v5091_v46 }
  0xbc   : > { %4069 = vmatmul.mubr.msk.bf16.gmra.mrb[12].mxu1 %vm412_vm1, %v4923_v52 }
  0xbd   : > { %4221 = vmatmul.mubr.msk.bf16.gmra.mrb[28].mxu0 %vm412_vm1, %v2234_v25  ;;  %4072 = vmatprep.mubr.msk.bf16.mxu1 %vm412_vm1, %v4935_v62 }
  0xbe   : > { %4226 = vmatprep.mubr.msk.bf16.mxu0 %vm412_vm1, %v2513_v44 }
  0xc4   : > { %4073 = vmatmul.mubr.msk.bf16.gmra.mrb[16].mxu1 %vm412_vm1, %v4937_v4 }
  0xc5   : > { %4227 = vmatmul.mubr.msk.bf16.vlgmr.msra.gmra.mrb[0].mxu0 %vm412_vm1, %v4758_v41  ;;  %4076 = vmatprep.mubr.msk.bf16.mxu1 %vm412_vm1, %v4948_v17  ;;  %v2510_v41 = vld [vmem:[#allocation2 + $0x189] sm:$0xff] }
  0xc6   : > { %4259 = vmatpush3.bf16.msra.mxu0 %v2874_v54  ;;  %4230 = vmatprep.mubr.msk.bf16.mxu0 %vm412_vm1, %v4795_v60 }
  0xcc   : > { %4077 = vmatmul.mubr.msk.bf16.gmra.mrb[20].mxu1 %vm412_vm1, %v4954_v24 }
  0xcd   : > { %4231 = vmatmul.mubr.msk.bf16.gmra.mrb[4].mxu0 %vm412_vm1, %v4805_v10  ;;  %4080 = vmatprep.mubr.msk.bf16.mxu1 %vm412_vm1, %v4973_v39  ;;  %v2511_v10 = vld [vmem:[#allocation2 + $0x199] sm:$0xff] }
  0xce   : > { %4234 = vmatprep.mubr.msk.bf16.mxu0 %vm412_vm1, %v4829_v37  ;;  %v2512_v37 = vld [vmem:[#allocation2 + $0x1a1] sm:$0xff] }
  0xd4   : > { %4081 = vmatmul.mubr.msk.bf16.gmra.mrb[24].mxu1 %vm412_vm1, %v4977_v42 }
  0xd5   : > { %4235 = vmatmul.mubr.msk.bf16.gmra.mrb[8].mxu0 %vm412_vm1, %v4837_v47  ;;  %4084 = vmatprep.mubr.msk.bf16.mxu1 %vm412_vm1, %v4989_v58  ;;  %v2528_v47 = vpack.c.bf16 %v2512_v37, %v2511_v10 }
  0xd6   : > { %4238 = vmatprep.mubr.msk.bf16.mxu0 %vm412_vm1, %v4858_v63  ;;  %v1614_v63 = vld [vmem:[#allocation2 + $0xd9] sm:$0xff] }
  0xdc   : > { %4085 = vmatmul.mubr.msk.bf16.gmra.mrb[28].mxu1 %vm412_vm1, %v4993_v59 }
  0xdd   : > { %4239 = vmatmul.mubr.msk.bf16.gmra.mrb[12].mxu0 %vm412_vm1, %v4875_v20  ;;  %4090 = vmatprep.mubr.msk.bf16.mxu1 %vm412_vm1, %v4946_v16  ;;  %v1615_v20 = vld [vmem:[#allocation2 + $0xe1] sm:$0xff] }
  0xde   : > { %4242 = vmatprep.mubr.msk.bf16.mxu0 %vm412_vm1, %v4880_v22  ;;  %v1616_v22 = vld [vmem:[#allocation2 + $0xf1] sm:$0xff] }
  0xe4   : > { %4091 = vmatmul.mubr.msk.bf16.vlgmr.msra.gmra.mrb[0].mxu1 %vm412_vm1, %v4952_v19 }
  0xe5   : > { %4293 = vmatpush3.bf16.msra.mxu1 %v4630_v3  ;;  %4243 = vmatmul.mubr.msk.bf16.gmra.mrb[16].mxu0 %vm412_vm1, %v4901_v33  ;;  %v2509_v3 = vld [vmem:[#allocation2 + $0x181] sm:$0xff]  ;;  %v1618_v33 = vld [vmem:[#allocation2 + $0x109] sm:$0xff] }
  0xe6   : > { %4094 = vmatprep.mubr.msk.bf16.mxu1 %vm412_vm1, %v4971_v38  ;;  %4246 = vmatprep.mubr.msk.bf16.mxu0 %vm412_vm1, %v4905_v35  ;;  %v2527_v60 = vpack.c.bf16 %v2510_v41, %v2509_v3 }
  0xec   : > { %4095 = vmatmul.mubr.msk.bf16.gmra.mrb[4].mxu1 %vm412_vm1, %v4975_v40 }
  0xed   : > { %4247 = vmatmul.mubr.msk.bf16.gmra.mrb[20].mxu0 %vm412_vm1, %v4917_v49  ;;  %4098 = vmatprep.mubr.msk.bf16.mxu1 %vm412_vm1, %v4987_v57 }
  0xee   : > { %4250 = vmatprep.mubr.msk.bf16.mxu0 %vm412_vm1, %v4921_v51 }
  0xf4   : > { %4099 = vmatmul.mubr.msk.bf16.gmra.mrb[8].mxu1 %vm412_vm1, %v4991_v11 }
  0xf5   : > { %4251 = vmatmul.mubr.msk.bf16.gmra.mrb[24].mxu0 %vm412_vm1, %v4933_v61  ;;  %4102 = vmatprep.mubr.msk.bf16.mxu1 %vm412_vm1, %v5003_v14 }
  0xf6   : > { %4254 = vmatprep.mubr.msk.bf16.mxu0 %vm412_vm1, %v2527_v60 }
  0xfc   : > { %4103 = vmatmul.mubr.msk.bf16.gmra.mrb[12].mxu1 %vm412_vm1, %v5007_v15 }
  0xfd   : > { %4255 = vmatmul.mubr.msk.bf16.gmra.mrb[28].mxu0 %vm412_vm1, %v2528_v47  ;;  %4106 = vmatprep.mubr.msk.bf16.mxu1 %vm412_vm1, %v5017_v53 }
  0xfe   : > { %4260 = vmatprep.mubr.msk.bf16.mxu0 %vm412_vm1, %v4878_v21  ;;  %v1638_v21 = vpack.c.bf16 %v1615_v20, %v1614_v63 }
 0x104   : > { %4107 = vmatmul.mubr.msk.bf16.gmra.mrb[16].mxu1 %vm412_vm1, %v5019_v29 }
 0x105   : > { %4261 = vmatmul.mubr.msk.bf16.vlgmr.msra.gmra.mrb[0].mxu0 %vm412_vm1, %v4882_v23  ;;  %4110 = vmatprep.mubr.msk.bf16.mxu1 %vm412_vm1, %v5038_v45  ;;  %v1617_v23 = vld [vmem:[#allocation2 + $0xf9] sm:$0xff] }
 0x106   : > { %4264 = vmatprep.mubr.msk.bf16.mxu0 %vm412_vm1, %v4903_v34  ;;  %v1619_v34 = vld [vmem:[#allocation2 + $0x111] sm:$0xff] }
 0x10c   : > { %4111 = vmatmul.mubr.msk.bf16.gmra.mrb[20].mxu1 %vm412_vm1, %v5040_v48 }
 0x10d   : > { %4265 = vmatmul.mubr.msk.bf16.gmra.mrb[4].mxu0 %vm412_vm1, %v4907_v36  ;;  %4114 = vmatprep.mubr.msk.bf16.mxu1 %vm412_vm1, %v5050_v0  ;;  %v1639_v36 = vpack.c.bf16 %v1617_v23, %v1616_v22 }
 0x10e   : > { %4268 = vmatprep.mubr.msk.bf16.mxu0 %vm412_vm1, %v4919_v50  ;;  %v1640_v50 = vpack.c.bf16 %v1619_v34, %v1618_v33 }
 0x114   : > { %4115 = vmatmul.mubr.msk.bf16.gmra.mrb[24].mxu1 %vm412_vm1, %v5052_v5 }
 0x115   : > { %4269 = vmatmul.mubr.msk.bf16.gmra.mrb[8].mxu0 %vm412_vm1, %v4923_v52  ;;  %4118 = vmatprep.mubr.msk.bf16.mxu1 %vm412_vm1, %v5062_v18  ;;  %v2806_v52 = vld [vmem:[#allocation2 + $0x1a2] sm:$0xff] }
 0x116   : > { %4272 = vmatprep.mubr.msk.bf16.mxu0 %vm412_vm1, %v4935_v62 }
 0x11c   : > { %4119 = vmatmul.mubr.msk.bf16.gmra.mrb[28].mxu1 %vm412_vm1, %v5091_v46 }
 0x11d   : > { %4273 = vmatmul.mubr.msk.bf16.gmra.mrb[12].mxu0 %vm412_vm1, %v4937_v4  ;;  %4140 = vmatprep.mubr.msk.bf16.mxu1 %vm412_vm1, %v1638_v21 }
 0x11e   : > { %4276 = vmatprep.mubr.msk.bf16.mxu0 %vm412_vm1, %v4948_v17 }
 0x124   : > { %4141 = vmatmul.mubr.msk.bf16.vlgmr.msra.gmra.mrb[16].mxu1 %vm412_vm1, %v1639_v36 }
 0x125   : > { %4277 = vmatmul.mubr.msk.bf16.gmra.mrb[16].mxu0 %vm412_vm1, %v4954_v24  ;;  %4144 = vmatprep.mubr.msk.bf16.mxu1 %vm412_vm1, %v1640_v50 }
 0x126   : > { %4280 = vmatprep.mubr.msk.bf16.mxu0 %vm412_vm1, %v4973_v39 }
 0x12c   : > { %4145 = vmatmul.mubr.msk.bf16.gmra.mrb[20].mxu1 %vm412_vm1, %v4905_v35  ;;  %v2805_v35 = vld [vmem:[#allocation2 + $0x19a] sm:$0xff] }
 0x12d   : > { %4281 = vmatmul.mubr.msk.bf16.gmra.mrb[20].mxu0 %vm412_vm1, %v4977_v42  ;;  %4148 = vmatprep.mubr.msk.bf16.mxu1 %vm412_vm1, %v4917_v49  ;;  %v2822_v62 = vpack.c.bf16 %v2806_v52, %v2805_v35 }
 0x12e   : > { %4284 = vmatprep.mubr.msk.bf16.mxu0 %vm412_vm1, %v4989_v58 }
 0x134   : > { %4149 = vmatmul.mubr.msk.bf16.gmra.mrb[24].mxu1 %vm412_vm1, %v4921_v51 }
 0x135   : > { %4285 = vmatmul.mubr.msk.bf16.gmra.mrb[24].mxu0 %vm412_vm1, %v4993_v59  ;;  %4152 = vmatprep.mubr.msk.bf16.mxu1 %vm412_vm1, %v4933_v61 }
 0x136   : > { %4288 = vmatprep.mubr.msk.bf16.mxu0 %vm412_vm1, %v5005_v7 }
 0x13c   : > { %4153 = vmatmul.mubr.msk.bf16.gmra.mrb[28].mxu1 %vm412_vm1, %v2527_v60 }
 0x13d   : > { %4289 = vmatmul.mubr.msk.bf16.gmra.mrb[28].mxu0 %vm412_vm1, %v2822_v62 }
 0x1b7   : > { %v4092_v49 = vpop.f32.mrb[0].mxu1 }
 0x1b8   : > { %v1439_v4 = vpop.f32.mrb[1].mxu1 }
 0x1b9   : > { %v4093_v16 = vpop.f32.mrb[2].mxu1 }
 0x1ba   : > { %v1442_v51 = vpop.f32.mrb[3].mxu1 }
 0x1bf   : > { %v4096_v17 = vpop.f32.mrb[4].mxu1 }
 0x1c0   : > { %v1455_v19 = vpop.f32.mrb[5].mxu1 }
 0x1c1   : > { %v4097_v24 = vpop.f32.mrb[6].mxu1 }
 0x1c2   : > { %v1458_v38 = vpop.f32.mrb[7].mxu1 }
 0x1c7   : > { %v5227_v61 = vpop.f32.mrb[8].mxu1 }
 0x1c8   : > { %v5229_v39 = vpop.f32.mrb[9].mxu1 }
 0x1c9   : > { %v5231_v40 = vpop.f32.mrb[10].mxu1 }
 0x1ca   : > { %v5233_v42 = vpop.f32.mrb[11].mxu1 }
 0x1cf   : > { %v5235_v57 = vpop.f32.mrb[12].mxu1 }
 0x1d0   : > { %v5237_v58 = vpop.f32.mrb[13].mxu1 }
 0x1d1   : > { %v5239_v11 = vpop.f32.mrb[14].mxu1 }
 0x1d2   : > { %v5241_v59 = vpop.f32.mrb[15].mxu1 }
 0x1d8   : > { %v4262_v14 = vpop.f32.mrb[0].mxu0 }
 0x1d9   : > { %v4294_v7 = vadd.f32 %v4262_v14, %v4092_v49  ;;  %v2910_v15 = vpop.f32.mrb[1].mxu0 }
 0x1da   : > { %v4295_v53 = vadd.f32 %v2910_v15, %v1439_v4  ;;  %v4263_v29 = vpop.f32.mrb[2].mxu0 }
 0x1db   : > { %v3724_v31 = vpack.c.bf16 %v4294_v7, %v4294_v7  ;;  %v4296_v45 = vadd.f32 %v4263_v29, %v4093_v16  ;;  %v2913_v48 = vpop.f32.mrb[3].mxu0 }
 0x1dc   : > { %v3722_v9 = vpack.c.bf16 %v4295_v53, %v4295_v53  ;;  %v4297_v55 = vadd.f32 %v2913_v48, %v1442_v51 }
 0x1dd   : > { %3200 = vst.msk [vmem:[%s5248_s25 + $0x8] sm:$0xf] %vm3197_vm4, %v3724_v31  ;;  %v3070_v56 = vpack.c.bf16 %v4296_v45, %v4294_v7  ;;  %v3725_v0 = vpack.c.bf16 %v4296_v45, %v4296_v45 }
 0x1de   : > { %3198 = vst.msk [vmem:[%s5248_s25] sm:$0xf] %vm3197_vm4, %v3722_v9  ;;  %v3069_v5 = vpack.c.bf16 %v4297_v55, %v4295_v53  ;;  %v3723_v6 = vpack.c.bf16 %v4297_v55, %v4297_v55 }
 0x1df   : > { %3201 = vst.msk [vmem:[%s5248_s25 + $0xc] sm:$0xf] %vm3197_vm4, %v3725_v0  ;;  %v3232_v8 = vunpack.c.l.bf16 %v3070_v56  ;;  %v3233_v12 = vunpack.c.h.bf16 %v3070_v56 }
 0x1e0   : > { %3199 = vst.msk [vmem:[%s5248_s25 + $0x4] sm:$0xf] %vm3197_vm4, %v3723_v6  ;;  %v3230_v13 = vunpack.c.l.bf16 %v3069_v5  ;;  %v3231_v18 = vunpack.c.h.bf16 %v3069_v5  ;;  %v4266_v27 = vpop.f32.mrb[4].mxu0 }
 0x1e1   : > { %v3265_v28 = vsel %vm412_vm1, %v3232_v8, 0.0  ;;  %v3333_v2 = vmul.f32 %v3232_v8, %v3232_v8  ;;  %v2926_v26 = vpop.f32.mrb[5].mxu0  ;;  %v3267_v25 = vsel %vm412_vm1, %v3233_v12, 0.0  ;;  %v3334_v44 = vmul.f32 %v3233_v12, %v3233_v12 }
 0x1e2   : > { %v3262_v46 = vsel %vm412_vm1, %v3230_v13, 0.0  ;;  %v3263_v1 = vsel %vm412_vm1, %v3231_v18, 0.0  ;;  %v3331_v30 = vmul.f32 %v3230_v13, %v3230_v13  ;;  %v3332_v32 = vmul.f32 %v3231_v18, %v3231_v18  ;;  %v4267_v43 = vpop.f32.mrb[6].mxu0 }
 0x1e3   : > { %v3264_v54 = vadd.f32 %v3263_v1, %v3262_v46  ;;  %v4298_v3 = vadd.f32 %v4266_v27, %v4096_v17  ;;  %v2929_v41 = vpop.f32.mrb[7].mxu0  ;;  %v4299_v37 = vadd.f32 %v2926_v26, %v1455_v19  ;;  %v4300_v47 = vadd.f32 %v4267_v43, %v4097_v24 }
 0x1e4   : > { %v3363_v60 = vsel %vm412_vm1, %v3331_v30, 0.0  ;;  %v3364_v10 = vsel %vm412_vm1, %v3332_v32, 0.0  ;;  %v4301_v22 = vadd.f32 %v2929_v41, %v1458_v38  ;;  %v3366_v23 = vsel %vm412_vm1, %v3333_v2, 0.0 }
 0x1e5   : > { %v3266_v63 = vadd.f32 %v3265_v28, %v3264_v54  ;;  %v3365_v20 = vadd.f32 %v3364_v10, %v3363_v60  ;;  %v3728_v21 = vpack.c.bf16 %v4298_v3, %v4298_v3  ;;  %v3726_v33 = vpack.c.bf16 %v4299_v37, %v4299_v37 }
 0x1e6   : > { %v3072_v34 = vpack.c.bf16 %v4300_v47, %v4298_v3  ;;  %v3729_v36 = vpack.c.bf16 %v4300_v47, %v4300_v47  ;;  %v3071_v35 = vpack.c.bf16 %v4301_v22, %v4299_v37  ;;  %v3727_v52 = vpack.c.bf16 %v4301_v22, %v4301_v22 }
 0x1e7   : > { %v3367_v50 = vadd.f32 %v3366_v23, %v3365_v20  ;;  %3204 = vst.msk [vmem:[%s5248_s25 + $0x18] sm:$0xf] %vm3197_vm4, %v3728_v21  ;;  %v3268_v62 = vadd.f32 %v3267_v25, %v3266_v63  ;;  %v3368_v49 = vsel %vm412_vm1, %v3334_v44, 0.0  ;;  %3202 = vst.msk [vmem:[%s5248_s25 + $0x10] sm:$0xf] %vm3197_vm4, %v3726_v33 }
 0x1e8   : > { %3205 = vst.msk [vmem:[%s5248_s25 + $0x1c] sm:$0xf] %vm3197_vm4, %v3729_v36  ;;  %v3236_v4 = vunpack.c.l.bf16 %v3072_v34  ;;  %v3237_v16 = vunpack.c.h.bf16 %v3072_v34  ;;  %v4270_v51 = vpop.f32.mrb[8].mxu0  ;;  %3203 = vst.msk [vmem:[%s5248_s25 + $0x14] sm:$0xf] %vm3197_vm4, %v3727_v52  ;;  %v3234_v17 = vunpack.c.l.bf16 %v3071_v35  ;;  %v3235_v19 = vunpack.c.h.bf16 %v3071_v35 }
 0x1e9   : > { %v3369_v24 = vadd.f32 %v3368_v49, %v3367_v50  ;;  %v4302_v38 = vadd.f32 %v4270_v51, %v5227_v61  ;;  %v2942_v14 = vpop.f32.mrb[9].mxu0 }
 0x1ea   : > { %v4271_v7 = vpop.f32.mrb[10].mxu0  ;;  %v3273_v15 = vsel %vm412_vm1, %v3236_v4, 0.0  ;;  %v3269_v53 = vsel %vm412_vm1, %v3234_v17, 0.0  ;;  %v3335_v29 = vmul.f32 %v3234_v17, %v3234_v17  ;;  %v3336_v31 = vmul.f32 %v3235_v19, %v3235_v19 }
 0x1eb   : > { %v2945_v45 = vpop.f32.mrb[11].mxu0  ;;  %v3275_v48 = vsel %vm412_vm1, %v3237_v16, 0.0  ;;  %v3337_v9 = vmul.f32 %v3236_v4, %v3236_v4  ;;  %v3270_v55 = vadd.f32 %v3269_v53, %v3268_v62  ;;  %v3732_v56 = vpack.c.bf16 %v4302_v38, %v4302_v38 }
 0x1ec   : > { %v3271_v0 = vsel %vm412_vm1, %v3235_v19, 0.0  ;;  %v3370_v5 = vsel %vm412_vm1, %v3335_v29, 0.0  ;;  %v4303_v61 = vadd.f32 %v2942_v14, %v5229_v39  ;;  %v4304_v6 = vadd.f32 %v4271_v7, %v5231_v40 }
 0x1ed   : > { %v3338_v8 = vmul.f32 %v3237_v16, %v3237_v16  ;;  %v3272_v12 = vadd.f32 %v3271_v0, %v3270_v55  ;;  %v3371_v13 = vadd.f32 %v3370_v5, %v3369_v24  ;;  %3208 = vst.msk [vmem:[%s5248_s25 + $0x28] sm:$0xf] %vm3197_vm4, %v3732_v56  ;;  %v4305_v18 = vadd.f32 %v2945_v45, %v5233_v42 }
 0x1ee   : > { %v3372_v27 = vsel %vm412_vm1, %v3336_v31, 0.0  ;;  %v3730_v28 = vpack.c.bf16 %v4303_v61, %v4303_v61  ;;  %v3074_v2 = vpack.c.bf16 %v4304_v6, %v4302_v38  ;;  %v3733_v26 = vpack.c.bf16 %v4304_v6, %v4304_v6 }
 0x1ef   : > { %v3274_v46 = vadd.f32 %v3273_v15, %v3272_v12  ;;  %v3373_v1 = vadd.f32 %v3372_v27, %v3371_v13  ;;  %v3073_v39 = vpack.c.bf16 %v4305_v18, %v4303_v61  ;;  %v3731_v30 = vpack.c.bf16 %v4305_v18, %v4305_v18 }
 0x1f0   : > { %v4274_v40 = vpop.f32.mrb[12].mxu0  ;;  %v3374_v32 = vsel %vm412_vm1, %v3337_v9, 0.0  ;;  %3206 = vst.msk [vmem:[%s5248_s25 + $0x20] sm:$0xf] %vm3197_vm4, %v3730_v28  ;;  %3209 = vst.msk [vmem:[%s5248_s25 + $0x2c] sm:$0xf] %vm3197_vm4, %v3733_v26  ;;  %v3240_v43 = vunpack.c.l.bf16 %v3074_v2  ;;  %v3241_v25 = vunpack.c.h.bf16 %v3074_v2 }
 0x1f1   : > { %v4306_v42 = vadd.f32 %v4274_v40, %v5235_v57  ;;  %v2958_v44 = vpop.f32.mrb[13].mxu0  ;;  %v3375_v54 = vadd.f32 %v3374_v32, %v3373_v1  ;;  %3207 = vst.msk [vmem:[%s5248_s25 + $0x24] sm:$0xf] %vm3197_vm4, %v3731_v30  ;;  %v3238_v3 = vunpack.c.l.bf16 %v3073_v39  ;;  %v3239_v41 = vunpack.c.h.bf16 %v3073_v39 }
 0x1f2   : > { %v3276_v60 = vadd.f32 %v3275_v48, %v3274_v46  ;;  %v4275_v10 = vpop.f32.mrb[14].mxu0  ;;  %v3376_v37 = vsel %vm412_vm1, %v3338_v8, 0.0  ;;  %v3341_v63 = vmul.f32 %v3240_v43, %v3240_v43  ;;  %v3281_v23 = vsel %vm412_vm1, %v3240_v43, 0.0 }
 0x1f3   : > { %v2961_v47 = vpop.f32.mrb[15].mxu0  ;;  %v3277_v20 = vsel %vm412_vm1, %v3238_v3, 0.0  ;;  %v3339_v21 = vmul.f32 %v3238_v3, %v3238_v3  ;;  %v3340_v22 = vmul.f32 %v3239_v41, %v3239_v41  ;;  %v3283_v57 = vsel %vm412_vm1, %v3241_v25, 0.0 }
 0x1f4   : > { %v3278_v33 = vadd.f32 %v3277_v20, %v3276_v60  ;;  %v3377_v34 = vadd.f32 %v3376_v37, %v3375_v54  ;;  %v3279_v36 = vsel %vm412_vm1, %v3239_v41, 0.0  ;;  %v3736_v35 = vpack.c.bf16 %v4306_v42, %v4306_v42 }
 0x1f5   : > { %v3378_v50 = vsel %vm412_vm1, %v3339_v21, 0.0  ;;  %v4307_v52 = vadd.f32 %v2958_v44, %v5237_v58  ;;  %v4308_v4 = vadd.f32 %v4275_v10, %v5239_v11  ;;  %v4309_v16 = vadd.f32 %v2961_v47, %v5241_v59 }
 0x1f6   : > { %v3280_v62 = vadd.f32 %v3279_v36, %v3278_v33  ;;  %v3379_v49 = vadd.f32 %v3378_v50, %v3377_v34  ;;  %v3342_v17 = vmul.f32 %v3241_v25, %v3241_v25  ;;  %v3382_v19 = vsel %vm412_vm1, %v3341_v63, 0.0  ;;  %3212 = vst.msk [vmem:[%s5248_s25 + $0x38] sm:$0xf] %vm3197_vm4, %v3736_v35 }
 0x1f7   : > { %v4142_v51 = vpop.f32.mrb[16].mxu1  ;;  %v3380_v24 = vsel %vm412_vm1, %v3340_v22, 0.0  ;;  %v3734_v38 = vpack.c.bf16 %v4307_v52, %v4307_v52  ;;  %v3076_v53 = vpack.c.bf16 %v4308_v4, %v4306_v42  ;;  %v3737_v29 = vpack.c.bf16 %v4308_v4, %v4308_v4 }
 0x1f8   : > { %v1797_v14 = vpop.f32.mrb[17].mxu1  ;;  %v4278_v7 = vpop.f32.mrb[16].mxu0  ;;  %v3282_v58 = vadd.f32 %v3281_v23, %v3280_v62  ;;  %v3381_v15 = vadd.f32 %v3380_v24, %v3379_v49  ;;  %v3075_v59 = vpack.c.bf16 %v4309_v16, %v4307_v52  ;;  %v3735_v45 = vpack.c.bf16 %v4309_v16, %v4309_v16 }
 0x1f9   : > { %v4143_v11 = vpop.f32.mrb[18].mxu1  ;;  %v2974_v31 = vpop.f32.mrb[17].mxu0  ;;  %3210 = vst.msk [vmem:[%s5248_s25 + $0x30] sm:$0xf] %vm3197_vm4, %v3734_v38  ;;  %v4310_v48 = vadd.f32 %v4278_v7, %v4142_v51  ;;  %3213 = vst.msk [vmem:[%s5248_s25 + $0x3c] sm:$0xf] %vm3197_vm4, %v3737_v29  ;;  %v3244_v5 = vunpack.c.l.bf16 %v3076_v53  ;;  %v3245_v61 = vunpack.c.h.bf16 %v3076_v53 }
 0x1fa   : > { %v4311_v9 = vadd.f32 %v2974_v31, %v1797_v14  ;;  %v1800_v55 = vpop.f32.mrb[19].mxu1  ;;  %v4279_v56 = vpop.f32.mrb[18].mxu0  ;;  %v3383_v0 = vadd.f32 %v3382_v19, %v3381_v15  ;;  %v3284_v6 = vadd.f32 %v3283_v57, %v3282_v58  ;;  %3211 = vst.msk [vmem:[%s5248_s25 + $0x34] sm:$0xf] %vm3197_vm4, %v3735_v45  ;;  %v3242_v12 = vunpack.c.l.bf16 %v3075_v59 }
 0x1fb   : > { %v2977_v8 = vpop.f32.mrb[19].mxu0  ;;  %v3243_v13 = vunpack.c.h.bf16 %v3075_v59  ;;  %v3740_v18 = vpack.c.bf16 %v4310_v48, %v4310_v48  ;;  %v3384_v28 = vsel %vm412_vm1, %v3342_v17, 0.0  ;;  %v3289_v2 = vsel %vm412_vm1, %v3244_v5, 0.0 }
 0x1fc   : > { %v3738_v27 = vpack.c.bf16 %v4311_v9, %v4311_v9  ;;  %v3345_v26 = vmul.f32 %v3244_v5, %v3244_v5  ;;  %v3291_v46 = vsel %vm412_vm1, %v3245_v61, 0.0  ;;  %v3285_v1 = vsel %vm412_vm1, %v3242_v12, 0.0 }
 0x1fd   : > { %v3343_v39 = vmul.f32 %v3242_v12, %v3242_v12  ;;  %v3344_v30 = vmul.f32 %v3243_v13, %v3243_v13  ;;  %3216 = vst.msk [vmem:[%s5248_s25 + $0x48] sm:$0xf] %vm3197_vm4, %v3740_v18  ;;  %v3346_v40 = vmul.f32 %v3245_v61, %v3245_v61  ;;  %v3286_v32 = vadd.f32 %v3285_v1, %v3284_v6 }
 0x1fe   : > { %3214 = vst.msk [vmem:[%s5248_s25 + $0x40] sm:$0xf] %vm3197_vm4, %v3738_v27  ;;  %v3287_v43 = vsel %vm412_vm1, %v3243_v13, 0.0  ;;  %v3385_v25 = vadd.f32 %v3384_v28, %v3383_v0  ;;  %v3390_v44 = vsel %vm412_vm1, %v3345_v26, 0.0  ;;  %v4312_v3 = vadd.f32 %v4279_v56, %v4143_v11 }
 0x1ff   : > { %v4146_v42 = vpop.f32.mrb[20].mxu1  ;;  %v3386_v54 = vsel %vm412_vm1, %v3343_v39, 0.0  ;;  %v4313_v41 = vadd.f32 %v2977_v8, %v1800_v55  ;;  %v3288_v37 = vadd.f32 %v3287_v43, %v3286_v32  ;;  %v3388_v63 = vsel %vm412_vm1, %v3344_v30, 0.0 }
 0x200   : > { %v1813_v60 = vpop.f32.mrb[21].mxu1  ;;  %v4282_v10 = vpop.f32.mrb[20].mxu0  ;;  %v3387_v47 = vadd.f32 %v3386_v54, %v3385_v25  ;;  %v3078_v23 = vpack.c.bf16 %v4312_v3, %v4310_v48  ;;  %v3741_v57 = vpack.c.bf16 %v4312_v3, %v4312_v3  ;;  %v3392_v58 = vsel %vm412_vm1, %v3346_v40, 0.0 }
 0x201   : > { %v4314_v20 = vadd.f32 %v4282_v10, %v4146_v42  ;;  %v4147_v21 = vpop.f32.mrb[22].mxu1  ;;  %v2990_v22 = vpop.f32.mrb[21].mxu0  ;;  %v3077_v33 = vpack.c.bf16 %v4313_v41, %v4311_v9  ;;  %v3739_v34 = vpack.c.bf16 %v4313_v41, %v4313_v41  ;;  %v3290_v35 = vadd.f32 %v3289_v2, %v3288_v37 }
 0x202   : > { %v1816_v36 = vpop.f32.mrb[23].mxu1  ;;  %v4283_v50 = vpop.f32.mrb[22].mxu0  ;;  %v3389_v52 = vadd.f32 %v3388_v63, %v3387_v47  ;;  %v4315_v49 = vadd.f32 %v2990_v22, %v1813_v60  ;;  %3217 = vst.msk [vmem:[%s5248_s25 + $0x4c] sm:$0xf] %vm3197_vm4, %v3741_v57  ;;  %v3248_v16 = vunpack.c.l.bf16 %v3078_v23  ;;  %v3249_v51 = vunpack.c.h.bf16 %v3078_v23 }
 0x203   : > { %v3744_v62 = vpack.c.bf16 %v4314_v20, %v4314_v20  ;;  %v2993_v4 = vpop.f32.mrb[23].mxu0  ;;  %3215 = vst.msk [vmem:[%s5248_s25 + $0x44] sm:$0xf] %vm3197_vm4, %v3739_v34  ;;  %v3246_v17 = vunpack.c.l.bf16 %v3077_v33  ;;  %v3247_v19 = vunpack.c.h.bf16 %v3077_v33  ;;  %v3292_v38 = vadd.f32 %v3291_v46, %v3290_v35 }
 0x204   : > { %v3391_v24 = vadd.f32 %v3390_v44, %v3389_v52  ;;  %v3742_v14 = vpack.c.bf16 %v4315_v49, %v4315_v49  ;;  %v4316_v7 = vadd.f32 %v4283_v50, %v4147_v21  ;;  %v3297_v15 = vsel %vm412_vm1, %v3248_v16, 0.0 }
 0x205   : > { %3220 = vst.msk [vmem:[%s5248_s25 + $0x58] sm:$0xf] %vm3197_vm4, %v3744_v62  ;;  %v3349_v53 = vmul.f32 %v3248_v16, %v3248_v16  ;;  %v3293_v29 = vsel %vm412_vm1, %v3246_v17, 0.0  ;;  %v3347_v11 = vmul.f32 %v3246_v17, %v3246_v17  ;;  %v3348_v31 = vmul.f32 %v3247_v19, %v3247_v19 }
 0x206   : > { %3218 = vst.msk [vmem:[%s5248_s25 + $0x50] sm:$0xf] %vm3197_vm4, %v3742_v14  ;;  %v3350_v45 = vmul.f32 %v3249_v51, %v3249_v51  ;;  %v3294_v48 = vadd.f32 %v3293_v29, %v3292_v38  ;;  %v3295_v9 = vsel %vm412_vm1, %v3247_v19, 0.0  ;;  %v3393_v55 = vadd.f32 %v3392_v58, %v3391_v24 }
 0x207   : > { %v4150_v59 = vpop.f32.mrb[24].mxu1  ;;  %v3394_v5 = vsel %vm412_vm1, %v3347_v11, 0.0  ;;  %v3396_v61 = vsel %vm412_vm1, %v3348_v31, 0.0  ;;  %v3080_v6 = vpack.c.bf16 %v4316_v7, %v4314_v20  ;;  %v3745_v8 = vpack.c.bf16 %v4316_v7, %v4316_v7 }
 0x208   : > { %v1829_v56 = vpop.f32.mrb[25].mxu1  ;;  %v4286_v0 = vpop.f32.mrb[24].mxu0  ;;  %v3296_v18 = vadd.f32 %v3295_v9, %v3294_v48  ;;  %v3395_v27 = vadd.f32 %v3394_v5, %v3393_v55  ;;  %v4317_v28 = vadd.f32 %v2993_v4, %v1816_v36  ;;  %v3299_v54 = vsel %vm412_vm1, %v3249_v51, 0.0 }
 0x209   : > { %v4151_v12 = vpop.f32.mrb[26].mxu1  ;;  %v3006_v13 = vpop.f32.mrb[25].mxu0  ;;  %v4318_v2 = vadd.f32 %v4286_v0, %v4150_v59  ;;  %3221 = vst.msk [vmem:[%s5248_s25 + $0x5c] sm:$0xf] %vm3197_vm4, %v3745_v8  ;;  %v3252_v1 = vunpack.c.l.bf16 %v3080_v6  ;;  %v3253_v39 = vunpack.c.h.bf16 %v3080_v6  ;;  %v3398_v3 = vsel %vm412_vm1, %v3349_v53, 0.0 }
 0x20a   : > { %v1832_v26 = vpop.f32.mrb[27].mxu1  ;;  %v4287_v46 = vpop.f32.mrb[26].mxu0  ;;  %v4319_v30 = vadd.f32 %v3006_v13, %v1829_v56  ;;  %v3298_v43 = vadd.f32 %v3297_v15, %v3296_v18  ;;  %v3397_v25 = vadd.f32 %v3396_v61, %v3395_v27  ;;  %v3079_v42 = vpack.c.bf16 %v4317_v28, %v4315_v49 }
 0x20b   : > { %v4320_v40 = vadd.f32 %v4287_v46, %v4151_v12  ;;  %v3009_v32 = vpop.f32.mrb[27].mxu0  ;;  %v3743_v44 = vpack.c.bf16 %v4317_v28, %v4317_v28  ;;  %v3400_v41 = vsel %vm412_vm1, %v3350_v45, 0.0  ;;  %v3305_v63 = vsel %vm412_vm1, %v3252_v1, 0.0 }
 0x20c   : > { %v3399_v60 = vadd.f32 %v3398_v3, %v3397_v25  ;;  %v3250_v10 = vunpack.c.l.bf16 %v3079_v42  ;;  %v3251_v37 = vunpack.c.h.bf16 %v3079_v42  ;;  %v3300_v47 = vadd.f32 %v3299_v54, %v3298_v43 }
 0x20d   : > { %3219 = vst.msk [vmem:[%s5248_s25 + $0x54] sm:$0xf] %vm3197_vm4, %v3743_v44  ;;  %v3353_v20 = vmul.f32 %v3252_v1, %v3252_v1  ;;  %v3748_v21 = vpack.c.bf16 %v4318_v2, %v4318_v2  ;;  %v3746_v22 = vpack.c.bf16 %v4319_v30, %v4319_v30  ;;  %v3354_v57 = vmul.f32 %v3253_v39, %v3253_v39 }
 0x20e   : > { %v3301_v33 = vsel %vm412_vm1, %v3250_v10, 0.0  ;;  %v3351_v34 = vmul.f32 %v3250_v10, %v3250_v10  ;;  %v3352_v36 = vmul.f32 %v3251_v37, %v3251_v37  ;;  %v3401_v62 = vadd.f32 %v3400_v41, %v3399_v60 }
 0x20f   : > { %v4154_v23 = vpop.f32.mrb[28].mxu1  ;;  %v3302_v52 = vadd.f32 %v3301_v33, %v3300_v47  ;;  %3224 = vst.msk [vmem:[%s5248_s25 + $0x68] sm:$0xf] %vm3197_vm4, %v3748_v21  ;;  %3222 = vst.msk [vmem:[%s5248_s25 + $0x60] sm:$0xf] %vm3197_vm4, %v3746_v22  ;;  %v3082_v49 = vpack.c.bf16 %v4320_v40, %v4318_v2  ;;  %v3749_v4 = vpack.c.bf16 %v4320_v40, %v4320_v40  ;;  %v3303_v17 = vsel %vm412_vm1, %v3251_v37, 0.0 }
 0x210   : > { %v1845_v50 = vpop.f32.mrb[29].mxu1  ;;  %v4290_v35 = vpop.f32.mrb[28].mxu0  ;;  %v3402_v19 = vsel %vm412_vm1, %v3351_v34, 0.0  ;;  %v4321_v24 = vadd.f32 %v3009_v32, %v1832_v26  ;;  %v3404_v53 = vsel %vm412_vm1, %v3352_v36, 0.0  ;;  %v3307_v56 = vsel %vm412_vm1, %v3253_v39, 0.0 }
 0x211   : > { %v4155_v16 = vpop.f32.mrb[30].mxu1  ;;  %v3022_v51 = vpop.f32.mrb[29].mxu0  ;;  %v4322_v38 = vadd.f32 %v4290_v35, %v4154_v23  ;;  %v3304_v58 = vadd.f32 %v3303_v17, %v3302_v52  ;;  %v3403_v15 = vadd.f32 %v3402_v19, %v3401_v62  ;;  %3225 = vst.msk [vmem:[%s5248_s25 + $0x6c] sm:$0xf] %vm3197_vm4, %v3749_v4  ;;  %v3256_v29 = vunpack.c.l.bf16 %v3082_v49 }
 0x212   : > { %v1848_v14 = vpop.f32.mrb[31].mxu1  ;;  %v4291_v7 = vpop.f32.mrb[30].mxu0  ;;  %v3081_v31 = vpack.c.bf16 %v4321_v24, %v4319_v30  ;;  %v3747_v59 = vpack.c.bf16 %v4321_v24, %v4321_v24  ;;  %v4323_v48 = vadd.f32 %v3022_v51, %v1845_v50  ;;  %v3406_v0 = vsel %vm412_vm1, %v3353_v20, 0.0 }
 0x213   : > { %v3025_v11 = vpop.f32.mrb[31].mxu0  ;;  %v3752_v45 = vpack.c.bf16 %v4322_v38, %v4322_v38  ;;  %v3306_v9 = vadd.f32 %v3305_v63, %v3304_v58  ;;  %v3405_v55 = vadd.f32 %v3404_v53, %v3403_v15  ;;  %v4324_v13 = vadd.f32 %v4291_v7, %v4155_v16 }
 0x214   : > { %3223 = vst.msk [vmem:[%s5248_s25 + $0x64] sm:$0xf] %vm3197_vm4, %v3747_v59  ;;  %v3254_v5 = vunpack.c.l.bf16 %v3081_v31  ;;  %v3255_v61 = vunpack.c.h.bf16 %v3081_v31  ;;  %v3750_v12 = vpack.c.bf16 %v4323_v48, %v4323_v48  ;;  %v3408_v18 = vsel %vm412_vm1, %v3354_v57, 0.0 }
 0x215   : > { %3228 = vst.msk [vmem:[%s5248_s25 + $0x78] sm:$0xf] %vm3197_vm4, %v3752_v45  ;;  %v3407_v6 = vadd.f32 %v3406_v0, %v3405_v55  ;;  %v3308_v8 = vadd.f32 %v3307_v56, %v3306_v9  ;;  %v3257_v27 = vunpack.c.h.bf16 %v3082_v49  ;;  %v3357_v28 = vmul.f32 %v3256_v29, %v3256_v29 }
 0x216   : > { %v3309_v2 = vsel %vm412_vm1, %v3254_v5, 0.0  ;;  %v3355_v46 = vmul.f32 %v3254_v5, %v3254_v5  ;;  %v3356_v1 = vmul.f32 %v3255_v61, %v3255_v61  ;;  %3226 = vst.msk [vmem:[%s5248_s25 + $0x70] sm:$0xf] %vm3197_vm4, %v3750_v12  ;;  %v3311_v30 = vsel %vm412_vm1, %v3255_v61, 0.0 }
 0x217   : > { %v3310_v26 = vadd.f32 %v3309_v2, %v3308_v8  ;;  %v3409_v39 = vadd.f32 %v3408_v18, %v3407_v6  ;;  %v3084_v40 = vpack.c.bf16 %v4324_v13, %v4322_v38  ;;  %v3753_v32 = vpack.c.bf16 %v4324_v13, %v4324_v13 }
 0x218   : > { %v4325_v43 = vadd.f32 %v3025_v11, %v1848_v14  ;;  %v3410_v42 = vsel %vm412_vm1, %v3355_v46, 0.0  ;;  %v3313_v44 = vsel %vm412_vm1, %v3256_v29, 0.0  ;;  %v3358_v41 = vmul.f32 %v3257_v27, %v3257_v27 }
 0x219   : > { %v3312_v25 = vadd.f32 %v3311_v30, %v3310_v26  ;;  %v3411_v54 = vadd.f32 %v3410_v42, %v3409_v39  ;;  %3229 = vst.msk [vmem:[%s5248_s25 + $0x7c] sm:$0xf] %vm3197_vm4, %v3753_v32  ;;  %v3412_v10 = vsel %vm412_vm1, %v3356_v1, 0.0  ;;  %v3315_v47 = vsel %vm412_vm1, %v3257_v27, 0.0 }
 0x21a   : > { %v3083_v3 = vpack.c.bf16 %v4325_v43, %v4323_v48  ;;  %v3751_v37 = vpack.c.bf16 %v4325_v43, %v4325_v43  ;;  %v3414_v63 = vsel %vm412_vm1, %v3357_v28, 0.0  ;;  %v3260_v21 = vunpack.c.l.bf16 %v3084_v40 }
 0x21b   : > { %v3314_v60 = vadd.f32 %v3313_v44, %v3312_v25  ;;  %v3413_v20 = vadd.f32 %v3412_v10, %v3411_v54  ;;  %v3416_v34 = vsel %vm412_vm1, %v3358_v41, 0.0  ;;  %v3261_v36 = vunpack.c.h.bf16 %v3084_v40 }
 0x21c   : > { %3227 = vst.msk [vmem:[%s5248_s25 + $0x74] sm:$0xf] %vm3197_vm4, %v3751_v37  ;;  %v3258_v22 = vunpack.c.l.bf16 %v3083_v3  ;;  %v3259_v23 = vunpack.c.h.bf16 %v3083_v3  ;;  %v3361_v4 = vmul.f32 %v3260_v21, %v3260_v21  ;;  %v3321_v24 = vsel %vm412_vm1, %v3260_v21, 0.0 }
 0x21d   : > { %v3316_v57 = vadd.f32 %v3315_v47, %v3314_v60  ;;  %v3415_v33 = vadd.f32 %v3414_v63, %v3413_v20  ;;  %v3362_v38 = vmul.f32 %v3261_v36, %v3261_v36  ;;  %v3323_v15 = vsel %vm412_vm1, %v3261_v36, 0.0 }
 0x21e   : > { %v3317_v50 = vsel %vm412_vm1, %v3258_v22, 0.0  ;;  %v3359_v35 = vmul.f32 %v3258_v22, %v3258_v22  ;;  %v3360_v62 = vmul.f32 %v3259_v23, %v3259_v23  ;;  %v3319_v16 = vsel %vm412_vm1, %v3259_v23, 0.0 }
 0x21f   : > { %v3318_v52 = vadd.f32 %v3317_v50, %v3316_v57  ;;  %v3417_v49 = vadd.f32 %v3416_v34, %v3415_v33  ;;  %v3422_v53 = vsel %vm412_vm1, %v3361_v4, 0.0  ;;  %v3424_v31 = vsel %vm412_vm1, %v3362_v38, 0.0 }
 0x220   : > { %v3418_v51 = vsel %vm412_vm1, %v3359_v35, 0.0  ;;  %v3420_v14 = vsel %vm412_vm1, %v3360_v62, 0.0 }
 0x221   : > { %v3320_v17 = vadd.f32 %v3319_v16, %v3318_v52  ;;  %v3419_v19 = vadd.f32 %v3418_v51, %v3417_v49 }
 0x223   : > { %v3322_v7 = vadd.f32 %v3321_v24, %v3320_v17  ;;  %v3421_v58 = vadd.f32 %v3420_v14, %v3419_v19 }
 0x225   : > { %v3324_v29 = vadd.f32 %v3323_v15, %v3322_v7  ;;  %v3423_v11 = vadd.f32 %v3422_v53, %v3421_v58 }
 0x227   : > { %v3325_v59 = vrot.slane %v3324_v29, 4  ;;  %v3425_v45 = vadd.f32 %v3424_v31, %v3423_v11 }
 0x229   : > { %v3326_v48 = vadd.f32 %v3325_v59, %v3324_v29  ;;  %v3426_v9 = vrot.slane %v3425_v45, 4 }
 0x22b   : > { %v3327_v55 = vrot.slane %v3326_v48, 2  ;;  %v3427_v56 = vadd.f32 %v3426_v9, %v3425_v45 }
 0x22d   : > { %v3328_v0 = vadd.f32 %v3327_v55, %v3326_v48  ;;  %v3428_v5 = vrot.slane %v3427_v56, 2 }
 0x22f   : > { %v3329_v61 = vrot.slane %v3328_v0, 1  ;;  %v3429_v6 = vadd.f32 %v3428_v5, %v3427_v56 }
 0x231   : > { %v3430_v8 = vrot.slane %v3429_v6, 1  ;;  %v3330_v12 = vadd.f32 %v3329_v61, %v3328_v0 }
 0x233   : > { %v3431_v13 = vadd.f32 %v3430_v8, %v3429_v6 }
 0x235   : > { %v3433_v18 = vsel %vm3432_vm5, %v3330_v12, %v3431_v13 }
 0x236   : > { %v3434_v27 = vsel %vm633_vm0, %v3433_v18, 0.0 }
 0x237   : > { %3435 = vst.msk [vmem:[%s235_s29] sm:$0xff] %vm412_vm1, %v3434_v27 }
 0x238 PF: > { %s16_s18 = sadd.s32 1, %s4575_s18  }
 0x239   : > { %p13_p4 = scmp.ge.s32.totalorder %s16_s18, 4  }
 0x23b   :  { %15 = sbr.rel (!%p13_p4) target bundleno = 1 (0x1), region = 89 }

// kernel: preact_bottleneck.7
= control target key start
LH: loop header
LB: loop body
LE: loop exit
PB: predicated region body
PF: predicated region fallthrough
CT: control target
= control target key end

     0   :  { %vm861_vm0 = vcmask 1041408   ;;  %vm764_vm1 = vcmask 31744   ;;  %vm1542_vm2 = vcmask 130048   ;;  %s3124_s7 = inlined_call_operand.vmem [shape: bf16[4,16], index: 7, kind: input, shape index: {}]   ;;  %s3125_s3 = inlined_call_operand.vmem [shape: bf16[4,16], index: 3, kind: input, shape index: {}]   ;;  %s3126_s4 = inlined_call_operand.vmem [shape: bf16[512,4], index: 4, kind: input, shape index: {}]   ;;  %s3127_s5 = inlined_call_operand.vmem [shape: f32[1,4], index: 5, kind: input, shape index: {}]   ;;  %s3128_s6 = inlined_call_operand.vmem [shape: f32[1,4], index: 6, kind: input, shape index: {}]   ;;  %s3129_s0 = inlined_call_operand.vmem [shape: bf16[512,4], index: 0, kind: input, shape index: {}]   ;;  %s3130_s1 = inlined_call_operand.vmem [shape: f32[1,4], index: 1, kind: input, shape index: {}]   ;;  %s3131_s2 = inlined_call_operand.vmem [shape: f32[1,4], index: 2, kind: input, shape index: {}]   ;;  %s3132_s8 = inlined_call_operand.vmem [shape: f32[512,16], index: 8, kind: output, shape index: {}]  }
   0x1   :  { %v763_v0 = vld [vmem:[%s3124_s7] sm:$0x3]  ;;  %v1966_v15 = vld [vmem:[%s3126_s4 + $0x8] sm:$0xff]   ;;  %v1967_v30 = vld [vmem:[%s3126_s4 + $0x10] sm:$0xff]  }
   0x2   :  { %v396_v1 = vld [vmem:[%s3125_s3] sm:$0x3]  ;;  %2259 = vmatprep.subr.msk.bf16.mxu1 %vm861_vm0, %v763_v0  ;;  %v863_v3 = vsel %vm861_vm0, %v763_v0, 0  ;;  %v1935_v16 = vld [vmem:[%s3129_s0 + $0x8] sm:$0xff]   ;;  %v1813_v18 = vunpack.c.l.bf16 %v1966_v15  ;;  %v1814_v19 = vunpack.c.h.bf16 %v1966_v15  ;;  %v1936_v39 = vld [vmem:[%s3129_s0 + $0x10] sm:$0xff]   ;;  %v1817_v43 = vunpack.c.l.bf16 %v1967_v30 }
   0x3   :  { %v1808_v2 = vld [vmem:[%s3126_s4] sm:$0xff]   ;;  %2260 = vmatprep.subr.msk.bf16.mxu0 %vm861_vm0, %v396_v1  ;;  %v1251_v4 = vsel %vm861_vm0, %v396_v1, 0  ;;  %2064 = vmatpush3.bf16.msra.mxu1 %v863_v3  ;;  %v1685_v20 = vunpack.c.l.bf16 %v1935_v16  ;;  %v1686_v21 = vunpack.c.h.bf16 %v1935_v16  ;;  %v1968_v44 = vld [vmem:[%s3126_s4 + $0x18] sm:$0xff]   ;;  %v1818_v50 = vunpack.c.h.bf16 %v1967_v30 }
   0x4   :  { %v1809_v5 = vunpack.c.l.bf16 %v1808_v2  ;;  %v1810_v6 = vunpack.c.h.bf16 %v1808_v2  ;;  %v2322_v7 = vld [vmem:[%s3127_s5] ss:$0 sm:$0xff]  ;;  %2130 = vmatpush3.bf16.msra.mxu0 %v1251_v4  ;;  %v1689_v52 = vunpack.c.l.bf16 %v1936_v39  ;;  %v1937_v53 = vld [vmem:[%s3129_s0 + $0x18] sm:$0xff]   ;;  %v1690_v56 = vunpack.c.h.bf16 %v1936_v39 }
   0x5   :  { %v2327_v8 = vld [vmem:[%s3128_s6] ss:$0 sm:$0xff]  ;;  %v534_v26 = vmul.f32 %v1813_v18, %v2322_v7  ;;  %v535_v27 = vmul.f32 %v1814_v19, %v2322_v7  ;;  %v536_v51 = vmul.f32 %v1817_v43, %v2322_v7  ;;  %v1821_v57 = vunpack.c.l.bf16 %v1968_v44 }
   0x6   :  { %v1680_v9 = vld [vmem:[%s3129_s0] sm:$0xff]   ;;  %v532_v11 = vmul.f32 %v1809_v5, %v2322_v7  ;;  %v533_v12 = vmul.f32 %v1810_v6, %v2322_v7  ;;  %v537_v58 = vmul.f32 %v1818_v50, %v2322_v7  ;;  %v1822_v61 = vunpack.c.h.bf16 %v1968_v44 }
   0x7   :  { %v2335_v10 = vld [vmem:[%s3130_s1] ss:$0 sm:$0xff]  ;;  %v1681_v13 = vunpack.c.l.bf16 %v1680_v9  ;;  %v1682_v14 = vunpack.c.h.bf16 %v1680_v9  ;;  %v605_v35 = vadd.f32 %v2327_v8, %v534_v26  ;;  %v606_v36 = vadd.f32 %v2327_v8, %v535_v27 }
   0x8   :  { %v2348_v17 = vld [vmem:[%s3131_s2] ss:$0 sm:$0xff]  ;;  %v603_v22 = vadd.f32 %v2327_v8, %v532_v11  ;;  %v604_v23 = vadd.f32 %v2327_v8, %v533_v12  ;;  %v167_v28 = vmul.f32 %v1685_v20, %v2335_v10  ;;  %v168_v29 = vmul.f32 %v1686_v21, %v2335_v10 }
   0x9   :  { %v165_v24 = vmul.f32 %v1681_v13, %v2335_v10  ;;  %v166_v25 = vmul.f32 %v1682_v14, %v2335_v10  ;;  %v669_v45 = vmax.f32 %v605_v35, 0.0  ;;  %v670_v46 = vmax.f32 %v606_v36, 0.0  ;;  %v1969_v2 = vld [vmem:[%s3126_s4 + $0x20] sm:$0xff]  }
   0xa   :  { %v667_v31 = vmax.f32 %v603_v22, 0.0  ;;  %v668_v32 = vmax.f32 %v604_v23, 0.0  ;;  %v238_v37 = vadd.f32 %v2348_v17, %v167_v28  ;;  %v239_v38 = vadd.f32 %v2348_v17, %v168_v29  ;;  %v1938_v19 = vld [vmem:[%s3129_s0 + $0x20] sm:$0xff]   ;;  %v1970_v28 = vld [vmem:[%s3126_s4 + $0x28] sm:$0xff]  }
   0xb   :  { %v236_v33 = vadd.f32 %v2348_v17, %v165_v24  ;;  %v237_v34 = vadd.f32 %v2348_v17, %v166_v25  ;;  %v732_v54 = vpack.c.bf16 %v670_v46, %v669_v45  ;;  %v607_v59 = vadd.f32 %v2327_v8, %v536_v51 }
   0xc   :  { %v731_v40 = vpack.c.bf16 %v668_v32, %v667_v31  ;;  %v302_v47 = vmax.f32 %v238_v37, 0.0  ;;  %v303_v48 = vmax.f32 %v239_v38, 0.0  ;;  %v169_v60 = vmul.f32 %v1689_v52, %v2335_v10 }
   0xd   :  { %v300_v41 = vmax.f32 %v236_v33, 0.0  ;;  %v301_v42 = vmax.f32 %v237_v34, 0.0  ;;  %v170_v62 = vmul.f32 %v1690_v56, %v2335_v10  ;;  %v538_v63 = vmul.f32 %v1821_v57, %v2322_v7  ;;  %v1939_v33 = vld [vmem:[%s3129_s0 + $0x28] sm:$0xff]  }
   0xe   :  { %2065 = vmatprep.mubr.msk.bf16.mxu1 %vm764_vm1, %v731_v40  ;;  %v365_v55 = vpack.c.bf16 %v303_v48, %v302_v47  ;;  %v1693_v0 = vunpack.c.l.bf16 %v1937_v53  ;;  %v1694_v1 = vunpack.c.h.bf16 %v1937_v53  ;;  %v608_v3 = vadd.f32 %v2327_v8, %v537_v58 }
   0xf   :  { %v364_v49 = vpack.c.bf16 %v301_v42, %v300_v41  ;;  %2066 = vmatmul.mubr.msk.bf16.vlgmr.msra.gmra.mrb[0].mxu1 %vm764_vm1, %v732_v54  ;;  %v671_v4 = vmax.f32 %v607_v59, 0.0  ;;  %v240_v5 = vadd.f32 %v2348_v17, %v169_v60  ;;  %v539_v6 = vmul.f32 %v1822_v61, %v2322_v7  ;;  %v1971_v42 = vld [vmem:[%s3126_s4 + $0x30] sm:$0xff]  }
  0x10   :  { %v241_v9 = vadd.f32 %v2348_v17, %v170_v62  ;;  %v609_v11 = vadd.f32 %v2327_v8, %v538_v63  ;;  %v171_v12 = vmul.f32 %v1693_v0, %v2335_v10  ;;  %v172_v13 = vmul.f32 %v1694_v1, %v2335_v10  ;;  %v1940_v59 = vld [vmem:[%s3129_s0 + $0x30] sm:$0xff]  }
  0x11   :  { %2131 = vmatprep.mubr.msk.bf16.mxu0 %vm764_vm1, %v364_v49  ;;  %v672_v14 = vmax.f32 %v608_v3, 0.0  ;;  %v304_v15 = vmax.f32 %v240_v5, 0.0  ;;  %v610_v16 = vadd.f32 %v2327_v8, %v539_v6  ;;  %v1825_v18 = vunpack.c.l.bf16 %v1969_v2 }
  0x12   :  { %2132 = vmatmul.mubr.msk.bf16.vlgmr.msra.gmra.mrb[0].mxu0 %vm764_vm1, %v365_v55  ;;  %v305_v20 = vmax.f32 %v241_v9, 0.0  ;;  %v673_v21 = vmax.f32 %v609_v11, 0.0  ;;  %v242_v22 = vadd.f32 %v2348_v17, %v171_v12  ;;  %v243_v23 = vadd.f32 %v2348_v17, %v172_v13  ;;  %v1941_v12 = vld [vmem:[%s3129_s0 + $0x38] sm:$0xff]  }
  0x13   :  { %v733_v24 = vpack.c.bf16 %v672_v14, %v671_v4  ;;  %v674_v25 = vmax.f32 %v610_v16, 0.0  ;;  %v1826_v26 = vunpack.c.h.bf16 %v1969_v2  ;;  %v540_v27 = vmul.f32 %v1825_v18, %v2322_v7  ;;  %v1972_v4 = vld [vmem:[%s3126_s4 + $0x38] sm:$0xff]  }
  0x14   :  { %v366_v29 = vpack.c.bf16 %v305_v20, %v304_v15  ;;  %v306_v30 = vmax.f32 %v242_v22, 0.0  ;;  %v307_v31 = vmax.f32 %v243_v23, 0.0  ;;  %v1697_v32 = vunpack.c.l.bf16 %v1938_v19  ;;  %v1973_v22 = vld [vmem:[%s3126_s4 + $0x40] sm:$0xff]  }
  0x15   :  { %2069 = vmatprep.mubr.msk.bf16.mxu1 %vm764_vm1, %v733_v24  ;;  %v734_v34 = vpack.c.bf16 %v674_v25, %v673_v21  ;;  %v541_v35 = vmul.f32 %v1826_v26, %v2322_v7  ;;  %v611_v36 = vadd.f32 %v2327_v8, %v540_v27  ;;  %v1698_v37 = vunpack.c.h.bf16 %v1938_v19 }
  0x16   :  { %2135 = vmatprep.mubr.msk.bf16.mxu0 %vm764_vm1, %v366_v29  ;;  %v367_v38 = vpack.c.bf16 %v307_v31, %v306_v30  ;;  %v173_v39 = vmul.f32 %v1697_v32, %v2335_v10  ;;  %v1829_v40 = vunpack.c.l.bf16 %v1970_v28  ;;  %v1830_v41 = vunpack.c.h.bf16 %v1970_v28 }
  0x17   :  { %2070 = vmatmul.mubr.msk.bf16.gmra.mrb[4].mxu1 %vm764_vm1, %v734_v34  ;;  %v612_v43 = vadd.f32 %v2327_v8, %v541_v35  ;;  %v675_v44 = vmax.f32 %v611_v36, 0.0  ;;  %v174_v45 = vmul.f32 %v1698_v37, %v2335_v10  ;;  %v1701_v46 = vunpack.c.l.bf16 %v1939_v33  ;;  %v1942_v35 = vld [vmem:[%s3129_s0 + $0x40] sm:$0xff]  }
  0x18   :  { %v244_v47 = vadd.f32 %v2348_v17, %v173_v39  ;;  %v542_v48 = vmul.f32 %v1829_v40, %v2322_v7  ;;  %v543_v49 = vmul.f32 %v1830_v41, %v2322_v7  ;;  %v1702_v50 = vunpack.c.h.bf16 %v1939_v33 }
  0x19   :  { %v676_v51 = vmax.f32 %v612_v43, 0.0  ;;  %v245_v52 = vadd.f32 %v2348_v17, %v174_v45  ;;  %v175_v53 = vmul.f32 %v1701_v46, %v2335_v10  ;;  %v1833_v54 = vunpack.c.l.bf16 %v1971_v42 }
  0x1a   :  { %2136 = vmatmul.mubr.msk.bf16.gmra.mrb[4].mxu0 %vm764_vm1, %v367_v38  ;;  %v308_v55 = vmax.f32 %v244_v47, 0.0  ;;  %v613_v56 = vadd.f32 %v2327_v8, %v542_v48  ;;  %v614_v57 = vadd.f32 %v2327_v8, %v543_v49  ;;  %v176_v58 = vmul.f32 %v1702_v50, %v2335_v10  ;;  %v1974_v48 = vld [vmem:[%s3126_s4 + $0x48] sm:$0xff]  }
  0x1b   :  { %v735_v60 = vpack.c.bf16 %v676_v51, %v675_v44  ;;  %v309_v61 = vmax.f32 %v245_v52, 0.0  ;;  %v246_v62 = vadd.f32 %v2348_v17, %v175_v53  ;;  %v1834_v63 = vunpack.c.h.bf16 %v1971_v42  ;;  %v1943_v53 = vld [vmem:[%s3129_s0 + $0x48] sm:$0xff]  }
  0x1c   :  { %v677_v0 = vmax.f32 %v613_v56, 0.0  ;;  %v678_v1 = vmax.f32 %v614_v57, 0.0  ;;  %v247_v2 = vadd.f32 %v2348_v17, %v176_v58  ;;  %v544_v3 = vmul.f32 %v1833_v54, %v2322_v7 }
  0x1d   :  { %2073 = vmatprep.mubr.msk.bf16.mxu1 %vm764_vm1, %v735_v60  ;;  %v368_v5 = vpack.c.bf16 %v309_v61, %v308_v55  ;;  %v310_v6 = vmax.f32 %v246_v62, 0.0  ;;  %v545_v9 = vmul.f32 %v1834_v63, %v2322_v7  ;;  %v1705_v11 = vunpack.c.l.bf16 %v1940_v59 }
  0x1e   :  { %v736_v13 = vpack.c.bf16 %v678_v1, %v677_v0  ;;  %v311_v14 = vmax.f32 %v247_v2, 0.0  ;;  %v615_v15 = vadd.f32 %v2327_v8, %v544_v3  ;;  %v1706_v16 = vunpack.c.h.bf16 %v1940_v59  ;;  %v1975_v2 = vld [vmem:[%s3126_s4 + $0x50] sm:$0xff]  }
  0x1f   :  { %2139 = vmatprep.mubr.msk.bf16.mxu0 %vm764_vm1, %v368_v5  ;;  %v616_v18 = vadd.f32 %v2327_v8, %v545_v9  ;;  %v177_v19 = vmul.f32 %v1705_v11, %v2335_v10  ;;  %v1837_v20 = vunpack.c.l.bf16 %v1972_v4  ;;  %v1838_v21 = vunpack.c.h.bf16 %v1972_v4 }
  0x20   :  { %2074 = vmatmul.mubr.msk.bf16.gmra.mrb[8].mxu1 %vm764_vm1, %v736_v13  ;;  %v369_v23 = vpack.c.bf16 %v311_v14, %v310_v6  ;;  %v679_v24 = vmax.f32 %v615_v15, 0.0  ;;  %v178_v25 = vmul.f32 %v1706_v16, %v2335_v10  ;;  %v1709_v26 = vunpack.c.l.bf16 %v1941_v12  ;;  %v1944_v14 = vld [vmem:[%s3129_s0 + $0x50] sm:$0xff]  }
  0x21   :  { %v680_v27 = vmax.f32 %v616_v18, 0.0  ;;  %v248_v28 = vadd.f32 %v2348_v17, %v177_v19  ;;  %v546_v29 = vmul.f32 %v1837_v20, %v2322_v7  ;;  %v547_v30 = vmul.f32 %v1838_v21, %v2322_v7 }
  0x22   :  { %2140 = vmatmul.mubr.msk.bf16.gmra.mrb[8].mxu0 %vm764_vm1, %v369_v23  ;;  %v249_v31 = vadd.f32 %v2348_v17, %v178_v25  ;;  %v1710_v32 = vunpack.c.h.bf16 %v1941_v12  ;;  %v179_v33 = vmul.f32 %v1709_v26, %v2335_v10  ;;  %v1841_v34 = vunpack.c.l.bf16 %v1973_v22 }
  0x23   :  { %v737_v36 = vpack.c.bf16 %v680_v27, %v679_v24  ;;  %v312_v37 = vmax.f32 %v248_v28, 0.0  ;;  %v617_v38 = vadd.f32 %v2327_v8, %v546_v29  ;;  %v618_v39 = vadd.f32 %v2327_v8, %v547_v30  ;;  %v1976_v28 = vld [vmem:[%s3126_s4 + $0x58] sm:$0xff]  }
  0x24   :  { %v313_v40 = vmax.f32 %v249_v31, 0.0  ;;  %v180_v41 = vmul.f32 %v1710_v32, %v2335_v10  ;;  %v250_v42 = vadd.f32 %v2348_v17, %v179_v33  ;;  %v1842_v43 = vunpack.c.h.bf16 %v1973_v22  ;;  %v1945_v33 = vld [vmem:[%s3129_s0 + $0x58] sm:$0xff]  }
  0x25   :  { %2077 = vmatprep.mubr.msk.bf16.mxu1 %vm764_vm1, %v737_v36  ;;  %v681_v44 = vmax.f32 %v617_v38, 0.0  ;;  %v682_v45 = vmax.f32 %v618_v39, 0.0  ;;  %v548_v46 = vmul.f32 %v1841_v34, %v2322_v7  ;;  %v1713_v47 = vunpack.c.l.bf16 %v1942_v35 }
  0x26   :  { %v370_v49 = vpack.c.bf16 %v313_v40, %v312_v37  ;;  %v251_v50 = vadd.f32 %v2348_v17, %v180_v41  ;;  %v314_v51 = vmax.f32 %v250_v42, 0.0  ;;  %v549_v52 = vmul.f32 %v1842_v43, %v2322_v7 }
  0x27   :  { %v738_v54 = vpack.c.bf16 %v682_v45, %v681_v44  ;;  %v619_v55 = vadd.f32 %v2327_v8, %v548_v46  ;;  %v1714_v56 = vunpack.c.h.bf16 %v1942_v35  ;;  %v181_v57 = vmul.f32 %v1713_v47, %v2335_v10  ;;  %v1977_v46 = vld [vmem:[%s3126_s4 + $0x60] sm:$0xff]  }
  0x28   :  { %2143 = vmatprep.mubr.msk.bf16.mxu0 %vm764_vm1, %v370_v49  ;;  %v315_v58 = vmax.f32 %v251_v50, 0.0  ;;  %v620_v59 = vadd.f32 %v2327_v8, %v549_v52  ;;  %v1845_v60 = vunpack.c.l.bf16 %v1974_v48  ;;  %v1846_v61 = vunpack.c.h.bf16 %v1974_v48 }
  0x29   :  { %2078 = vmatmul.mubr.msk.bf16.gmra.mrb[12].mxu1 %vm764_vm1, %v738_v54  ;;  %v683_v62 = vmax.f32 %v619_v55, 0.0  ;;  %v182_v63 = vmul.f32 %v1714_v56, %v2335_v10  ;;  %v252_v0 = vadd.f32 %v2348_v17, %v181_v57  ;;  %v1717_v1 = vunpack.c.l.bf16 %v1943_v53  ;;  %v1946_v55 = vld [vmem:[%s3129_s0 + $0x60] sm:$0xff]  }
  0x2a   :  { %v371_v3 = vpack.c.bf16 %v315_v58, %v314_v51  ;;  %v684_v4 = vmax.f32 %v620_v59, 0.0  ;;  %v550_v5 = vmul.f32 %v1845_v60, %v2322_v7  ;;  %v551_v6 = vmul.f32 %v1846_v61, %v2322_v7 }
  0x2b   :  { %v253_v9 = vadd.f32 %v2348_v17, %v182_v63  ;;  %v316_v11 = vmax.f32 %v252_v0, 0.0  ;;  %v1718_v12 = vunpack.c.h.bf16 %v1943_v53  ;;  %v183_v13 = vmul.f32 %v1717_v1, %v2335_v10 }
  0x2c   :  { %2144 = vmatmul.mubr.msk.bf16.gmra.mrb[12].mxu0 %vm764_vm1, %v371_v3  ;;  %v739_v15 = vpack.c.bf16 %v684_v4, %v683_v62  ;;  %v621_v16 = vadd.f32 %v2327_v8, %v550_v5  ;;  %v622_v18 = vadd.f32 %v2327_v8, %v551_v6  ;;  %v1849_v19 = vunpack.c.l.bf16 %v1975_v2  ;;  %v1978_v4 = vld [vmem:[%s3126_s4 + $0x68] sm:$0xff]  }
  0x2d   :  { %v317_v20 = vmax.f32 %v253_v9, 0.0  ;;  %v184_v21 = vmul.f32 %v1718_v12, %v2335_v10  ;;  %v254_v22 = vadd.f32 %v2348_v17, %v183_v13  ;;  %v1850_v23 = vunpack.c.h.bf16 %v1975_v2  ;;  %v1947_v12 = vld [vmem:[%s3129_s0 + $0x68] sm:$0xff]  }
  0x2e   :  { %2081 = vmatprep.mubr.msk.bf16.mxu1 %vm764_vm1, %v739_v15  ;;  %v685_v24 = vmax.f32 %v621_v16, 0.0  ;;  %v686_v25 = vmax.f32 %v622_v18, 0.0  ;;  %v552_v26 = vmul.f32 %v1849_v19, %v2322_v7  ;;  %v1721_v27 = vunpack.c.l.bf16 %v1944_v14 }
  0x2f   :  { %v372_v29 = vpack.c.bf16 %v317_v20, %v316_v11  ;;  %v255_v30 = vadd.f32 %v2348_v17, %v184_v21  ;;  %v318_v31 = vmax.f32 %v254_v22, 0.0  ;;  %v553_v32 = vmul.f32 %v1850_v23, %v2322_v7 }
  0x30   :  { %v740_v34 = vpack.c.bf16 %v686_v25, %v685_v24  ;;  %v623_v35 = vadd.f32 %v2327_v8, %v552_v26  ;;  %v1722_v36 = vunpack.c.h.bf16 %v1944_v14  ;;  %v185_v37 = vmul.f32 %v1721_v27, %v2335_v10  ;;  %v1979_v26 = vld [vmem:[%s3126_s4 + $0x70] sm:$0xff]  }
  0x31   :  { %2147 = vmatprep.mubr.msk.bf16.mxu0 %vm764_vm1, %v372_v29  ;;  %v319_v38 = vmax.f32 %v255_v30, 0.0  ;;  %v624_v39 = vadd.f32 %v2327_v8, %v553_v32  ;;  %v1853_v40 = vunpack.c.l.bf16 %v1976_v28  ;;  %v1854_v41 = vunpack.c.h.bf16 %v1976_v28 }
  0x32   :  { %2082 = vmatmul.mubr.msk.bf16.gmra.mrb[16].mxu1 %vm764_vm1, %v740_v34  ;;  %v687_v42 = vmax.f32 %v623_v35, 0.0  ;;  %v186_v43 = vmul.f32 %v1722_v36, %v2335_v10  ;;  %v256_v44 = vadd.f32 %v2348_v17, %v185_v37  ;;  %v1725_v45 = vunpack.c.l.bf16 %v1945_v33  ;;  %v1948_v35 = vld [vmem:[%s3129_s0 + $0x70] sm:$0xff]  }
  0x33   :  { %v373_v47 = vpack.c.bf16 %v319_v38, %v318_v31  ;;  %v688_v48 = vmax.f32 %v624_v39, 0.0  ;;  %v554_v49 = vmul.f32 %v1853_v40, %v2322_v7  ;;  %v555_v50 = vmul.f32 %v1854_v41, %v2322_v7 }
  0x34   :  { %v257_v51 = vadd.f32 %v2348_v17, %v186_v43  ;;  %v320_v52 = vmax.f32 %v256_v44, 0.0  ;;  %v1726_v53 = vunpack.c.h.bf16 %v1945_v33  ;;  %v187_v54 = vmul.f32 %v1725_v45, %v2335_v10 }
  0x35   :  { %2148 = vmatmul.mubr.msk.bf16.gmra.mrb[16].mxu0 %vm764_vm1, %v373_v47  ;;  %v741_v56 = vpack.c.bf16 %v688_v48, %v687_v42  ;;  %v625_v57 = vadd.f32 %v2327_v8, %v554_v49  ;;  %v626_v58 = vadd.f32 %v2327_v8, %v555_v50  ;;  %v1857_v59 = vunpack.c.l.bf16 %v1977_v46  ;;  %v1980_v48 = vld [vmem:[%s3126_s4 + $0x78] sm:$0xff]  }
  0x36   :  { %v321_v60 = vmax.f32 %v257_v51, 0.0  ;;  %v188_v61 = vmul.f32 %v1726_v53, %v2335_v10  ;;  %v258_v62 = vadd.f32 %v2348_v17, %v187_v54  ;;  %v1858_v63 = vunpack.c.h.bf16 %v1977_v46  ;;  %v1949_v53 = vld [vmem:[%s3129_s0 + $0x78] sm:$0xff]  }
  0x37   :  { %2085 = vmatprep.mubr.msk.bf16.mxu1 %vm764_vm1, %v741_v56  ;;  %v689_v0 = vmax.f32 %v625_v57, 0.0  ;;  %v690_v1 = vmax.f32 %v626_v58, 0.0  ;;  %v556_v2 = vmul.f32 %v1857_v59, %v2322_v7  ;;  %v1729_v3 = vunpack.c.l.bf16 %v1946_v55 }
  0x38   :  { %v374_v5 = vpack.c.bf16 %v321_v60, %v320_v52  ;;  %v259_v6 = vadd.f32 %v2348_v17, %v188_v61  ;;  %v322_v9 = vmax.f32 %v258_v62, 0.0  ;;  %v557_v11 = vmul.f32 %v1858_v63, %v2322_v7 }
  0x39   :  { %v742_v13 = vpack.c.bf16 %v690_v1, %v689_v0  ;;  %v627_v14 = vadd.f32 %v2327_v8, %v556_v2  ;;  %v1730_v15 = vunpack.c.h.bf16 %v1946_v55  ;;  %v189_v16 = vmul.f32 %v1729_v3, %v2335_v10  ;;  %v1981_v2 = vld [vmem:[%s3126_s4 + $0x80] sm:$0xff]  }
  0x3a   :  { %2151 = vmatprep.mubr.msk.bf16.mxu0 %vm764_vm1, %v374_v5  ;;  %v323_v18 = vmax.f32 %v259_v6, 0.0  ;;  %v628_v19 = vadd.f32 %v2327_v8, %v557_v11  ;;  %v1861_v20 = vunpack.c.l.bf16 %v1978_v4  ;;  %v1862_v21 = vunpack.c.h.bf16 %v1978_v4 }
  0x3b   :  { %2086 = vmatmul.mubr.msk.bf16.gmra.mrb[20].mxu1 %vm764_vm1, %v742_v13  ;;  %v691_v22 = vmax.f32 %v627_v14, 0.0  ;;  %v190_v23 = vmul.f32 %v1730_v15, %v2335_v10  ;;  %v260_v24 = vadd.f32 %v2348_v17, %v189_v16  ;;  %v1733_v25 = vunpack.c.l.bf16 %v1947_v12  ;;  %v1950_v14 = vld [vmem:[%s3129_s0 + $0x80] sm:$0xff]  }
  0x3c   :  { %v375_v27 = vpack.c.bf16 %v323_v18, %v322_v9  ;;  %v692_v28 = vmax.f32 %v628_v19, 0.0  ;;  %v558_v29 = vmul.f32 %v1861_v20, %v2322_v7  ;;  %v559_v30 = vmul.f32 %v1862_v21, %v2322_v7 }
  0x3d   :  { %v261_v31 = vadd.f32 %v2348_v17, %v190_v23  ;;  %v324_v32 = vmax.f32 %v260_v24, 0.0  ;;  %v1734_v33 = vunpack.c.h.bf16 %v1947_v12  ;;  %v191_v34 = vmul.f32 %v1733_v25, %v2335_v10 }
  0x3e   :  { %2152 = vmatmul.mubr.msk.bf16.gmra.mrb[20].mxu0 %vm764_vm1, %v375_v27  ;;  %v743_v36 = vpack.c.bf16 %v692_v28, %v691_v22  ;;  %v629_v37 = vadd.f32 %v2327_v8, %v558_v29  ;;  %v630_v38 = vadd.f32 %v2327_v8, %v559_v30  ;;  %v1865_v39 = vunpack.c.l.bf16 %v1979_v26  ;;  %v1982_v28 = vld [vmem:[%s3126_s4 + $0x88] sm:$0xff]  }
  0x3f   :  { %v325_v40 = vmax.f32 %v261_v31, 0.0  ;;  %v192_v41 = vmul.f32 %v1734_v33, %v2335_v10  ;;  %v262_v42 = vadd.f32 %v2348_v17, %v191_v34  ;;  %v1866_v43 = vunpack.c.h.bf16 %v1979_v26  ;;  %v1951_v33 = vld [vmem:[%s3129_s0 + $0x88] sm:$0xff]  }
  0x40   :  { %2089 = vmatprep.mubr.msk.bf16.mxu1 %vm764_vm1, %v743_v36  ;;  %v693_v44 = vmax.f32 %v629_v37, 0.0  ;;  %v694_v45 = vmax.f32 %v630_v38, 0.0  ;;  %v560_v46 = vmul.f32 %v1865_v39, %v2322_v7  ;;  %v1737_v47 = vunpack.c.l.bf16 %v1948_v35 }
  0x41   :  { %v376_v49 = vpack.c.bf16 %v325_v40, %v324_v32  ;;  %v263_v50 = vadd.f32 %v2348_v17, %v192_v41  ;;  %v326_v51 = vmax.f32 %v262_v42, 0.0  ;;  %v561_v52 = vmul.f32 %v1866_v43, %v2322_v7 }
  0x42   :  { %v744_v54 = vpack.c.bf16 %v694_v45, %v693_v44  ;;  %v631_v55 = vadd.f32 %v2327_v8, %v560_v46  ;;  %v1738_v56 = vunpack.c.h.bf16 %v1948_v35  ;;  %v193_v57 = vmul.f32 %v1737_v47, %v2335_v10  ;;  %v1983_v46 = vld [vmem:[%s3126_s4 + $0x90] sm:$0xff]  }
  0x43   :  { %2155 = vmatprep.mubr.msk.bf16.mxu0 %vm764_vm1, %v376_v49  ;;  %v327_v58 = vmax.f32 %v263_v50, 0.0  ;;  %v632_v59 = vadd.f32 %v2327_v8, %v561_v52  ;;  %v1869_v60 = vunpack.c.l.bf16 %v1980_v48  ;;  %v1870_v61 = vunpack.c.h.bf16 %v1980_v48 }
  0x44   :  { %2090 = vmatmul.mubr.msk.bf16.gmra.mrb[24].mxu1 %vm764_vm1, %v744_v54  ;;  %v695_v62 = vmax.f32 %v631_v55, 0.0  ;;  %v194_v63 = vmul.f32 %v1738_v56, %v2335_v10  ;;  %v264_v0 = vadd.f32 %v2348_v17, %v193_v57  ;;  %v1741_v1 = vunpack.c.l.bf16 %v1949_v53  ;;  %v1952_v55 = vld [vmem:[%s3129_s0 + $0x90] sm:$0xff]  }
  0x45   :  { %v377_v3 = vpack.c.bf16 %v327_v58, %v326_v51  ;;  %v696_v4 = vmax.f32 %v632_v59, 0.0  ;;  %v562_v5 = vmul.f32 %v1869_v60, %v2322_v7  ;;  %v563_v6 = vmul.f32 %v1870_v61, %v2322_v7 }
  0x46   :  { %v265_v9 = vadd.f32 %v2348_v17, %v194_v63  ;;  %v328_v11 = vmax.f32 %v264_v0, 0.0  ;;  %v1742_v12 = vunpack.c.h.bf16 %v1949_v53  ;;  %v195_v13 = vmul.f32 %v1741_v1, %v2335_v10 }
  0x47   :  { %2156 = vmatmul.mubr.msk.bf16.gmra.mrb[24].mxu0 %vm764_vm1, %v377_v3  ;;  %v745_v15 = vpack.c.bf16 %v696_v4, %v695_v62  ;;  %v633_v16 = vadd.f32 %v2327_v8, %v562_v5  ;;  %v634_v18 = vadd.f32 %v2327_v8, %v563_v6  ;;  %v1873_v19 = vunpack.c.l.bf16 %v1981_v2  ;;  %v1984_v4 = vld [vmem:[%s3126_s4 + $0x98] sm:$0xff]  }
  0x48   :  { %v329_v20 = vmax.f32 %v265_v9, 0.0  ;;  %v196_v21 = vmul.f32 %v1742_v12, %v2335_v10  ;;  %v266_v22 = vadd.f32 %v2348_v17, %v195_v13  ;;  %v1874_v23 = vunpack.c.h.bf16 %v1981_v2  ;;  %v1953_v12 = vld [vmem:[%s3129_s0 + $0x98] sm:$0xff]  }
  0x49   :  { %2093 = vmatprep.mubr.msk.bf16.mxu1 %vm764_vm1, %v745_v15  ;;  %v697_v24 = vmax.f32 %v633_v16, 0.0  ;;  %v698_v25 = vmax.f32 %v634_v18, 0.0  ;;  %v564_v26 = vmul.f32 %v1873_v19, %v2322_v7  ;;  %v1745_v27 = vunpack.c.l.bf16 %v1950_v14 }
  0x4a   :  { %v378_v29 = vpack.c.bf16 %v329_v20, %v328_v11  ;;  %v267_v30 = vadd.f32 %v2348_v17, %v196_v21  ;;  %v330_v31 = vmax.f32 %v266_v22, 0.0  ;;  %v565_v32 = vmul.f32 %v1874_v23, %v2322_v7 }
  0x4b   :  { %v746_v34 = vpack.c.bf16 %v698_v25, %v697_v24  ;;  %v635_v35 = vadd.f32 %v2327_v8, %v564_v26  ;;  %v1746_v36 = vunpack.c.h.bf16 %v1950_v14  ;;  %v197_v37 = vmul.f32 %v1745_v27, %v2335_v10  ;;  %v1985_v26 = vld [vmem:[%s3126_s4 + $0xa0] sm:$0xff]  }
  0x4c   :  { %2159 = vmatprep.mubr.msk.bf16.mxu0 %vm764_vm1, %v378_v29  ;;  %v331_v38 = vmax.f32 %v267_v30, 0.0  ;;  %v636_v39 = vadd.f32 %v2327_v8, %v565_v32  ;;  %v1877_v40 = vunpack.c.l.bf16 %v1982_v28  ;;  %v1878_v41 = vunpack.c.h.bf16 %v1982_v28 }
  0x4d   :  { %2094 = vmatmul.mubr.msk.bf16.gmra.mrb[28].mxu1 %vm764_vm1, %v746_v34  ;;  %v699_v42 = vmax.f32 %v635_v35, 0.0  ;;  %v198_v43 = vmul.f32 %v1746_v36, %v2335_v10  ;;  %v268_v44 = vadd.f32 %v2348_v17, %v197_v37  ;;  %v1749_v45 = vunpack.c.l.bf16 %v1951_v33  ;;  %v1954_v35 = vld [vmem:[%s3129_s0 + $0xa0] sm:$0xff]  }
  0x4e   :  { %v379_v47 = vpack.c.bf16 %v331_v38, %v330_v31  ;;  %v700_v48 = vmax.f32 %v636_v39, 0.0  ;;  %v566_v49 = vmul.f32 %v1877_v40, %v2322_v7  ;;  %v567_v50 = vmul.f32 %v1878_v41, %v2322_v7 }
  0x4f   :  { %v269_v51 = vadd.f32 %v2348_v17, %v198_v43  ;;  %v332_v52 = vmax.f32 %v268_v44, 0.0  ;;  %v1750_v53 = vunpack.c.h.bf16 %v1951_v33  ;;  %v199_v54 = vmul.f32 %v1749_v45, %v2335_v10 }
  0x50   :  { %2160 = vmatmul.mubr.msk.bf16.gmra.mrb[28].mxu0 %vm764_vm1, %v379_v47  ;;  %v747_v56 = vpack.c.bf16 %v700_v48, %v699_v42  ;;  %v637_v57 = vadd.f32 %v2327_v8, %v566_v49  ;;  %v638_v58 = vadd.f32 %v2327_v8, %v567_v50  ;;  %v1881_v59 = vunpack.c.l.bf16 %v1983_v46  ;;  %v1986_v48 = vld [vmem:[%s3126_s4 + $0xa8] sm:$0xff]  }
  0x51   :  { %v333_v60 = vmax.f32 %v269_v51, 0.0  ;;  %v200_v61 = vmul.f32 %v1750_v53, %v2335_v10  ;;  %v270_v62 = vadd.f32 %v2348_v17, %v199_v54  ;;  %v1882_v63 = vunpack.c.h.bf16 %v1983_v46  ;;  %v1955_v53 = vld [vmem:[%s3129_s0 + $0xa8] sm:$0xff]  }
  0x52   :  { %2097 = vmatprep.mubr.msk.bf16.mxu1 %vm764_vm1, %v747_v56  ;;  %v701_v0 = vmax.f32 %v637_v57, 0.0  ;;  %v702_v1 = vmax.f32 %v638_v58, 0.0  ;;  %v568_v2 = vmul.f32 %v1881_v59, %v2322_v7  ;;  %v1753_v3 = vunpack.c.l.bf16 %v1952_v55 }
  0x53   :  { %v380_v5 = vpack.c.bf16 %v333_v60, %v332_v52  ;;  %v271_v6 = vadd.f32 %v2348_v17, %v200_v61  ;;  %v334_v9 = vmax.f32 %v270_v62, 0.0  ;;  %v569_v11 = vmul.f32 %v1882_v63, %v2322_v7 }
  0x54   :  { %v748_v13 = vpack.c.bf16 %v702_v1, %v701_v0  ;;  %v639_v14 = vadd.f32 %v2327_v8, %v568_v2  ;;  %v1754_v15 = vunpack.c.h.bf16 %v1952_v55  ;;  %v201_v16 = vmul.f32 %v1753_v3, %v2335_v10  ;;  %v1987_v2 = vld [vmem:[%s3126_s4 + $0xb0] sm:$0xff]  }
  0x55   :  { %2163 = vmatprep.mubr.msk.bf16.mxu0 %vm764_vm1, %v380_v5  ;;  %v335_v18 = vmax.f32 %v271_v6, 0.0  ;;  %v640_v19 = vadd.f32 %v2327_v8, %v569_v11  ;;  %v1885_v20 = vunpack.c.l.bf16 %v1984_v4  ;;  %v1886_v21 = vunpack.c.h.bf16 %v1984_v4 }
  0x56   :  { %2098 = vmatmul.mubr.msk.bf16.gmra.mrb[32].mxu1 %vm764_vm1, %v748_v13  ;;  %v703_v22 = vmax.f32 %v639_v14, 0.0  ;;  %v202_v23 = vmul.f32 %v1754_v15, %v2335_v10  ;;  %v272_v24 = vadd.f32 %v2348_v17, %v201_v16  ;;  %v1757_v25 = vunpack.c.l.bf16 %v1953_v12  ;;  %v1956_v14 = vld [vmem:[%s3129_s0 + $0xb0] sm:$0xff]  }
  0x57   :  { %v381_v27 = vpack.c.bf16 %v335_v18, %v334_v9  ;;  %v704_v28 = vmax.f32 %v640_v19, 0.0  ;;  %v570_v29 = vmul.f32 %v1885_v20, %v2322_v7  ;;  %v571_v30 = vmul.f32 %v1886_v21, %v2322_v7 }
  0x58   :  { %v273_v31 = vadd.f32 %v2348_v17, %v202_v23  ;;  %v336_v32 = vmax.f32 %v272_v24, 0.0  ;;  %v1758_v33 = vunpack.c.h.bf16 %v1953_v12  ;;  %v203_v34 = vmul.f32 %v1757_v25, %v2335_v10 }
  0x59   :  { %2164 = vmatmul.mubr.msk.bf16.gmra.mrb[32].mxu0 %vm764_vm1, %v381_v27  ;;  %v749_v36 = vpack.c.bf16 %v704_v28, %v703_v22  ;;  %v641_v37 = vadd.f32 %v2327_v8, %v570_v29  ;;  %v642_v38 = vadd.f32 %v2327_v8, %v571_v30  ;;  %v1889_v39 = vunpack.c.l.bf16 %v1985_v26  ;;  %v1988_v28 = vld [vmem:[%s3126_s4 + $0xb8] sm:$0xff]  }
  0x5a   :  { %v337_v40 = vmax.f32 %v273_v31, 0.0  ;;  %v204_v41 = vmul.f32 %v1758_v33, %v2335_v10  ;;  %v274_v42 = vadd.f32 %v2348_v17, %v203_v34  ;;  %v1890_v43 = vunpack.c.h.bf16 %v1985_v26  ;;  %v1957_v33 = vld [vmem:[%s3129_s0 + $0xb8] sm:$0xff]  }
  0x5b   :  { %2101 = vmatprep.mubr.msk.bf16.mxu1 %vm764_vm1, %v749_v36  ;;  %v705_v44 = vmax.f32 %v641_v37, 0.0  ;;  %v706_v45 = vmax.f32 %v642_v38, 0.0  ;;  %v572_v46 = vmul.f32 %v1889_v39, %v2322_v7  ;;  %v1761_v47 = vunpack.c.l.bf16 %v1954_v35 }
  0x5c   :  { %v382_v49 = vpack.c.bf16 %v337_v40, %v336_v32  ;;  %v275_v50 = vadd.f32 %v2348_v17, %v204_v41  ;;  %v338_v51 = vmax.f32 %v274_v42, 0.0  ;;  %v573_v52 = vmul.f32 %v1890_v43, %v2322_v7 }
  0x5d   :  { %v750_v54 = vpack.c.bf16 %v706_v45, %v705_v44  ;;  %v643_v55 = vadd.f32 %v2327_v8, %v572_v46  ;;  %v1762_v56 = vunpack.c.h.bf16 %v1954_v35  ;;  %v205_v57 = vmul.f32 %v1761_v47, %v2335_v10  ;;  %v1989_v46 = vld [vmem:[%s3126_s4 + $0xc0] sm:$0xff]  }
  0x5e   :  { %2167 = vmatprep.mubr.msk.bf16.mxu0 %vm764_vm1, %v382_v49  ;;  %v339_v58 = vmax.f32 %v275_v50, 0.0  ;;  %v644_v59 = vadd.f32 %v2327_v8, %v573_v52  ;;  %v1893_v60 = vunpack.c.l.bf16 %v1986_v48  ;;  %v1894_v61 = vunpack.c.h.bf16 %v1986_v48 }
  0x5f   :  { %2102 = vmatmul.mubr.msk.bf16.gmra.mrb[36].mxu1 %vm764_vm1, %v750_v54  ;;  %v707_v62 = vmax.f32 %v643_v55, 0.0  ;;  %v206_v63 = vmul.f32 %v1762_v56, %v2335_v10  ;;  %v276_v0 = vadd.f32 %v2348_v17, %v205_v57  ;;  %v1765_v1 = vunpack.c.l.bf16 %v1955_v53  ;;  %v1958_v54 = vld [vmem:[%s3129_s0 + $0xc0] sm:$0xff]  }
  0x60   :  { %v383_v3 = vpack.c.bf16 %v339_v58, %v338_v51  ;;  %v708_v4 = vmax.f32 %v644_v59, 0.0  ;;  %v574_v5 = vmul.f32 %v1893_v60, %v2322_v7  ;;  %v575_v6 = vmul.f32 %v1894_v61, %v2322_v7  ;;  %v2720_v56 = vld [vmem:[%s3128_s6] ss:$0 sm:$0xff] }
  0x61   :  { %v277_v9 = vadd.f32 %v2348_v17, %v206_v63  ;;  %v340_v11 = vmax.f32 %v276_v0, 0.0  ;;  %v1766_v12 = vunpack.c.h.bf16 %v1955_v53  ;;  %v207_v13 = vmul.f32 %v1765_v1, %v2335_v10  ;;  %v2735_v1 = vld [vmem:[%s3127_s5] ss:$0 sm:$0xff] }
  0x62   :  { %2168 = vmatmul.mubr.msk.bf16.gmra.mrb[36].mxu0 %vm764_vm1, %v383_v3  ;;  %v751_v15 = vpack.c.bf16 %v708_v4, %v707_v62  ;;  %v645_v16 = vadd.f32 %v2327_v8, %v574_v5  ;;  %v646_v18 = vadd.f32 %v2327_v8, %v575_v6  ;;  %v1897_v19 = vunpack.c.l.bf16 %v1987_v2  ;;  %v1990_v4 = vld [vmem:[%s3126_s4 + $0xc8] sm:$0xff]  }
  0x63   :  { %v341_v20 = vmax.f32 %v277_v9, 0.0  ;;  %v208_v21 = vmul.f32 %v1766_v12, %v2335_v10  ;;  %v278_v22 = vadd.f32 %v2348_v17, %v207_v13  ;;  %v1898_v23 = vunpack.c.h.bf16 %v1987_v2  ;;  %v1959_v12 = vld [vmem:[%s3129_s0 + $0xc8] sm:$0xff]  }
  0x64   :  { %2105 = vmatprep.mubr.msk.bf16.mxu1 %vm764_vm1, %v751_v15  ;;  %v709_v24 = vmax.f32 %v645_v16, 0.0  ;;  %v710_v25 = vmax.f32 %v646_v18, 0.0  ;;  %v576_v26 = vmul.f32 %v1897_v19, %v2322_v7  ;;  %v1769_v27 = vunpack.c.l.bf16 %v1956_v14 }
  0x65   :  { %v384_v29 = vpack.c.bf16 %v341_v20, %v340_v11  ;;  %v279_v30 = vadd.f32 %v2348_v17, %v208_v21  ;;  %v342_v31 = vmax.f32 %v278_v22, 0.0  ;;  %v577_v32 = vmul.f32 %v1898_v23, %v2322_v7 }
  0x66   :  { %v752_v34 = vpack.c.bf16 %v710_v25, %v709_v24  ;;  %v647_v35 = vadd.f32 %v2327_v8, %v576_v26  ;;  %v1770_v36 = vunpack.c.h.bf16 %v1956_v14  ;;  %v209_v37 = vmul.f32 %v1769_v27, %v2335_v10  ;;  %v1991_v26 = vld [vmem:[%s3126_s4 + $0xd0] sm:$0xff]  }
  0x67   :  { %2171 = vmatprep.mubr.msk.bf16.mxu0 %vm764_vm1, %v384_v29  ;;  %v343_v38 = vmax.f32 %v279_v30, 0.0  ;;  %v648_v39 = vadd.f32 %v2327_v8, %v577_v32  ;;  %v1901_v40 = vunpack.c.l.bf16 %v1988_v28  ;;  %v1902_v41 = vunpack.c.h.bf16 %v1988_v28 }
  0x68   :  { %2106 = vmatmul.mubr.msk.bf16.gmra.mrb[40].mxu1 %vm764_vm1, %v752_v34  ;;  %v711_v42 = vmax.f32 %v647_v35, 0.0  ;;  %v210_v43 = vmul.f32 %v1770_v36, %v2335_v10  ;;  %v280_v44 = vadd.f32 %v2348_v17, %v209_v37  ;;  %v1773_v45 = vunpack.c.l.bf16 %v1957_v33  ;;  %v1960_v35 = vld [vmem:[%s3129_s0 + $0xd0] sm:$0xff]  }
  0x69   :  { %v385_v47 = vpack.c.bf16 %v343_v38, %v342_v31  ;;  %v712_v48 = vmax.f32 %v648_v39, 0.0  ;;  %v578_v49 = vmul.f32 %v1901_v40, %v2322_v7  ;;  %v579_v8 = vmul.f32 %v1902_v41, %v2322_v7 }
  0x6a   :  { %v281_v50 = vadd.f32 %v2348_v17, %v210_v43  ;;  %v344_v51 = vmax.f32 %v280_v44, 0.0  ;;  %v1774_v52 = vunpack.c.h.bf16 %v1957_v33  ;;  %v211_v53 = vmul.f32 %v1773_v45, %v2335_v10  ;;  %v2727_v10 = vld [vmem:[%s3130_s1] ss:$0 sm:$0xff] }
  0x6b   :  { %2172 = vmatmul.mubr.msk.bf16.gmra.mrb[40].mxu0 %vm764_vm1, %v385_v47  ;;  %v753_v55 = vpack.c.bf16 %v712_v48, %v711_v42  ;;  %v649_v7 = vadd.f32 %v2720_v56, %v578_v49  ;;  %v650_v57 = vadd.f32 %v2720_v56, %v579_v8  ;;  %v1905_v58 = vunpack.c.l.bf16 %v1989_v46  ;;  %v1992_v48 = vld [vmem:[%s3126_s4 + $0xd8] sm:$0xff]  }
  0x6c   :  { %v345_v59 = vmax.f32 %v281_v50, 0.0  ;;  %v212_v60 = vmul.f32 %v2727_v10, %v1774_v52  ;;  %v282_v61 = vadd.f32 %v2348_v17, %v211_v53  ;;  %v1906_v62 = vunpack.c.h.bf16 %v1989_v46  ;;  %v2744_v17 = vld [vmem:[%s3131_s2] ss:$0 sm:$0xff]  ;;  %v1961_v52 = vld [vmem:[%s3129_s0 + $0xd8] sm:$0xff]  }
  0x6d   :  { %2109 = vmatprep.mubr.msk.bf16.mxu1 %vm764_vm1, %v753_v55  ;;  %v713_v63 = vmax.f32 %v649_v7, 0.0  ;;  %v714_v0 = vmax.f32 %v650_v57, 0.0  ;;  %v580_v2 = vmul.f32 %v2735_v1, %v1905_v58  ;;  %v1777_v3 = vunpack.c.l.bf16 %v1958_v54 }
  0x6e   :  { %v386_v5 = vpack.c.bf16 %v345_v59, %v344_v51  ;;  %v283_v6 = vadd.f32 %v2744_v17, %v212_v60  ;;  %v346_v9 = vmax.f32 %v282_v61, 0.0  ;;  %v581_v11 = vmul.f32 %v2735_v1, %v1906_v62 }
  0x6f   :  { %v754_v13 = vpack.c.bf16 %v714_v0, %v713_v63  ;;  %v651_v14 = vadd.f32 %v2720_v56, %v580_v2  ;;  %v1778_v15 = vunpack.c.h.bf16 %v1958_v54  ;;  %v213_v16 = vmul.f32 %v2727_v10, %v1777_v3  ;;  %v1993_v2 = vld [vmem:[%s3126_s4 + $0xe0] sm:$0xff]  }
  0x70   :  { %2175 = vmatprep.mubr.msk.bf16.mxu0 %vm764_vm1, %v386_v5  ;;  %v347_v18 = vmax.f32 %v283_v6, 0.0  ;;  %v652_v19 = vadd.f32 %v2720_v56, %v581_v11  ;;  %v1909_v20 = vunpack.c.l.bf16 %v1990_v4  ;;  %v1910_v21 = vunpack.c.h.bf16 %v1990_v4 }
  0x71   :  { %2110 = vmatmul.mubr.msk.bf16.gmra.mrb[44].mxu1 %vm764_vm1, %v754_v13  ;;  %v715_v22 = vmax.f32 %v651_v14, 0.0  ;;  %v214_v23 = vmul.f32 %v2727_v10, %v1778_v15  ;;  %v284_v24 = vadd.f32 %v2744_v17, %v213_v16  ;;  %v1781_v25 = vunpack.c.l.bf16 %v1959_v12  ;;  %v1962_v14 = vld [vmem:[%s3129_s0 + $0xe0] sm:$0xff]  }
  0x72   :  { %v387_v27 = vpack.c.bf16 %v347_v18, %v346_v9  ;;  %v716_v28 = vmax.f32 %v652_v19, 0.0  ;;  %v582_v29 = vmul.f32 %v2735_v1, %v1909_v20  ;;  %v583_v30 = vmul.f32 %v2735_v1, %v1910_v21 }
  0x73   :  { %v285_v31 = vadd.f32 %v2744_v17, %v214_v23  ;;  %v348_v32 = vmax.f32 %v284_v24, 0.0  ;;  %v1782_v33 = vunpack.c.h.bf16 %v1959_v12  ;;  %v215_v34 = vmul.f32 %v2727_v10, %v1781_v25 }
  0x74   :  { %2176 = vmatmul.mubr.msk.bf16.gmra.mrb[44].mxu0 %vm764_vm1, %v387_v27  ;;  %v755_v36 = vpack.c.bf16 %v716_v28, %v715_v22  ;;  %v653_v37 = vadd.f32 %v2720_v56, %v582_v29  ;;  %v654_v38 = vadd.f32 %v2720_v56, %v583_v30  ;;  %v1913_v39 = vunpack.c.l.bf16 %v1991_v26  ;;  %v1994_v28 = vld [vmem:[%s3126_s4 + $0xe8] sm:$0xff]  }
  0x75   :  { %v349_v40 = vmax.f32 %v285_v31, 0.0  ;;  %v216_v41 = vmul.f32 %v2727_v10, %v1782_v33  ;;  %v286_v42 = vadd.f32 %v2744_v17, %v215_v34  ;;  %v1914_v43 = vunpack.c.h.bf16 %v1991_v26  ;;  %v1963_v33 = vld [vmem:[%s3129_s0 + $0xe8] sm:$0xff]  }
  0x76   :  { %2113 = vmatprep.mubr.msk.bf16.mxu1 %vm764_vm1, %v755_v36  ;;  %v717_v44 = vmax.f32 %v653_v37, 0.0  ;;  %v718_v45 = vmax.f32 %v654_v38, 0.0  ;;  %v584_v46 = vmul.f32 %v2735_v1, %v1913_v39  ;;  %v1785_v47 = vunpack.c.l.bf16 %v1960_v35 }
  0x77   :  { %v388_v49 = vpack.c.bf16 %v349_v40, %v348_v32  ;;  %v287_v8 = vadd.f32 %v2744_v17, %v216_v41  ;;  %v350_v50 = vmax.f32 %v286_v42, 0.0  ;;  %v585_v51 = vmul.f32 %v2735_v1, %v1914_v43 }
  0x78   :  { %v756_v53 = vpack.c.bf16 %v718_v45, %v717_v44  ;;  %v655_v54 = vadd.f32 %v2720_v56, %v584_v46  ;;  %v1786_v55 = vunpack.c.h.bf16 %v1960_v35  ;;  %v217_v7 = vmul.f32 %v2727_v10, %v1785_v47  ;;  %v1995_v46 = vld [vmem:[%s3126_s4 + $0xf0] sm:$0xff]  }
  0x79   :  { %2179 = vmatprep.mubr.msk.bf16.mxu0 %vm764_vm1, %v388_v49  ;;  %v351_v57 = vmax.f32 %v287_v8, 0.0  ;;  %v656_v58 = vadd.f32 %v2720_v56, %v585_v51  ;;  %v1917_v59 = vunpack.c.l.bf16 %v1992_v48  ;;  %v1918_v60 = vunpack.c.h.bf16 %v1992_v48 }
  0x7a   :  { %2114 = vmatmul.mubr.msk.bf16.gmra.mrb[48].mxu1 %vm764_vm1, %v756_v53  ;;  %v719_v61 = vmax.f32 %v655_v54, 0.0  ;;  %v218_v62 = vmul.f32 %v2727_v10, %v1786_v55  ;;  %v288_v63 = vadd.f32 %v2744_v17, %v217_v7  ;;  %v1789_v0 = vunpack.c.l.bf16 %v1961_v52  ;;  %v1964_v54 = vld [vmem:[%s3129_s0 + $0xf0] sm:$0xff]  }
  0x7b   :  { %v389_v3 = vpack.c.bf16 %v351_v57, %v350_v50  ;;  %v720_v4 = vmax.f32 %v656_v58, 0.0  ;;  %v586_v5 = vmul.f32 %v2735_v1, %v1917_v59  ;;  %v587_v6 = vmul.f32 %v2735_v1, %v1918_v60 }
  0x7c   :  { %v289_v9 = vadd.f32 %v2744_v17, %v218_v62  ;;  %v352_v11 = vmax.f32 %v288_v63, 0.0  ;;  %v1790_v12 = vunpack.c.h.bf16 %v1961_v52  ;;  %v219_v13 = vmul.f32 %v2727_v10, %v1789_v0 }
  0x7d   :  { %2180 = vmatmul.mubr.msk.bf16.gmra.mrb[48].mxu0 %vm764_vm1, %v389_v3  ;;  %v757_v15 = vpack.c.bf16 %v720_v4, %v719_v61  ;;  %v657_v16 = vadd.f32 %v2720_v56, %v586_v5  ;;  %v658_v18 = vadd.f32 %v2720_v56, %v587_v6  ;;  %v1921_v19 = vunpack.c.l.bf16 %v1993_v2  ;;  %v1996_v4 = vld [vmem:[%s3126_s4 + $0xf8] sm:$0xff]  }
  0x7e   :  { %v353_v20 = vmax.f32 %v289_v9, 0.0  ;;  %v220_v21 = vmul.f32 %v2727_v10, %v1790_v12  ;;  %v290_v22 = vadd.f32 %v2744_v17, %v219_v13  ;;  %v1922_v23 = vunpack.c.h.bf16 %v1993_v2  ;;  %v1965_v12 = vld [vmem:[%s3129_s0 + $0xf8] sm:$0xff]  }
  0x7f   :  { %2117 = vmatprep.mubr.msk.bf16.mxu1 %vm764_vm1, %v757_v15  ;;  %v721_v24 = vmax.f32 %v657_v16, 0.0  ;;  %v722_v25 = vmax.f32 %v658_v18, 0.0  ;;  %v588_v26 = vmul.f32 %v2735_v1, %v1921_v19  ;;  %v1793_v27 = vunpack.c.l.bf16 %v1962_v14 }
  0x80   :  { %v390_v29 = vpack.c.bf16 %v353_v20, %v352_v11  ;;  %v291_v30 = vadd.f32 %v2744_v17, %v220_v21  ;;  %v354_v31 = vmax.f32 %v290_v22, 0.0  ;;  %v589_v32 = vmul.f32 %v2735_v1, %v1922_v23 }
  0x81   :  { %v758_v34 = vpack.c.bf16 %v722_v25, %v721_v24  ;;  %v659_v35 = vadd.f32 %v2720_v56, %v588_v26  ;;  %v1794_v36 = vunpack.c.h.bf16 %v1962_v14  ;;  %v221_v37 = vmul.f32 %v2727_v10, %v1793_v27 }
  0x82   :  { %2183 = vmatprep.mubr.msk.bf16.mxu0 %vm764_vm1, %v390_v29  ;;  %v355_v38 = vmax.f32 %v291_v30, 0.0  ;;  %v660_v39 = vadd.f32 %v2720_v56, %v589_v32  ;;  %v1925_v40 = vunpack.c.l.bf16 %v1994_v28  ;;  %v1926_v41 = vunpack.c.h.bf16 %v1994_v28 }
  0x83   :  { %2118 = vmatmul.mubr.msk.bf16.gmra.mrb[52].mxu1 %vm764_vm1, %v758_v34  ;;  %v723_v42 = vmax.f32 %v659_v35, 0.0  ;;  %v222_v43 = vmul.f32 %v2727_v10, %v1794_v36  ;;  %v292_v44 = vadd.f32 %v2744_v17, %v221_v37  ;;  %v1797_v45 = vunpack.c.l.bf16 %v1963_v33 }
  0x84   :  { %v391_v47 = vpack.c.bf16 %v355_v38, %v354_v31  ;;  %v724_v48 = vmax.f32 %v660_v39, 0.0  ;;  %v590_v49 = vmul.f32 %v2735_v1, %v1925_v40  ;;  %v591_v8 = vmul.f32 %v2735_v1, %v1926_v41 }
  0x85   :  { %v293_v50 = vadd.f32 %v2744_v17, %v222_v43  ;;  %v356_v51 = vmax.f32 %v292_v44, 0.0  ;;  %v1798_v52 = vunpack.c.h.bf16 %v1963_v33  ;;  %v223_v53 = vmul.f32 %v2727_v10, %v1797_v45 }
  0x86   :  { %2184 = vmatmul.mubr.msk.bf16.gmra.mrb[52].mxu0 %vm764_vm1, %v391_v47  ;;  %v759_v55 = vpack.c.bf16 %v724_v48, %v723_v42  ;;  %v661_v7 = vadd.f32 %v2720_v56, %v590_v49  ;;  %v662_v57 = vadd.f32 %v2720_v56, %v591_v8  ;;  %v1929_v58 = vunpack.c.l.bf16 %v1995_v46 }
  0x87   :  { %v357_v59 = vmax.f32 %v293_v50, 0.0  ;;  %v224_v60 = vmul.f32 %v2727_v10, %v1798_v52  ;;  %v294_v61 = vadd.f32 %v2744_v17, %v223_v53  ;;  %v1930_v62 = vunpack.c.h.bf16 %v1995_v46 }
  0x88   :  { %2121 = vmatprep.mubr.msk.bf16.mxu1 %vm764_vm1, %v759_v55  ;;  %v725_v63 = vmax.f32 %v661_v7, 0.0  ;;  %v726_v0 = vmax.f32 %v662_v57, 0.0  ;;  %v592_v2 = vmul.f32 %v2735_v1, %v1929_v58  ;;  %v1801_v3 = vunpack.c.l.bf16 %v1964_v54 }
  0x89   :  { %v392_v5 = vpack.c.bf16 %v357_v59, %v356_v51  ;;  %v295_v6 = vadd.f32 %v2744_v17, %v224_v60  ;;  %v358_v9 = vmax.f32 %v294_v61, 0.0  ;;  %v593_v11 = vmul.f32 %v2735_v1, %v1930_v62 }
  0x8a   :  { %v760_v13 = vpack.c.bf16 %v726_v0, %v725_v63  ;;  %v663_v14 = vadd.f32 %v2720_v56, %v592_v2  ;;  %v1802_v15 = vunpack.c.h.bf16 %v1964_v54  ;;  %v225_v16 = vmul.f32 %v2727_v10, %v1801_v3 }
  0x8b   :  { %2187 = vmatprep.mubr.msk.bf16.mxu0 %vm764_vm1, %v392_v5  ;;  %v359_v18 = vmax.f32 %v295_v6, 0.0  ;;  %v664_v19 = vadd.f32 %v2720_v56, %v593_v11  ;;  %v1933_v20 = vunpack.c.l.bf16 %v1996_v4  ;;  %v1934_v21 = vunpack.c.h.bf16 %v1996_v4 }
  0x8c   :  { %2122 = vmatmul.mubr.msk.bf16.gmra.mrb[56].mxu1 %vm764_vm1, %v760_v13  ;;  %v727_v22 = vmax.f32 %v663_v14, 0.0  ;;  %v226_v23 = vmul.f32 %v2727_v10, %v1802_v15  ;;  %v296_v24 = vadd.f32 %v2744_v17, %v225_v16  ;;  %v1805_v25 = vunpack.c.l.bf16 %v1965_v12 }
  0x8d   :  { %v393_v26 = vpack.c.bf16 %v359_v18, %v358_v9  ;;  %v728_v27 = vmax.f32 %v664_v19, 0.0  ;;  %v594_v28 = vmul.f32 %v2735_v1, %v1933_v20  ;;  %v595_v29 = vmul.f32 %v2735_v1, %v1934_v21 }
  0x8e   :  { %v297_v30 = vadd.f32 %v2744_v17, %v226_v23  ;;  %v360_v31 = vmax.f32 %v296_v24, 0.0  ;;  %v1806_v32 = vunpack.c.h.bf16 %v1965_v12  ;;  %v227_v33 = vmul.f32 %v2727_v10, %v1805_v25 }
  0x8f   :  { %2188 = vmatmul.mubr.msk.bf16.gmra.mrb[56].mxu0 %vm764_vm1, %v393_v26  ;;  %v761_v34 = vpack.c.bf16 %v728_v27, %v727_v22  ;;  %v665_v35 = vadd.f32 %v2720_v56, %v594_v28  ;;  %v666_v36 = vadd.f32 %v2720_v56, %v595_v29 }
  0x90   :  { %v361_v37 = vmax.f32 %v297_v30, 0.0  ;;  %v228_v38 = vmul.f32 %v2727_v10, %v1806_v32  ;;  %v298_v39 = vadd.f32 %v2744_v17, %v227_v33 }
  0x91   :  { %2125 = vmatprep.mubr.msk.bf16.mxu1 %vm764_vm1, %v761_v34  ;;  %v729_v1 = vmax.f32 %v665_v35, 0.0  ;;  %v730_v40 = vmax.f32 %v666_v36, 0.0 }
  0x92   :  { %v394_v41 = vpack.c.bf16 %v361_v37, %v360_v31  ;;  %v299_v42 = vadd.f32 %v2744_v17, %v228_v38  ;;  %v362_v43 = vmax.f32 %v298_v39, 0.0 }
  0x93   :  { %v762_v44 = vpack.c.bf16 %v730_v40, %v729_v1 }
  0x94   :  { %2191 = vmatprep.mubr.msk.bf16.mxu0 %vm764_vm1, %v394_v41  ;;  %v363_v45 = vmax.f32 %v299_v42, 0.0 }
  0x95   :  { %2126 = vmatmul.mubr.msk.bf16.gmra.mrb[60].mxu1 %vm764_vm1, %v762_v44 }
  0x96   :  { %v395_v56 = vpack.c.bf16 %v363_v45, %v362_v43 }
  0x98   :  { %2192 = vmatmul.mubr.msk.bf16.gmra.mrb[60].mxu0 %vm764_vm1, %v395_v56 }
  0xe2   :  { %v2067_v10 = vpop.f32.mrb[0].mxu1 }
  0xe3   :  { %v899_v48 = vpop.f32.mrb[1].mxu1 }
  0xe4   :  { %v2068_v50 = vpop.f32.mrb[2].mxu1 }
  0xe5   :  { %v2133_v46 = vpop.f32.mrb[0].mxu0  ;;  %v902_v52 = vpop.f32.mrb[3].mxu1 }
  0xe6   :  { %v1296_v47 = vadd.f32 %v2133_v46, %v2067_v10  ;;  %v1287_v49 = vpop.f32.mrb[1].mxu0 }
  0xe7   :  { %v1288_v8 = vadd.f32 %v1287_v49, %v899_v48  ;;  %v2134_v51 = vpop.f32.mrb[2].mxu0 }
  0xe8   :  { %1545 = vst.msk [vmem:[%s3132_s8 + $0x10] sm:$0xff] %vm1542_vm2, %v1296_v47  ;;  %v1299_v17 = vadd.f32 %v2134_v51, %v2068_v50  ;;  %v1290_v53 = vpop.f32.mrb[3].mxu0 }
  0xe9   :  { %1543 = vst.msk [vmem:[%s3132_s8] sm:$0xff] %vm1542_vm2, %v1288_v8  ;;  %v1291_v54 = vadd.f32 %v1290_v53, %v902_v52 }
  0xea   :  { %1546 = vst.msk [vmem:[%s3132_s8 + $0x18] sm:$0xff] %vm1542_vm2, %v1299_v17  ;;  %v2071_v55 = vpop.f32.mrb[4].mxu1 }
  0xeb   :  { %1544 = vst.msk [vmem:[%s3132_s8 + $0x8] sm:$0xff] %vm1542_vm2, %v1291_v54  ;;  %v915_v57 = vpop.f32.mrb[5].mxu1 }
  0xec   :  { %v2072_v60 = vpop.f32.mrb[6].mxu1 }
  0xed   :  { %v2137_v7 = vpop.f32.mrb[4].mxu0  ;;  %v918_v63 = vpop.f32.mrb[7].mxu1 }
  0xee   :  { %v1312_v58 = vadd.f32 %v2137_v7, %v2071_v55  ;;  %v1303_v59 = vpop.f32.mrb[5].mxu0 }
  0xef   :  { %v1304_v61 = vadd.f32 %v1303_v59, %v915_v57  ;;  %v2138_v62 = vpop.f32.mrb[6].mxu0 }
  0xf0   :  { %1549 = vst.msk [vmem:[%s3132_s8 + $0x30] sm:$0xff] %vm1542_vm2, %v1312_v58  ;;  %v1315_v0 = vadd.f32 %v2138_v62, %v2072_v60  ;;  %v1306_v2 = vpop.f32.mrb[7].mxu0 }
  0xf1   :  { %1547 = vst.msk [vmem:[%s3132_s8 + $0x20] sm:$0xff] %vm1542_vm2, %v1304_v61  ;;  %v1307_v3 = vadd.f32 %v1306_v2, %v918_v63 }
  0xf2   :  { %1550 = vst.msk [vmem:[%s3132_s8 + $0x38] sm:$0xff] %vm1542_vm2, %v1315_v0 }
  0xf3   :  { %1548 = vst.msk [vmem:[%s3132_s8 + $0x28] sm:$0xff] %vm1542_vm2, %v1307_v3  ;;  %v2075_v4 = vpop.f32.mrb[8].mxu1 }
  0xf4   :  { %v931_v5 = vpop.f32.mrb[9].mxu1 }
  0xf5   :  { %v2141_v6 = vpop.f32.mrb[8].mxu0  ;;  %v2076_v9 = vpop.f32.mrb[10].mxu1 }
  0xf6   :  { %v1328_v11 = vadd.f32 %v2141_v6, %v2075_v4  ;;  %v1319_v12 = vpop.f32.mrb[9].mxu0  ;;  %v934_v13 = vpop.f32.mrb[11].mxu1 }
  0xf7   :  { %v1320_v14 = vadd.f32 %v1319_v12, %v931_v5  ;;  %v2142_v15 = vpop.f32.mrb[10].mxu0 }
  0xf8   :  { %1553 = vst.msk [vmem:[%s3132_s8 + $0x50] sm:$0xff] %vm1542_vm2, %v1328_v11  ;;  %v1331_v16 = vadd.f32 %v2142_v15, %v2076_v9  ;;  %v1322_v18 = vpop.f32.mrb[11].mxu0 }
  0xf9   :  { %1551 = vst.msk [vmem:[%s3132_s8 + $0x40] sm:$0xff] %vm1542_vm2, %v1320_v14  ;;  %v1323_v19 = vadd.f32 %v1322_v18, %v934_v13 }
  0xfa   :  { %1554 = vst.msk [vmem:[%s3132_s8 + $0x58] sm:$0xff] %vm1542_vm2, %v1331_v16 }
  0xfb   :  { %1552 = vst.msk [vmem:[%s3132_s8 + $0x48] sm:$0xff] %vm1542_vm2, %v1323_v19 }
  0xfc   :  { %v2079_v20 = vpop.f32.mrb[12].mxu1 }
  0xfd   :  { %v947_v21 = vpop.f32.mrb[13].mxu1 }
  0xfe   :  { %v2080_v22 = vpop.f32.mrb[14].mxu1 }
  0xff   :  { %v2145_v23 = vpop.f32.mrb[12].mxu0  ;;  %v950_v24 = vpop.f32.mrb[15].mxu1 }
 0x100   :  { %v1344_v25 = vadd.f32 %v2145_v23, %v2079_v20  ;;  %v1335_v26 = vpop.f32.mrb[13].mxu0 }
 0x101   :  { %v1336_v27 = vadd.f32 %v1335_v26, %v947_v21  ;;  %v2146_v28 = vpop.f32.mrb[14].mxu0 }
 0x102   :  { %1557 = vst.msk [vmem:[%s3132_s8 + $0x70] sm:$0xff] %vm1542_vm2, %v1344_v25  ;;  %v1347_v29 = vadd.f32 %v2146_v28, %v2080_v22  ;;  %v1338_v30 = vpop.f32.mrb[15].mxu0 }
 0x103   :  { %1555 = vst.msk [vmem:[%s3132_s8 + $0x60] sm:$0xff] %vm1542_vm2, %v1336_v27  ;;  %v1339_v31 = vadd.f32 %v1338_v30, %v950_v24 }
 0x104   :  { %1558 = vst.msk [vmem:[%s3132_s8 + $0x78] sm:$0xff] %vm1542_vm2, %v1347_v29 }
 0x105   :  { %1556 = vst.msk [vmem:[%s3132_s8 + $0x68] sm:$0xff] %vm1542_vm2, %v1339_v31  ;;  %v2083_v32 = vpop.f32.mrb[16].mxu1 }
 0x106   :  { %v963_v33 = vpop.f32.mrb[17].mxu1 }
 0x107   :  { %v2084_v34 = vpop.f32.mrb[18].mxu1 }
 0x108   :  { %v2149_v35 = vpop.f32.mrb[16].mxu0  ;;  %v966_v36 = vpop.f32.mrb[19].mxu1 }
 0x109   :  { %v1360_v37 = vadd.f32 %v2149_v35, %v2083_v32  ;;  %v1351_v38 = vpop.f32.mrb[17].mxu0 }
 0x10a   :  { %v1352_v39 = vadd.f32 %v1351_v38, %v963_v33  ;;  %v2150_v1 = vpop.f32.mrb[18].mxu0 }
 0x10b   :  { %1561 = vst.msk [vmem:[%s3132_s8 + $0x90] sm:$0xff] %vm1542_vm2, %v1360_v37  ;;  %v1363_v40 = vadd.f32 %v2150_v1, %v2084_v34  ;;  %v1354_v41 = vpop.f32.mrb[19].mxu0 }
 0x10c   :  { %1559 = vst.msk [vmem:[%s3132_s8 + $0x80] sm:$0xff] %vm1542_vm2, %v1352_v39  ;;  %v1355_v42 = vadd.f32 %v1354_v41, %v966_v36 }
 0x10d   :  { %1562 = vst.msk [vmem:[%s3132_s8 + $0x98] sm:$0xff] %vm1542_vm2, %v1363_v40 }
 0x10e   :  { %1560 = vst.msk [vmem:[%s3132_s8 + $0x88] sm:$0xff] %vm1542_vm2, %v1355_v42  ;;  %v2087_v43 = vpop.f32.mrb[20].mxu1 }
 0x10f   :  { %v979_v44 = vpop.f32.mrb[21].mxu1 }
 0x110   :  { %v2088_v45 = vpop.f32.mrb[22].mxu1 }
 0x111   :  { %v2153_v56 = vpop.f32.mrb[20].mxu0  ;;  %v982_v10 = vpop.f32.mrb[23].mxu1 }
 0x112   :  { %v1376_v46 = vadd.f32 %v2153_v56, %v2087_v43  ;;  %v1367_v47 = vpop.f32.mrb[21].mxu0 }
 0x113   :  { %v1368_v48 = vadd.f32 %v1367_v47, %v979_v44  ;;  %v2154_v49 = vpop.f32.mrb[22].mxu0 }
 0x114   :  { %1565 = vst.msk [vmem:[%s3132_s8 + $0xb0] sm:$0xff] %vm1542_vm2, %v1376_v46  ;;  %v1379_v8 = vadd.f32 %v2154_v49, %v2088_v45  ;;  %v1370_v50 = vpop.f32.mrb[23].mxu0 }
 0x115   :  { %1563 = vst.msk [vmem:[%s3132_s8 + $0xa0] sm:$0xff] %vm1542_vm2, %v1368_v48  ;;  %v1371_v51 = vadd.f32 %v1370_v50, %v982_v10 }
 0x116   :  { %1566 = vst.msk [vmem:[%s3132_s8 + $0xb8] sm:$0xff] %vm1542_vm2, %v1379_v8 }
 0x117   :  { %1564 = vst.msk [vmem:[%s3132_s8 + $0xa8] sm:$0xff] %vm1542_vm2, %v1371_v51  ;;  %v2091_v17 = vpop.f32.mrb[24].mxu1 }
 0x118   :  { %v995_v52 = vpop.f32.mrb[25].mxu1 }
 0x119   :  { %v2092_v53 = vpop.f32.mrb[26].mxu1 }
 0x11a   :  { %v2157_v54 = vpop.f32.mrb[24].mxu0  ;;  %v998_v55 = vpop.f32.mrb[27].mxu1 }
 0x11b   :  { %v1392_v7 = vadd.f32 %v2157_v54, %v2091_v17  ;;  %v1383_v57 = vpop.f32.mrb[25].mxu0 }
 0x11c   :  { %v1384_v58 = vadd.f32 %v1383_v57, %v995_v52  ;;  %v2158_v59 = vpop.f32.mrb[26].mxu0 }
 0x11d   :  { %1569 = vst.msk [vmem:[%s3132_s8 + $0xd0] sm:$0xff] %vm1542_vm2, %v1392_v7  ;;  %v1395_v60 = vadd.f32 %v2158_v59, %v2092_v53  ;;  %v1386_v61 = vpop.f32.mrb[27].mxu0 }
 0x11e   :  { %1567 = vst.msk [vmem:[%s3132_s8 + $0xc0] sm:$0xff] %vm1542_vm2, %v1384_v58  ;;  %v1387_v62 = vadd.f32 %v1386_v61, %v998_v55 }
 0x11f   :  { %1570 = vst.msk [vmem:[%s3132_s8 + $0xd8] sm:$0xff] %vm1542_vm2, %v1395_v60 }
 0x120   :  { %1568 = vst.msk [vmem:[%s3132_s8 + $0xc8] sm:$0xff] %vm1542_vm2, %v1387_v62  ;;  %v2095_v63 = vpop.f32.mrb[28].mxu1 }
 0x121   :  { %v1011_v0 = vpop.f32.mrb[29].mxu1 }
 0x122   :  { %v2096_v2 = vpop.f32.mrb[30].mxu1 }
 0x123   :  { %v2161_v3 = vpop.f32.mrb[28].mxu0  ;;  %v1014_v4 = vpop.f32.mrb[31].mxu1 }
 0x124   :  { %v1408_v5 = vadd.f32 %v2161_v3, %v2095_v63  ;;  %v1399_v6 = vpop.f32.mrb[29].mxu0 }
 0x125   :  { %v1400_v9 = vadd.f32 %v1399_v6, %v1011_v0  ;;  %v2162_v11 = vpop.f32.mrb[30].mxu0 }
 0x126   :  { %1573 = vst.msk [vmem:[%s3132_s8 + $0xf0] sm:$0xff] %vm1542_vm2, %v1408_v5  ;;  %v1411_v12 = vadd.f32 %v2162_v11, %v2096_v2  ;;  %v1402_v13 = vpop.f32.mrb[31].mxu0 }
 0x127   :  { %1571 = vst.msk [vmem:[%s3132_s8 + $0xe0] sm:$0xff] %vm1542_vm2, %v1400_v9  ;;  %v1403_v14 = vadd.f32 %v1402_v13, %v1014_v4 }
 0x128   :  { %1574 = vst.msk [vmem:[%s3132_s8 + $0xf8] sm:$0xff] %vm1542_vm2, %v1411_v12 }
 0x129   :  { %1572 = vst.msk [vmem:[%s3132_s8 + $0xe8] sm:$0xff] %vm1542_vm2, %v1403_v14  ;;  %v2099_v15 = vpop.f32.mrb[32].mxu1 }
 0x12a   :  { %v1027_v16 = vpop.f32.mrb[33].mxu1 }
 0x12b   :  { %v2100_v18 = vpop.f32.mrb[34].mxu1 }
 0x12c   :  { %v2165_v19 = vpop.f32.mrb[32].mxu0  ;;  %v1030_v20 = vpop.f32.mrb[35].mxu1 }
 0x12d   :  { %v1424_v21 = vadd.f32 %v2165_v19, %v2099_v15  ;;  %v1415_v22 = vpop.f32.mrb[33].mxu0 }
 0x12e   :  { %v1416_v23 = vadd.f32 %v1415_v22, %v1027_v16  ;;  %v2166_v24 = vpop.f32.mrb[34].mxu0 }
 0x12f   :  { %1577 = vst.msk [vmem:[%s3132_s8 + $0x110] sm:$0xff] %vm1542_vm2, %v1424_v21  ;;  %v1427_v25 = vadd.f32 %v2166_v24, %v2100_v18  ;;  %v1418_v26 = vpop.f32.mrb[35].mxu0 }
 0x130   :  { %1575 = vst.msk [vmem:[%s3132_s8 + $0x100] sm:$0xff] %vm1542_vm2, %v1416_v23  ;;  %v1419_v27 = vadd.f32 %v1418_v26, %v1030_v20 }
 0x131   :  { %1578 = vst.msk [vmem:[%s3132_s8 + $0x118] sm:$0xff] %vm1542_vm2, %v1427_v25 }
 0x132   :  { %1576 = vst.msk [vmem:[%s3132_s8 + $0x108] sm:$0xff] %vm1542_vm2, %v1419_v27  ;;  %v2103_v28 = vpop.f32.mrb[36].mxu1 }
 0x133   :  { %v1043_v29 = vpop.f32.mrb[37].mxu1 }
 0x134   :  { %v2104_v30 = vpop.f32.mrb[38].mxu1 }
 0x135   :  { %v2169_v31 = vpop.f32.mrb[36].mxu0  ;;  %v1046_v32 = vpop.f32.mrb[39].mxu1 }
 0x136   :  { %v1440_v33 = vadd.f32 %v2169_v31, %v2103_v28  ;;  %v1431_v34 = vpop.f32.mrb[37].mxu0 }
 0x137   :  { %v1432_v35 = vadd.f32 %v1431_v34, %v1043_v29  ;;  %v2170_v36 = vpop.f32.mrb[38].mxu0 }
 0x138   :  { %1581 = vst.msk [vmem:[%s3132_s8 + $0x130] sm:$0xff] %vm1542_vm2, %v1440_v33  ;;  %v1443_v37 = vadd.f32 %v2170_v36, %v2104_v30  ;;  %v1434_v38 = vpop.f32.mrb[39].mxu0 }
 0x139   :  { %1579 = vst.msk [vmem:[%s3132_s8 + $0x120] sm:$0xff] %vm1542_vm2, %v1432_v35  ;;  %v1435_v39 = vadd.f32 %v1434_v38, %v1046_v32 }
 0x13a   :  { %1582 = vst.msk [vmem:[%s3132_s8 + $0x138] sm:$0xff] %vm1542_vm2, %v1443_v37 }
 0x13b   :  { %1580 = vst.msk [vmem:[%s3132_s8 + $0x128] sm:$0xff] %vm1542_vm2, %v1435_v39  ;;  %v2107_v1 = vpop.f32.mrb[40].mxu1 }
 0x13c   :  { %v1059_v40 = vpop.f32.mrb[41].mxu1 }
 0x13d   :  { %v2108_v41 = vpop.f32.mrb[42].mxu1 }
 0x13e   :  { %v2173_v42 = vpop.f32.mrb[40].mxu0  ;;  %v1062_v43 = vpop.f32.mrb[43].mxu1 }
 0x13f   :  { %v1456_v44 = vadd.f32 %v2173_v42, %v2107_v1  ;;  %v1447_v45 = vpop.f32.mrb[41].mxu0 }
 0x140   :  { %v1448_v56 = vadd.f32 %v1447_v45, %v1059_v40  ;;  %v2174_v10 = vpop.f32.mrb[42].mxu0 }
 0x141   :  { %1585 = vst.msk [vmem:[%s3132_s8 + $0x150] sm:$0xff] %vm1542_vm2, %v1456_v44  ;;  %v1459_v46 = vadd.f32 %v2174_v10, %v2108_v41  ;;  %v1450_v47 = vpop.f32.mrb[43].mxu0 }
 0x142   :  { %1583 = vst.msk [vmem:[%s3132_s8 + $0x140] sm:$0xff] %vm1542_vm2, %v1448_v56  ;;  %v1451_v48 = vadd.f32 %v1450_v47, %v1062_v43 }
 0x143   :  { %1586 = vst.msk [vmem:[%s3132_s8 + $0x158] sm:$0xff] %vm1542_vm2, %v1459_v46 }
 0x144   :  { %1584 = vst.msk [vmem:[%s3132_s8 + $0x148] sm:$0xff] %vm1542_vm2, %v1451_v48  ;;  %v2111_v49 = vpop.f32.mrb[44].mxu1 }
 0x145   :  { %v1075_v8 = vpop.f32.mrb[45].mxu1 }
 0x146   :  { %v2112_v50 = vpop.f32.mrb[46].mxu1 }
 0x147   :  { %v2177_v51 = vpop.f32.mrb[44].mxu0  ;;  %v1078_v17 = vpop.f32.mrb[47].mxu1 }
 0x148   :  { %v1472_v52 = vadd.f32 %v2177_v51, %v2111_v49  ;;  %v1463_v53 = vpop.f32.mrb[45].mxu0 }
 0x149   :  { %v1464_v54 = vadd.f32 %v1463_v53, %v1075_v8  ;;  %v2178_v55 = vpop.f32.mrb[46].mxu0 }
 0x14a   :  { %1589 = vst.msk [vmem:[%s3132_s8 + $0x170] sm:$0xff] %vm1542_vm2, %v1472_v52  ;;  %v1475_v7 = vadd.f32 %v2178_v55, %v2112_v50  ;;  %v1466_v57 = vpop.f32.mrb[47].mxu0 }
 0x14b   :  { %1587 = vst.msk [vmem:[%s3132_s8 + $0x160] sm:$0xff] %vm1542_vm2, %v1464_v54  ;;  %v1467_v58 = vadd.f32 %v1466_v57, %v1078_v17 }
 0x14c   :  { %1590 = vst.msk [vmem:[%s3132_s8 + $0x178] sm:$0xff] %vm1542_vm2, %v1475_v7 }
 0x14d   :  { %1588 = vst.msk [vmem:[%s3132_s8 + $0x168] sm:$0xff] %vm1542_vm2, %v1467_v58  ;;  %v2115_v59 = vpop.f32.mrb[48].mxu1 }
 0x14e   :  { %v1091_v60 = vpop.f32.mrb[49].mxu1 }
 0x14f   :  { %v2116_v61 = vpop.f32.mrb[50].mxu1 }
 0x150   :  { %v2181_v62 = vpop.f32.mrb[48].mxu0  ;;  %v1094_v63 = vpop.f32.mrb[51].mxu1 }
 0x151   :  { %v1488_v0 = vadd.f32 %v2181_v62, %v2115_v59  ;;  %v1479_v2 = vpop.f32.mrb[49].mxu0 }
 0x152   :  { %v1480_v3 = vadd.f32 %v1479_v2, %v1091_v60  ;;  %v2182_v4 = vpop.f32.mrb[50].mxu0 }
 0x153   :  { %1593 = vst.msk [vmem:[%s3132_s8 + $0x190] sm:$0xff] %vm1542_vm2, %v1488_v0  ;;  %v1491_v5 = vadd.f32 %v2182_v4, %v2116_v61  ;;  %v1482_v6 = vpop.f32.mrb[51].mxu0 }
 0x154   :  { %1591 = vst.msk [vmem:[%s3132_s8 + $0x180] sm:$0xff] %vm1542_vm2, %v1480_v3  ;;  %v1483_v9 = vadd.f32 %v1482_v6, %v1094_v63 }
 0x155   :  { %1594 = vst.msk [vmem:[%s3132_s8 + $0x198] sm:$0xff] %vm1542_vm2, %v1491_v5 }
 0x156   :  { %1592 = vst.msk [vmem:[%s3132_s8 + $0x188] sm:$0xff] %vm1542_vm2, %v1483_v9  ;;  %v2119_v11 = vpop.f32.mrb[52].mxu1 }
 0x157   :  { %v1107_v12 = vpop.f32.mrb[53].mxu1 }
 0x158   :  { %v2120_v13 = vpop.f32.mrb[54].mxu1 }
 0x159   :  { %v2185_v14 = vpop.f32.mrb[52].mxu0  ;;  %v1110_v15 = vpop.f32.mrb[55].mxu1 }
 0x15a   :  { %v1504_v16 = vadd.f32 %v2185_v14, %v2119_v11  ;;  %v1495_v18 = vpop.f32.mrb[53].mxu0 }
 0x15b   :  { %v1496_v19 = vadd.f32 %v1495_v18, %v1107_v12  ;;  %v2186_v20 = vpop.f32.mrb[54].mxu0 }
 0x15c   :  { %1597 = vst.msk [vmem:[%s3132_s8 + $0x1b0] sm:$0xff] %vm1542_vm2, %v1504_v16  ;;  %v1507_v21 = vadd.f32 %v2186_v20, %v2120_v13  ;;  %v1498_v22 = vpop.f32.mrb[55].mxu0 }
 0x15d   :  { %1595 = vst.msk [vmem:[%s3132_s8 + $0x1a0] sm:$0xff] %vm1542_vm2, %v1496_v19  ;;  %v1499_v23 = vadd.f32 %v1498_v22, %v1110_v15 }
 0x15e   :  { %1598 = vst.msk [vmem:[%s3132_s8 + $0x1b8] sm:$0xff] %vm1542_vm2, %v1507_v21 }
 0x15f   :  { %1596 = vst.msk [vmem:[%s3132_s8 + $0x1a8] sm:$0xff] %vm1542_vm2, %v1499_v23  ;;  %v2123_v24 = vpop.f32.mrb[56].mxu1 }
 0x160   :  { %v1123_v25 = vpop.f32.mrb[57].mxu1 }
 0x161   :  { %v2124_v26 = vpop.f32.mrb[58].mxu1 }
 0x162   :  { %v2189_v27 = vpop.f32.mrb[56].mxu0  ;;  %v1126_v28 = vpop.f32.mrb[59].mxu1 }
 0x163   :  { %v1520_v29 = vadd.f32 %v2189_v27, %v2123_v24  ;;  %v1511_v30 = vpop.f32.mrb[57].mxu0 }
 0x164   :  { %v1512_v31 = vadd.f32 %v1511_v30, %v1123_v25  ;;  %v2190_v32 = vpop.f32.mrb[58].mxu0 }
 0x165   :  { %1601 = vst.msk [vmem:[%s3132_s8 + $0x1d0] sm:$0xff] %vm1542_vm2, %v1520_v29  ;;  %v1523_v33 = vadd.f32 %v2190_v32, %v2124_v26  ;;  %v1514_v34 = vpop.f32.mrb[59].mxu0 }
 0x166   :  { %1599 = vst.msk [vmem:[%s3132_s8 + $0x1c0] sm:$0xff] %vm1542_vm2, %v1512_v31  ;;  %v1515_v35 = vadd.f32 %v1514_v34, %v1126_v28 }
 0x167   :  { %1602 = vst.msk [vmem:[%s3132_s8 + $0x1d8] sm:$0xff] %vm1542_vm2, %v1523_v33 }
 0x168   :  { %1600 = vst.msk [vmem:[%s3132_s8 + $0x1c8] sm:$0xff] %vm1542_vm2, %v1515_v35  ;;  %v2127_v36 = vpop.f32.mrb[60].mxu1 }
 0x169   :  { %v1139_v37 = vpop.f32.mrb[61].mxu1 }
 0x16a   :  { %v2128_v38 = vpop.f32.mrb[62].mxu1 }
 0x16b   :  { %v2193_v39 = vpop.f32.mrb[60].mxu0  ;;  %v1142_v1 = vpop.f32.mrb[63].mxu1 }
 0x16c   :  { %v1536_v40 = vadd.f32 %v2193_v39, %v2127_v36  ;;  %v1527_v41 = vpop.f32.mrb[61].mxu0 }
 0x16d   :  { %v1528_v42 = vadd.f32 %v1527_v41, %v1139_v37  ;;  %v2194_v43 = vpop.f32.mrb[62].mxu0 }
 0x16e   :  { %1605 = vst.msk [vmem:[%s3132_s8 + $0x1f0] sm:$0xff] %vm1542_vm2, %v1536_v40  ;;  %v1539_v44 = vadd.f32 %v2194_v43, %v2128_v38  ;;  %v1530_v45 = vpop.f32.mrb[63].mxu0 }
 0x16f   :  { %1603 = vst.msk [vmem:[%s3132_s8 + $0x1e0] sm:$0xff] %vm1542_vm2, %v1528_v42  ;;  %v1531_v56 = vadd.f32 %v1530_v45, %v1142_v1 }
 0x170   :  { %1606 = vst.msk [vmem:[%s3132_s8 + $0x1f8] sm:$0xff] %vm1542_vm2, %v1539_v44 }
 0x171   :  { %1604 = vst.msk [vmem:[%s3132_s8 + $0x1e8] sm:$0xff] %vm1542_vm2, %v1531_v56 }

</bundles_post_ra>
